<compile_context>
chip_gen: v7x
topology: tpu7x:2x2x1
jax: 0.10.0
libtpu: 0.0.40
codegen_flags: <defaults>
</compile_context>

<pallas_src>
import functools

import numpy as np
import jax
import jax.numpy as jnp
from jax.experimental import pallas as pl
from jax.experimental.pallas import tpu as pltpu

EPSILON = float(np.finfo(np.float32).tiny)


def _dknn_kernel(qn2_ref, qq_ref, nt_ref, nn_ref, topk_ref, *score_out, k, tau):
    """One query tile against all neighbors.

    qn2_ref : (TQ, D)  -2 * query tile (scale folded into the MXU LHS)
    qq_ref  : (TQ, 1)  precomputed ||q||^2 (hoisted to the wrapper)
    nt_ref  : (D,  N)  neighbors pre-transposed (lane-dense over N, K-major MXU RHS)
    nn_ref  : (1,  N)  precomputed ||n||^2 (hoisted to the wrapper)
    """
    qn2 = qn2_ref[...]
    nt = nt_ref[...]

    # d2 = ||q||^2 + ||n||^2 - 2 q.n ; the -2 is pre-folded, cross term on the MXU.
    dots = jnp.dot(qn2, nt, preferred_element_type=jnp.float32)     # (TQ, N) == -2 q.n
    d2 = jnp.maximum(qq_ref[...] + nn_ref[...] + dots, 0.0)
    scores = -jnp.sqrt(d2)
    if score_out:                        # `extra` output is optional
        score_out[0][...] = scores

    # Relaxed top-k: k rounds of masked softmax. Single exp up front; the log-domain
    # mask is carried multiplicatively inside `e` (e <- e * max(1 - onehot, eps)^(1/tau)),
    # so per round: one lane-reduce (XLU), one approx reciprocal (EUP), two VPU muls.
    inv_tau = 1.0 / float(tau)
    z = scores - jnp.max(scores, axis=-1, keepdims=True)
    if inv_tau != 1.0:
        z = z * inv_tau
    e = jnp.exp(z)
    khot = jnp.zeros_like(scores)
    for i in range(k):                   # k is static -> fully unrolled
        # Floor the denominator so a fully-underflowed row cannot produce inf/NaN.
        denom = jnp.maximum(jnp.sum(e, axis=-1, keepdims=True), EPSILON)
        onehot = e * pl.reciprocal(denom, approx=True)
        khot = khot + onehot
        if i + 1 < k:                    # last round's mask update is dead work
            m = jnp.maximum(1.0 - onehot, EPSILON)
            if inv_tau != 1.0:
                m = m ** inv_tau         # == exp(log(mask)/tau) of the log-domain form
            e = e * m

    topk_ref[...] = khot


def _round_up(x, m):
    return ((x + m - 1) // m) * m


def _est_vmem_bytes(tile_q, D, N, single_buffer_const, return_scores):
    """Rough VMEM footprint: lane/sublane-padded pipeline I/O buffers + in-kernel
    working set of the unrolled k-round loop (scores / e / onehot / khot + temps)."""
    tq = _round_up(tile_q, 8)
    dl = _round_up(D, 128)        # lane-padded feature dim for (TQ, D) blocks
    ds = _round_up(D, 8)          # sublane-padded feature dim for the (D, N) block
    npad = _round_up(N, 128)
    cbuf = 1 if single_buffer_const else 2
    io = (2 * tq * dl             # -2*q tile (double buffered)
          + 2 * tq * 128          # ||q||^2 tile
          + cbuf * ds * npad      # neighbors^T (D, N), constant across the grid
          + cbuf * 8 * npad       # ||n||^2 (1, N)
          + 2 * tq * npad         # top_k output
          + (2 * tq * npad if return_scores else 0))
    work = 6 * tq * npad          # unrolled k-loop live arrays / temporaries
    return 4 * (io + work) + (2 << 20)


def subsets_dknn(query, neighbors, *, k, tau=1.0, tile_q=128, return_scores=True):
    """Returns (top_k, extra) with shapes ((Q, N), (Q, N)); extra is None when
    return_scores=False (halves the HBM writeback for memory-bound shapes)."""
    Q, D = query.shape
    N, Dn = neighbors.shape
    assert D == Dn

    # Per-generation VMEM budget / TensorCore count.
    try:
        vmem_cap = int(pltpu.get_tpu_info().vmem_capacity_bytes)
    except Exception:
        vmem_cap = 128 << 20
    # TODO(synk): infer TC count from VMEM size (v7x: 64 MiB/TC, 2 TCs; v5e/v6e:
    #             128 MiB, 1 TC); query it directly once TpuInfo exposes core count.
    num_tc = 2 if vmem_cap <= (64 << 20) else 1
    budget = int(0.75 * vmem_cap)

    # Query tile: as large as possible (128 matches MXU rows), and a divisor of Q.
    tile_q = min(tile_q, Q)
    if Q % tile_q != 0:
        cands = [t for t in range(tile_q, 0, -1)
                 if Q % t == 0 and (t % 8 == 0 or t == Q)]
        tile_q = cands[0] if cands else Q
    # Only split into >=2 grid steps on multi-TC chips (v7x), where the "parallel"
    # axis shards steps across TCs; on v5e/v6e a split just adds per-step overhead.
    if num_tc >= 2 and Q // tile_q < 2 and Q >= 16 and (Q // 2) % 8 == 0:
        tile_q = Q // 2
    # Shrink tile_q (halving, staying a multiple of 8 dividing Q) until the estimate
    # fits the per-generation budget.
    while (_est_vmem_bytes(tile_q, D, N, True, return_scores) > budget
           and tile_q % 2 == 0 and (tile_q // 2) % 8 == 0):
        tile_q //= 2
    assert Q % tile_q == 0 and (tile_q % 8 == 0 or tile_q == Q)

    f32 = jnp.float32
    qn2 = query.astype(f32) * (-2.0)                               # fold -2 into MXU LHS
    qq = jnp.sum(query.astype(f32) ** 2, axis=-1, keepdims=True)   # (Q, 1)
    nt = neighbors.astype(f32).T                                   # (D, N) lane-dense
    nn = jnp.sum(neighbors.astype(f32) ** 2, axis=-1)[None, :]     # (1, N)

    est = _est_vmem_bytes(tile_q, D, N, True, return_scores)
    vmem_limit = int(min(max(est, 32 << 20), budget))

    kernel = functools.partial(_dknn_kernel, k=k, tau=tau)
    out_shape = [jax.ShapeDtypeStruct((Q, N), f32)]
    if return_scores:
        out_shape.append(jax.ShapeDtypeStruct((Q, N), f32))

    def build(single_buffer_const):
        cmode = {"pipeline_mode": pl.Buffered(1)} if single_buffer_const else {}
        out_spec = pl.BlockSpec((tile_q, N), lambda i: (i, 0))
        return pl.pallas_call(
            kernel,
            out_shape=tuple(out_shape),
            grid_spec=pltpu.PrefetchScalarGridSpec(
                num_scalar_prefetch=0,
                grid=(Q // tile_q,),
                in_specs=[
                    pl.BlockSpec((tile_q, D), lambda i: (i, 0)),      # -2 * q tile
                    pl.BlockSpec((tile_q, 1), lambda i: (i, 0)),      # ||q||^2 tile
                    pl.BlockSpec((D, N), lambda i: (0, 0), **cmode),  # neighbors^T
                    pl.BlockSpec((1, N), lambda i: (0, 0), **cmode),  # ||n||^2
                ],
                out_specs=tuple(out_spec for _ in out_shape),
            ),
            compiler_params=pltpu.CompilerParams(
                dimension_semantics=("parallel",),
                vmem_limit_bytes=vmem_limit),
        )

    try:
        outs = build(True)(qn2, qq, nt, nn)
    except Exception:
        # TODO(synk): pl.Buffered(1) (single-buffered constant inputs) unsupported on
        #             this jax version; fall back to default double buffering.
        outs = build(False)(qn2, qq, nt, nn)

    if return_scores:
        return outs[0], outs[1]
    return outs[0], None


def _reference(query, neighbors, *, k, tau=1.0):
    d = jnp.sqrt(jnp.maximum(
        jnp.sum(query ** 2, -1, keepdims=True)
        + jnp.sum(neighbors ** 2, -1)[None, :]
        - 2.0 * query @ neighbors.T, 0.0))
    s = -d
    onehot = jnp.zeros_like(s)
    khot = jnp.zeros_like(s)
    for _ in range(k):
        s = s + jnp.log(jnp.maximum(1.0 - onehot, EPSILON))
        onehot = jax.nn.softmax(s / tau, axis=-1)
        khot = khot + onehot
    return khot, -d


if __name__ == "__main__":
    key = jax.random.PRNGKey(0)
    kq, kn = jax.random.split(key)
    Q, N, D, K = 128, 128, 32, 5
    query = jax.random.normal(kq, (Q, D), dtype=jnp.float32)
    neighbors = jax.random.normal(kn, (N, D), dtype=jnp.float32)

    top_k, extra = subsets_dknn(query, neighbors, k=K, tau=1.0)
    jax.block_until_ready(top_k)
    jax.block_until_ready(extra)

    ref_topk, ref_scores = _reference(query, neighbors, k=K, tau=1.0)
    np.testing.assert_allclose(np.asarray(extra), np.asarray(ref_scores),
                               rtol=1e-4, atol=1e-4)
    np.testing.assert_allclose(np.asarray(top_k), np.asarray(ref_topk),
                               rtol=2e-3, atol=2e-3)
    # each row of the relaxed k-hot sums to ~k
    np.testing.assert_allclose(np.asarray(top_k).sum(-1), np.full((Q,), float(K)),
                               rtol=2e-3, atol=2e-3)
    assert top_k.shape == (Q, N) and extra.shape == (Q, N)
    print("KERNEL_OK")
</pallas_src>

<mosaic_0001>
module attributes {stable_mosaic.version = 11 : i64} {
  func.func @_dknn_kernel(%arg0: i32, %arg1: memref<128x32xf32, #tpu.memory_space<vmem>>, %arg2: memref<128x1xf32, #tpu.memory_space<vmem>>, %arg3: memref<32x128xf32, #tpu.memory_space<vmem>>, %arg4: memref<1x128xf32, #tpu.memory_space<vmem>>, %arg5: memref<128x128xf32, #tpu.memory_space<vmem>>, %arg6: memref<128x128xf32, #tpu.memory_space<vmem>>) attributes {dimension_semantics = [#tpu.dimension_semantics<parallel>], iteration_bounds = array<i64: 1>, scalar_prefetch = 0 : i64, scratch_operands = 0 : i64, tpu.core_type = #tpu.core_type<tc>, window_params = [{transform_indices = @transform_0, window_bounds = array<i64: 128, 32>}, {transform_indices = @transform_1, window_bounds = array<i64: 128, 1>}, {pipeline_mode = #tpu.pipeline_mode<synchronous>, transform_indices = @transform_2, window_bounds = array<i64: 32, 128>}, {pipeline_mode = #tpu.pipeline_mode<synchronous>, transform_indices = @transform_3, window_bounds = array<i64: 1, 128>}, {transform_indices = @transform_4, window_bounds = array<i64: 128, 128>}, {transform_indices = @transform_5, window_bounds = array<i64: 128, 128>}]} {
    %c0 = arith.constant 0 : index
    %c0_0 = arith.constant 0 : index
    %0 = vector.load %arg1[%c0, %c0_0] : memref<128x32xf32, #tpu.memory_space<vmem>>, vector<128x32xf32>
    %c0_1 = arith.constant 0 : index
    %c0_2 = arith.constant 0 : index
    %1 = vector.load %arg3[%c0_1, %c0_2] : memref<32x128xf32, #tpu.memory_space<vmem>>, vector<32x128xf32>
    %cst = arith.constant dense<0.000000e+00> : vector<128x128xf32>
    %2 = tpu.matmul %0, %1, %cst {dimension_numbers = #tpu.dot_dimension_numbers<[1], [0], [0], [1], [0, 0, 1, 1], [], []>} : vector<128x32xf32>, vector<32x128xf32>, vector<128x128xf32> -> vector<128x128xf32>
    %c0_3 = arith.constant 0 : index
    %c0_4 = arith.constant 0 : index
    %3 = vector.load %arg2[%c0_3, %c0_4] : memref<128x1xf32, #tpu.memory_space<vmem>>, vector<128x1xf32>
    %c0_5 = arith.constant 0 : index
    %c0_6 = arith.constant 0 : index
    %4 = vector.load %arg4[%c0_5, %c0_6] : memref<1x128xf32, #tpu.memory_space<vmem>>, vector<1x128xf32>
    %5 = vector.broadcast %3 : vector<128x1xf32> to vector<128x128xf32>
    %6 = vector.broadcast %4 : vector<1x128xf32> to vector<128x128xf32>
    %7 = arith.addf %5, %6 : vector<128x128xf32>
    %8 = arith.addf %7, %2 : vector<128x128xf32>
    %cst_7 = arith.constant 0.000000e+00 : f32
    %9 = vector.broadcast %cst_7 : f32 to vector<128x128xf32>
    %10 = arith.maximumf %8, %9 : vector<128x128xf32>
    %11 = math.sqrt %10 : vector<128x128xf32>
    %cst_8 = arith.constant 0.000000e+00 : f32
    %12 = vector.broadcast %cst_8 : f32 to vector<128x128xf32>
    %13 = arith.subf %12, %11 : vector<128x128xf32>
    %c0_9 = arith.constant 0 : index
    %c0_10 = arith.constant 0 : index
    %14 = vector.load %arg6[%c0_9, %c0_10] : memref<128x128xf32, #tpu.memory_space<vmem>>, vector<128x128xf32>
    tpu.vector_store %arg6[%c0_9, %c0_10], %13 {strides = array<i32>} : memref<128x128xf32, #tpu.memory_space<vmem>>, vector<128x128xf32>,
    %cst_11 = arith.constant dense<0xFF800000> : vector<128xf32>
    %15 = vector.multi_reduction <maximumf>, %13, %cst_11 [1] : vector<128x128xf32> to vector<128xf32>
    %16 = vector.shape_cast %15 : vector<128xf32> to vector<128x1xf32>
    %17 = vector.broadcast %16 : vector<128x1xf32> to vector<128x128xf32>
    %18 = arith.subf %13, %17 : vector<128x128xf32>
    %19 = math.exp %18 : vector<128x128xf32>
    %cst_12 = arith.constant 0.000000e+00 : f32
    %20 = vector.broadcast %cst_12 : f32 to vector<128x128xf32>
    %cst_13 = arith.constant dense<0.000000e+00> : vector<128xf32>
    %21 = vector.multi_reduction <add>, %19, %cst_13 [1] : vector<128x128xf32> to vector<128xf32>
    %22 = vector.shape_cast %21 : vector<128xf32> to vector<128x1xf32>
    %cst_14 = arith.constant 1.17549435E-38 : f32
    %23 = vector.broadcast %cst_14 : f32 to vector<128x1xf32>
    %24 = arith.maximumf %22, %23 : vector<128x1xf32>
    %25 = tpu.reciprocal %24 {approx = true} : vector<128x1xf32> -> vector<128x1xf32>
    %26 = vector.broadcast %25 : vector<128x1xf32> to vector<128x128xf32>
    %27 = arith.mulf %19, %26 : vector<128x128xf32>
    %28 = arith.addf %20, %27 : vector<128x128xf32>
    %cst_15 = arith.constant 1.000000e+00 : f32
    %29 = vector.broadcast %cst_15 : f32 to vector<128x128xf32>
    %30 = arith.subf %29, %27 : vector<128x128xf32>
    %cst_16 = arith.constant 1.17549435E-38 : f32
    %31 = vector.broadcast %cst_16 : f32 to vector<128x128xf32>
    %32 = arith.maximumf %30, %31 : vector<128x128xf32>
    %33 = arith.mulf %19, %32 : vector<128x128xf32>
    %cst_17 = arith.constant dense<0.000000e+00> : vector<128xf32>
    %34 = vector.multi_reduction <add>, %33, %cst_17 [1] : vector<128x128xf32> to vector<128xf32>
    %35 = vector.shape_cast %34 : vector<128xf32> to vector<128x1xf32>
    %cst_18 = arith.constant 1.17549435E-38 : f32
    %36 = vector.broadcast %cst_18 : f32 to vector<128x1xf32>
    %37 = arith.maximumf %35, %36 : vector<128x1xf32>
    %38 = tpu.reciprocal %37 {approx = true} : vector<128x1xf32> -> vector<128x1xf32>
    %39 = vector.broadcast %38 : vector<128x1xf32> to vector<128x128xf32>
    %40 = arith.mulf %33, %39 : vector<128x128xf32>
    %41 = arith.addf %28, %40 : vector<128x128xf32>
    %cst_19 = arith.constant 1.000000e+00 : f32
    %42 = vector.broadcast %cst_19 : f32 to vector<128x128xf32>
    %43 = arith.subf %42, %40 : vector<128x128xf32>
    %cst_20 = arith.constant 1.17549435E-38 : f32
    %44 = vector.broadcast %cst_20 : f32 to vector<128x128xf32>
    %45 = arith.maximumf %43, %44 : vector<128x128xf32>
    %46 = arith.mulf %33, %45 : vector<128x128xf32>
    %cst_21 = arith.constant dense<0.000000e+00> : vector<128xf32>
    %47 = vector.multi_reduction <add>, %46, %cst_21 [1] : vector<128x128xf32> to vector<128xf32>
    %48 = vector.shape_cast %47 : vector<128xf32> to vector<128x1xf32>
    %cst_22 = arith.constant 1.17549435E-38 : f32
    %49 = vector.broadcast %cst_22 : f32 to vector<128x1xf32>
    %50 = arith.maximumf %48, %49 : vector<128x1xf32>
    %51 = tpu.reciprocal %50 {approx = true} : vector<128x1xf32> -> vector<128x1xf32>
    %52 = vector.broadcast %51 : vector<128x1xf32> to vector<128x128xf32>
    %53 = arith.mulf %46, %52 : vector<128x128xf32>
    %54 = arith.addf %41, %53 : vector<128x128xf32>
    %cst_23 = arith.constant 1.000000e+00 : f32
    %55 = vector.broadcast %cst_23 : f32 to vector<128x128xf32>
    %56 = arith.subf %55, %53 : vector<128x128xf32>
    %cst_24 = arith.constant 1.17549435E-38 : f32
    %57 = vector.broadcast %cst_24 : f32 to vector<128x128xf32>
    %58 = arith.maximumf %56, %57 : vector<128x128xf32>
    %59 = arith.mulf %46, %58 : vector<128x128xf32>
    %cst_25 = arith.constant dense<0.000000e+00> : vector<128xf32>
    %60 = vector.multi_reduction <add>, %59, %cst_25 [1] : vector<128x128xf32> to vector<128xf32>
    %61 = vector.shape_cast %60 : vector<128xf32> to vector<128x1xf32>
    %cst_26 = arith.constant 1.17549435E-38 : f32
    %62 = vector.broadcast %cst_26 : f32 to vector<128x1xf32>
    %63 = arith.maximumf %61, %62 : vector<128x1xf32>
    %64 = tpu.reciprocal %63 {approx = true} : vector<128x1xf32> -> vector<128x1xf32>
    %65 = vector.broadcast %64 : vector<128x1xf32> to vector<128x128xf32>
    %66 = arith.mulf %59, %65 : vector<128x128xf32>
    %67 = arith.addf %54, %66 : vector<128x128xf32>
    %cst_27 = arith.constant 1.000000e+00 : f32
    %68 = vector.broadcast %cst_27 : f32 to vector<128x128xf32>
    %69 = arith.subf %68, %66 : vector<128x128xf32>
    %cst_28 = arith.constant 1.17549435E-38 : f32
    %70 = vector.broadcast %cst_28 : f32 to vector<128x128xf32>
    %71 = arith.maximumf %69, %70 : vector<128x128xf32>
    %72 = arith.mulf %59, %71 : vector<128x128xf32>
    %cst_29 = arith.constant dense<0.000000e+00> : vector<128xf32>
    %73 = vector.multi_reduction <add>, %72, %cst_29 [1] : vector<128x128xf32> to vector<128xf32>
    %74 = vector.shape_cast %73 : vector<128xf32> to vector<128x1xf32>
    %cst_30 = arith.constant 1.17549435E-38 : f32
    %75 = vector.broadcast %cst_30 : f32 to vector<128x1xf32>
    %76 = arith.maximumf %74, %75 : vector<128x1xf32>
    %77 = tpu.reciprocal %76 {approx = true} : vector<128x1xf32> -> vector<128x1xf32>
    %78 = vector.broadcast %77 : vector<128x1xf32> to vector<128x128xf32>
    %79 = arith.mulf %72, %78 : vector<128x128xf32>
    %80 = arith.addf %67, %79 : vector<128x128xf32>
    %c0_31 = arith.constant 0 : index
    %c0_32 = arith.constant 0 : index
    %81 = vector.load %arg5[%c0_31, %c0_32] : memref<128x128xf32, #tpu.memory_space<vmem>>, vector<128x128xf32>
    tpu.vector_store %arg5[%c0_31, %c0_32], %80 {strides = array<i32>} : memref<128x128xf32, #tpu.memory_space<vmem>>, vector<128x128xf32>,
    return
  }
  func.func @transform_0(%arg0: i32) -> (i32, i32) {
    %c0_i32 = arith.constant 0 : i32
    %c0_i32_0 = arith.constant 0 : i32
    return %arg0, %c0_i32 : i32, i32
  }
  func.func @transform_1(%arg0: i32) -> (i32, i32) {
    %c0_i32 = arith.constant 0 : i32
    %c0_i32_0 = arith.constant 0 : i32
    return %arg0, %c0_i32 : i32, i32
  }
  func.func @transform_2(%arg0: i32) -> (i32, i32) {
    %c0_i32 = arith.constant 0 : i32
    %c0_i32_0 = arith.constant 0 : i32
    %c0_i32_1 = arith.constant 0 : i32
    return %c0_i32, %c0_i32_0 : i32, i32
  }
  func.func @transform_3(%arg0: i32) -> (i32, i32) {
    %c0_i32 = arith.constant 0 : i32
    %c0_i32_0 = arith.constant 0 : i32
    %c0_i32_1 = arith.constant 0 : i32
    return %c0_i32, %c0_i32_0 : i32, i32
  }
  func.func @transform_4(%arg0: i32) -> (i32, i32) {
    %c0_i32 = arith.constant 0 : i32
    %c0_i32_0 = arith.constant 0 : i32
    return %arg0, %c0_i32 : i32, i32
  }
  func.func @transform_5(%arg0: i32) -> (i32, i32) {
    %c0_i32 = arith.constant 0 : i32
    %c0_i32_0 = arith.constant 0 : i32
    return %arg0, %c0_i32 : i32, i32
  }
}

module attributes {stable_mosaic.version = 11 : i64} {
  func.func @_dknn_kernel(%arg0: i32, %arg1: memref<128x32xf32, #tpu.memory_space<vmem>>, %arg2: memref<128x1xf32, #tpu.memory_space<vmem>>, %arg3: memref<32x128xf32, #tpu.memory_space<vmem>>, %arg4: memref<1x128xf32, #tpu.memory_space<vmem>>, %arg5: memref<128x128xf32, #tpu.memory_space<vmem>>, %arg6: memref<128x128xf32, #tpu.memory_space<vmem>>) attributes {dimension_semantics = [#tpu.dimension_semantics<parallel>], iteration_bounds = array<i64: 1>, scalar_prefetch = 0 : i64, scratch_operands = 0 : i64, tpu.core_type = #tpu.core_type<tc>, window_params = [{transform_indices = @transform_0, window_bounds = array<i64: 128, 32>}, {transform_indices = @transform_1, window_bounds = array<i64: 128, 1>}, {pipeline_mode = #tpu.pipeline_mode<synchronous>, transform_indices = @transform_2, window_bounds = array<i64: 32, 128>}, {pipeline_mode = #tpu.pipeline_mode<synchronous>, transform_indices = @transform_3, window_bounds = array<i64: 1, 128>}, {transform_indices = @transform_4, window_bounds = array<i64: 128, 128>}, {transform_indices = @transform_5, window_bounds = array<i64: 128, 128>}]} {
    %c0 = arith.constant 0 : index
    %c0_0 = arith.constant 0 : index
    %0 = vector.load %arg1[%c0, %c0_0] : memref<128x32xf32, #tpu.memory_space<vmem>>, vector<128x32xf32>
    %c0_1 = arith.constant 0 : index
    %c0_2 = arith.constant 0 : index
    %1 = vector.load %arg3[%c0_1, %c0_2] : memref<32x128xf32, #tpu.memory_space<vmem>>, vector<32x128xf32>
    %cst = arith.constant dense<0.000000e+00> : vector<128x128xf32>
    %2 = tpu.matmul %0, %1, %cst {dimension_numbers = #tpu.dot_dimension_numbers<[1], [0], [0], [1], [0, 0, 1, 1], [], []>} : vector<128x32xf32>, vector<32x128xf32>, vector<128x128xf32> -> vector<128x128xf32>
    %c0_3 = arith.constant 0 : index
    %c0_4 = arith.constant 0 : index
    %3 = vector.load %arg2[%c0_3, %c0_4] : memref<128x1xf32, #tpu.memory_space<vmem>>, vector<128x1xf32>
    %c0_5 = arith.constant 0 : index
    %c0_6 = arith.constant 0 : index
    %4 = vector.load %arg4[%c0_5, %c0_6] : memref<1x128xf32, #tpu.memory_space<vmem>>, vector<1x128xf32>
    %5 = vector.broadcast %3 : vector<128x1xf32> to vector<128x128xf32>
    %6 = vector.broadcast %4 : vector<1x128xf32> to vector<128x128xf32>
    %7 = arith.addf %5, %6 : vector<128x128xf32>
    %8 = arith.addf %7, %2 : vector<128x128xf32>
    %cst_7 = arith.constant 0.000000e+00 : f32
    %9 = vector.broadcast %cst_7 : f32 to vector<128x128xf32>
    %10 = arith.maximumf %8, %9 : vector<128x128xf32>
    %11 = math.sqrt %10 : vector<128x128xf32>
    %cst_8 = arith.constant 0.000000e+00 : f32
    %12 = vector.broadcast %cst_8 : f32 to vector<128x128xf32>
    %13 = arith.subf %12, %11 : vector<128x128xf32>
    %c0_9 = arith.constant 0 : index
    %c0_10 = arith.constant 0 : index
    %14 = vector.load %arg6[%c0_9, %c0_10] : memref<128x128xf32, #tpu.memory_space<vmem>>, vector<128x128xf32>
    tpu.vector_store %arg6[%c0_9, %c0_10], %13 {strides = array<i32>} : memref<128x128xf32, #tpu.memory_space<vmem>>, vector<128x128xf32>,
    %cst_11 = arith.constant dense<0xFF800000> : vector<128xf32>
    %15 = vector.multi_reduction <maximumf>, %13, %cst_11 [1] : vector<128x128xf32> to vector<128xf32>
    %16 = vector.shape_cast %15 : vector<128xf32> to vector<128x1xf32>
    %17 = vector.broadcast %16 : vector<128x1xf32> to vector<128x128xf32>
    %18 = arith.subf %13, %17 : vector<128x128xf32>
    %19 = math.exp %18 : vector<128x128xf32>
    %cst_12 = arith.constant 0.000000e+00 : f32
    %20 = vector.broadcast %cst_12 : f32 to vector<128x128xf32>
    %cst_13 = arith.constant dense<0.000000e+00> : vector<128xf32>
    %21 = vector.multi_reduction <add>, %19, %cst_13 [1] : vector<128x128xf32> to vector<128xf32>
    %22 = vector.shape_cast %21 : vector<128xf32> to vector<128x1xf32>
    %cst_14 = arith.constant 1.17549435E-38 : f32
    %23 = vector.broadcast %cst_14 : f32 to vector<128x1xf32>
    %24 = arith.maximumf %22, %23 : vector<128x1xf32>
    %25 = tpu.reciprocal %24 {approx = true} : vector<128x1xf32> -> vector<128x1xf32>
    %26 = vector.broadcast %25 : vector<128x1xf32> to vector<128x128xf32>
    %27 = arith.mulf %19, %26 : vector<128x128xf32>
    %28 = arith.addf %20, %27 : vector<128x128xf32>
    %cst_15 = arith.constant 1.000000e+00 : f32
    %29 = vector.broadcast %cst_15 : f32 to vector<128x128xf32>
    %30 = arith.subf %29, %27 : vector<128x128xf32>
    %cst_16 = arith.constant 1.17549435E-38 : f32
    %31 = vector.broadcast %cst_16 : f32 to vector<128x128xf32>
    %32 = arith.maximumf %30, %31 : vector<128x128xf32>
    %33 = arith.mulf %19, %32 : vector<128x128xf32>
    %cst_17 = arith.constant dense<0.000000e+00> : vector<128xf32>
    %34 = vector.multi_reduction <add>, %33, %cst_17 [1] : vector<128x128xf32> to vector<128xf32>
    %35 = vector.shape_cast %34 : vector<128xf32> to vector<128x1xf32>
    %cst_18 = arith.constant 1.17549435E-38 : f32
    %36 = vector.broadcast %cst_18 : f32 to vector<128x1xf32>
    %37 = arith.maximumf %35, %36 : vector<128x1xf32>
    %38 = tpu.reciprocal %37 {approx = true} : vector<128x1xf32> -> vector<128x1xf32>
    %39 = vector.broadcast %38 : vector<128x1xf32> to vector<128x128xf32>
    %40 = arith.mulf %33, %39 : vector<128x128xf32>
    %41 = arith.addf %28, %40 : vector<128x128xf32>
    %cst_19 = arith.constant 1.000000e+00 : f32
    %42 = vector.broadcast %cst_19 : f32 to vector<128x128xf32>
    %43 = arith.subf %42, %40 : vector<128x128xf32>
    %cst_20 = arith.constant 1.17549435E-38 : f32
    %44 = vector.broadcast %cst_20 : f32 to vector<128x128xf32>
    %45 = arith.maximumf %43, %44 : vector<128x128xf32>
    %46 = arith.mulf %33, %45 : vector<128x128xf32>
    %cst_21 = arith.constant dense<0.000000e+00> : vector<128xf32>
    %47 = vector.multi_reduction <add>, %46, %cst_21 [1] : vector<128x128xf32> to vector<128xf32>
    %48 = vector.shape_cast %47 : vector<128xf32> to vector<128x1xf32>
    %cst_22 = arith.constant 1.17549435E-38 : f32
    %49 = vector.broadcast %cst_22 : f32 to vector<128x1xf32>
    %50 = arith.maximumf %48, %49 : vector<128x1xf32>
    %51 = tpu.reciprocal %50 {approx = true} : vector<128x1xf32> -> vector<128x1xf32>
    %52 = vector.broadcast %51 : vector<128x1xf32> to vector<128x128xf32>
    %53 = arith.mulf %46, %52 : vector<128x128xf32>
    %54 = arith.addf %41, %53 : vector<128x128xf32>
    %cst_23 = arith.constant 1.000000e+00 : f32
    %55 = vector.broadcast %cst_23 : f32 to vector<128x128xf32>
    %56 = arith.subf %55, %53 : vector<128x128xf32>
    %cst_24 = arith.constant 1.17549435E-38 : f32
    %57 = vector.broadcast %cst_24 : f32 to vector<128x128xf32>
    %58 = arith.maximumf %56, %57 : vector<128x128xf32>
    %59 = arith.mulf %46, %58 : vector<128x128xf32>
    %cst_25 = arith.constant dense<0.000000e+00> : vector<128xf32>
    %60 = vector.multi_reduction <add>, %59, %cst_25 [1] : vector<128x128xf32> to vector<128xf32>
    %61 = vector.shape_cast %60 : vector<128xf32> to vector<128x1xf32>
    %cst_26 = arith.constant 1.17549435E-38 : f32
    %62 = vector.broadcast %cst_26 : f32 to vector<128x1xf32>
    %63 = arith.maximumf %61, %62 : vector<128x1xf32>
    %64 = tpu.reciprocal %63 {approx = true} : vector<128x1xf32> -> vector<128x1xf32>
    %65 = vector.broadcast %64 : vector<128x1xf32> to vector<128x128xf32>
    %66 = arith.mulf %59, %65 : vector<128x128xf32>
    %67 = arith.addf %54, %66 : vector<128x128xf32>
    %cst_27 = arith.constant 1.000000e+00 : f32
    %68 = vector.broadcast %cst_27 : f32 to vector<128x128xf32>
    %69 = arith.subf %68, %66 : vector<128x128xf32>
    %cst_28 = arith.constant 1.17549435E-38 : f32
    %70 = vector.broadcast %cst_28 : f32 to vector<128x128xf32>
    %71 = arith.maximumf %69, %70 : vector<128x128xf32>
    %72 = arith.mulf %59, %71 : vector<128x128xf32>
    %cst_29 = arith.constant dense<0.000000e+00> : vector<128xf32>
    %73 = vector.multi_reduction <add>, %72, %cst_29 [1] : vector<128x128xf32> to vector<128xf32>
    %74 = vector.shape_cast %73 : vector<128xf32> to vector<128x1xf32>
    %cst_30 = arith.constant 1.17549435E-38 : f32
    %75 = vector.broadcast %cst_30 : f32 to vector<128x1xf32>
    %76 = arith.maximumf %74, %75 : vector<128x1xf32>
    %77 = tpu.reciprocal %76 {approx = true} : vector<128x1xf32> -> vector<128x1xf32>
    %78 = vector.broadcast %77 : vector<128x1xf32> to vector<128x128xf32>
    %79 = arith.mulf %72, %78 : vector<128x128xf32>
    %80 = arith.addf %67, %79 : vector<128x128xf32>
    %c0_31 = arith.constant 0 : index
    %c0_32 = arith.constant 0 : index
    %81 = vector.load %arg5[%c0_31, %c0_32] : memref<128x128xf32, #tpu.memory_space<vmem>>, vector<128x128xf32>
    tpu.vector_store %arg5[%c0_31, %c0_32], %80 {strides = array<i32>} : memref<128x128xf32, #tpu.memory_space<vmem>>, vector<128x128xf32>,
    return
  }
  func.func @transform_0(%arg0: i32) -> (i32, i32) {
    %c0_i32 = arith.constant 0 : i32
    %c0_i32_0 = arith.constant 0 : i32
    return %arg0, %c0_i32 : i32, i32
  }
  func.func @transform_1(%arg0: i32) -> (i32, i32) {
    %c0_i32 = arith.constant 0 : i32
    %c0_i32_0 = arith.constant 0 : i32
    return %arg0, %c0_i32 : i32, i32
  }
  func.func @transform_2(%arg0: i32) -> (i32, i32) {
    %c0_i32 = arith.constant 0 : i32
    %c0_i32_0 = arith.constant 0 : i32
    %c0_i32_1 = arith.constant 0 : i32
    return %c0_i32, %c0_i32_0 : i32, i32
  }
  func.func @transform_3(%arg0: i32) -> (i32, i32) {
    %c0_i32 = arith.constant 0 : i32
    %c0_i32_0 = arith.constant 0 : i32
    %c0_i32_1 = arith.constant 0 : i32
    return %c0_i32, %c0_i32_0 : i32, i32
  }
  func.func @transform_4(%arg0: i32) -> (i32, i32) {
    %c0_i32 = arith.constant 0 : i32
    %c0_i32_0 = arith.constant 0 : i32
    return %arg0, %c0_i32 : i32, i32
  }
  func.func @transform_5(%arg0: i32) -> (i32, i32) {
    %c0_i32 = arith.constant 0 : i32
    %c0_i32_0 = arith.constant 0 : i32
    return %arg0, %c0_i32 : i32, i32
  }
}

</mosaic_0001>

<bundles_post_ra>
// kernel: tpu_custom_call.1
= control target key start
LH: loop header
LB: loop body
LE: loop exit
PB: predicated region body
PF: predicated region fallthrough
CT: control target
= control target key end

     0   :  { %11 = vsyncpa [#allocation3], 0  ;;  %vm41_vm0 = vcmask 261120   ;;  %v1690_v7 = vmov 0   ;;  %s2727_s0 = inlined_call_operand.vmem [shape: f32[128,32], index: 0, kind: input, shape index: {}]   ;;  %s2728_s1 = inlined_call_operand.vmem [shape: f32[128,1], index: 1, kind: input, shape index: {}]   ;;  %s2729_s2 = inlined_call_operand.vmem [shape: f32[32,128], index: 2, kind: input, shape index: {}]   ;;  %s2730_s3 = inlined_call_operand.vmem [shape: f32[1,128], index: 3, kind: input, shape index: {}]   ;;  %s2731_s4 = inlined_call_operand.hbm [shape: f32[128,128], index: 4, kind: output, shape index: {0}]   ;;  %s2732_s5 = inlined_call_operand.hbm [shape: f32[128,128], index: 5, kind: output, shape index: {1}]  }
   0x1   :  { %v37_v0 = vld [vmem:[%s2729_s2] sm:$0xff]  ;;  %v38_v1 = vld [vmem:[%s2729_s2 + $0x8] sm:$0xff]  ;;  %v39_v2 = vld [vmem:[%s2729_s2 + $0x10] sm:$0xff]  ;;  %1417 = vset.pattern.permute.xlu1 %v1690_v7  ;;  %1416 = vset.pattern.permute.xlu0 %v1690_v7 }
   0x2   :  { %v1399_v3 = vpack.c.bf16 %v38_v1, %v37_v0  ;;  %v40_v4 = vld [vmem:[%s2729_s2 + $0x18] sm:$0xff]  ;;  %v21_v5 = vld [vmem:[%s2727_s0] sm:$0xff]  ;;  %v237_v9 = vld [vmem:[%s2728_s1 + $0x10] sm:$0xff] }
   0x3   :  { %v29_v6 = vld [vmem:[%s2727_s0 + $0x40] sm:$0xff]  ;;  %v1403_v8 = vpack.c.bf16 %v40_v4, %v39_v2  ;;  %1375 = vmatprep.mubr.msk.f32.mxu0 %vm41_vm0, %v21_v5  ;;  %264 = vperm.xlu1 %1417, %v237_v9   ;;  %v22_v10 = vld [vmem:[%s2727_s0 + $0x8] sm:$0xff]  ;;  %v23_v13 = vld [vmem:[%s2727_s0 + $0x10] sm:$0xff] }
   0x4   :  { %1387 = vmatprep.mubr.msk.f32.mxu1 %vm41_vm0, %v29_v6  ;;  %1400 = vmatprep.subr.bf16.mxu0 %v1399_v3  ;;  %v30_v11 = vld [vmem:[%s2727_s0 + $0x48] sm:$0xff]  ;;  %v235_v12 = vld [vmem:[%s2728_s1] sm:$0xff]  ;;  %v31_v14 = vld [vmem:[%s2727_s0 + $0x50] sm:$0xff] }
   0x5   :  { %1407 = vmatprep.subr.bf16.mxu1 %v1399_v3  ;;  %1402 = vmatpush3.bf16.msra.mxu0 %v1399_v3  ;;  %v238_v15 = vld [vmem:[%s2728_s1 + $0x18] sm:$0xff]  ;;  %v236_v16 = vld [vmem:[%s2728_s1 + $0x8] sm:$0xff] }
   0x6   :  { %1409 = vmatpush3.bf16.msra.mxu1 %v1399_v3  ;;  %1404 = vmatprep.subr.bf16.mxu0 %v1403_v8  ;;  %v24_v17 = vld [vmem:[%s2727_s0 + $0x18] sm:$0xff] }
   0x7   :  { %1408 = vmatprep.subr.bf16.mxu1 %v1403_v8  ;;  %254 = vperm.xlu0 %1416, %v235_v12   ;;  %v32_v18 = vld [vmem:[%s2727_s0 + $0x58] sm:$0xff] }
   0x9   :  { %1406 = vmatpush3.bf16.msra.mxu0 %v1403_v8 }
   0xa   :  { %1410 = vmatpush3.bf16.msra.mxu1 %v1403_v8 }
   0xc   :  { %1376 = vmatmul.mubr.msk.f32.vlgmr.msra.gmra.mrb[0].mxu0 %vm41_vm0, %v22_v10 }
   0xd   :  { %1388 = vmatmul.mubr.msk.f32.vlgmr.msra.gmra.mrb[0].mxu1 %vm41_vm0, %v30_v11  ;;  %1378 = vmatprep.mubr.msk.f32.mxu0 %vm41_vm0, %v23_v13 }
   0xe   :  { %1390 = vmatprep.mubr.msk.f32.mxu1 %vm41_vm0, %v31_v14 }
   0xf   :  { %12 = vsyncpa [#allocation5], 0  ;;  %v25_v19 = vld [vmem:[%s2727_s0 + $0x20] sm:$0xff]  ;;  %269 = vperm.xlu1 %1417, %v238_v15   ;;  %259 = vperm.xlu0 %1416, %v236_v16   ;;  %v240_v21 = vld [vmem:[%s2728_s1 + $0x28] sm:$0xff] }
  0x10   :  { %v33_v20 = vld [vmem:[%s2727_s0 + $0x60] sm:$0xff]  ;;  %1379 = vmatmul.mubr.msk.f32.gmra.mrb[2].mxu0 %vm41_vm0, %v24_v17  ;;  %v26_v23 = vld [vmem:[%s2727_s0 + $0x28] sm:$0xff]  ;;  %v27_v25 = vld [vmem:[%s2727_s0 + $0x30] sm:$0xff] }
  0x11   :  { %v239_v22 = vld [vmem:[%s2728_s1 + $0x20] sm:$0xff]  ;;  %1391 = vmatmul.mubr.msk.f32.gmra.mrb[2].mxu1 %vm41_vm0, %v32_v18  ;;  %1381 = vmatprep.mubr.msk.f32.mxu0 %vm41_vm0, %v25_v19  ;;  %v34_v24 = vld [vmem:[%s2727_s0 + $0x68] sm:$0xff]  ;;  %v35_v26 = vld [vmem:[%s2727_s0 + $0x70] sm:$0xff] }
  0x12   :  { %1393 = vmatprep.mubr.msk.f32.mxu1 %vm41_vm0, %v33_v20  ;;  %v242_v27 = vld [vmem:[%s2728_s1 + $0x38] sm:$0xff]  ;;  %v241_v28 = vld [vmem:[%s2728_s1 + $0x30] sm:$0xff]  ;;  %v244_v31 = vld [vmem:[%s2728_s1 + $0x48] sm:$0xff] }
  0x13   :  { %279 = vperm.xlu1 %1417, %v240_v21   ;;  %274 = vperm.xlu0 %1416, %v239_v22   ;;  %v28_v29 = vld [vmem:[%s2727_s0 + $0x38] sm:$0xff]  ;;  %v243_v32 = vld [vmem:[%s2728_s1 + $0x40] sm:$0xff]  ;;  %v245_v34 = vld [vmem:[%s2728_s1 + $0x50] sm:$0xff] }
  0x14   :  { %1382 = vmatmul.mubr.msk.f32.gmra.mrb[4].mxu0 %vm41_vm0, %v26_v23  ;;  %v36_v30 = vld [vmem:[%s2727_s0 + $0x78] sm:$0xff]  ;;  %v248_v35 = vld [vmem:[%s2728_s1 + $0x68] sm:$0xff]  ;;  %v247_v36 = vld [vmem:[%s2728_s1 + $0x60] sm:$0xff] }
  0x15   :  { %1394 = vmatmul.mubr.msk.f32.gmra.mrb[4].mxu1 %vm41_vm0, %v34_v24  ;;  %1384 = vmatprep.mubr.msk.f32.mxu0 %vm41_vm0, %v27_v25  ;;  %v246_v33 = vld [vmem:[%s2728_s1 + $0x58] sm:$0xff]  ;;  %v249_v38 = vld [vmem:[%s2728_s1 + $0x70] sm:$0xff]  ;;  %v1346_v51 = vld [vmem:[%s2730_s3] ss:$0 sm:$0xff] }
  0x16   :  { %1396 = vmatprep.mubr.msk.f32.mxu1 %vm41_vm0, %v35_v26  ;;  %v250_v37 = vld [vmem:[%s2728_s1 + $0x78] sm:$0xff]  ;;  %s1691_s1 = smov [#allocation4]  }
  0x17   :  { %289 = vperm.xlu1 %1417, %v242_v27   ;;  %284 = vperm.xlu0 %1416, %v241_v28   ;;  %s1315_s3 = sshll.u32 %s1691_s1, 4  ;;  %s1316_s3 = int_to_ptr.vmem [resolvable:$true] %s1315_s3 }
  0x18   :  { %1385 = vmatmul.mubr.msk.f32.gmra.mrb[6].mxu0 %vm41_vm0, %v28_v29  ;;  %s1642_s13 = scalar_lea.vmem %s1316_s3, 2048  ;;  %p1647_p1 = scmp.lt.s32.totalorder %s1316_s3, %s1316_s3 }
  0x19   :  { %1397 = vmatmul.mubr.msk.f32.gmra.mrb[6].mxu1 %vm41_vm0, %v36_v30  ;;  %p1643_p0 = scmp.ne.s32.totalorder %s1316_s3, %s1642_s13  ;;  %p1648_p2 = scmp.lt.s32.totalorder %s1642_s13, %s1642_s13 }
  0x1b   :  { %299 = vperm.xlu1 %1417, %v244_v31   ;;  %294 = vperm.xlu0 %1416, %v243_v32   ;;  %p1649_p3 = por %p1648_p2, %p1647_p1 }
  0x1d   :  { %p1650_p4 = pnand %p1649_p3, %p1643_p0 }
  0x1f   :  { %309 = vperm.xlu1 %1417, %v246_v33   ;;  %304 = vperm.xlu0 %1416, %v245_v34  }
  0x23   :  { %319 = vperm.xlu1 %1417, %v248_v35   ;;  %314 = vperm.xlu0 %1416, %v247_v36  }
  0x27   :  { %329 = vperm.xlu1 %1417, %v250_v37   ;;  %324 = vperm.xlu0 %1416, %v249_v38  }
  0x82   :  { %v265_v39 = vpop.permute.xlu1 %264 }
  0x83   :  { %v340_v56 = vadd.f32 %v1346_v51, %v265_v39 }
  0x86   :  { %v255_v40 = vpop.permute.xlu0 %254 }
  0x87   :  { %v338_v57 = vadd.f32 %v1346_v51, %v255_v40 }
  0x8e   :  { %v270_v41 = vpop.permute.xlu1 %269  ;;  %v260_v42 = vpop.permute.xlu0 %259 }
  0x8f   :  { %v339_v55 = vadd.f32 %v1346_v51, %v260_v42  ;;  %v341_v61 = vadd.f32 %v1346_v51, %v270_v41 }
  0x92   :  { %v280_v43 = vpop.permute.xlu1 %279  ;;  %v275_v44 = vpop.permute.xlu0 %274 }
  0x93   :  { %v343_v62 = vadd.f32 %v1346_v51, %v280_v43  ;;  %v342_v4 = vadd.f32 %v1346_v51, %v275_v44 }
  0x96   :  { %v290_v45 = vpop.permute.xlu1 %289  ;;  %v285_v46 = vpop.permute.xlu0 %284 }
  0x97   :  { %v345_v3 = vadd.f32 %v1346_v51, %v290_v45  ;;  %v344_v8 = vadd.f32 %v1346_v51, %v285_v46 }
  0x9a   :  { %v300_v47 = vpop.permute.xlu1 %299  ;;  %v295_v48 = vpop.permute.xlu0 %294 }
  0x9b   :  { %v347_v54 = vadd.f32 %v1346_v51, %v300_v47  ;;  %v346_v58 = vadd.f32 %v1346_v51, %v295_v48 }
  0x9e   :  { %v310_v49 = vpop.permute.xlu1 %309  ;;  %v305_v50 = vpop.permute.xlu0 %304 }
  0x9f   :  { %v349_v7 = vadd.f32 %v1346_v51, %v310_v49  ;;  %v348_v14 = vadd.f32 %v1346_v51, %v305_v50 }
  0xa2   :  { %v320_v52 = vpop.permute.xlu1 %319  ;;  %v315_v53 = vpop.permute.xlu0 %314 }
  0xa3   :  { %v351_v13 = vadd.f32 %v1346_v51, %v320_v52  ;;  %v350_v19 = vadd.f32 %v1346_v51, %v315_v53 }
  0xa6   :  { %v330_v9 = vpop.permute.xlu1 %329  ;;  %v325_v10 = vpop.permute.xlu0 %324 }
  0xa7   :  { %v353_v24 = vadd.f32 %v1346_v51, %v330_v9  ;;  %v352_v27 = vadd.f32 %v1346_v51, %v325_v10 }
  0xdf   :  { %v1377_v59 = vpop.f32.mrb[0].mxu0 }
  0xe0   :  { %v1389_v60 = vpop.f32.mrb[0].mxu1  ;;  %v355_v63 = vadd.f32 %v1377_v59, %v339_v55  ;;  %v156_v1 = vpop.f32.mrb[1].mxu0 }
  0xe1   :  { %v363_v0 = vadd.f32 %v1389_v60, %v347_v54  ;;  %v196_v2 = vpop.f32.mrb[1].mxu1  ;;  %v354_v5 = vadd.f32 %v338_v57, %v156_v1 }
  0xe2   :  { %v362_v6 = vadd.f32 %v346_v58, %v196_v2  ;;  %v1852_v11 = vmax.f32 %v355_v63, 0.0 }
  0xe3   :  { %v1854_v12 = vmax.f32 %v363_v0, 0.0  ;;  %v1856_v15 = vmax.f32 %v354_v5, 0.0  ;;  %v1380_v17 = vpop.f32.mrb[2].mxu0 }
  0xe4   :  { %v1858_v16 = vmax.f32 %v362_v6, 0.0  ;;  %v1392_v18 = vpop.f32.mrb[2].mxu1  ;;  %1418 = vrsqrt.f32 %v1852_v11  ;;  %v357_v20 = vadd.f32 %v1380_v17, %v341_v61  ;;  %v166_v22 = vpop.f32.mrb[3].mxu0  ;;  %vm395_vm1 = vcmp.eq.f32.partialorder %v1852_v11, inf }
  0xe5   :  { %v365_v21 = vadd.f32 %v1392_v18, %v349_v7  ;;  %v206_v23 = vpop.f32.mrb[3].mxu1  ;;  %1420 = vrsqrt.f32 %v1854_v12  ;;  %v356_v25 = vadd.f32 %v340_v56, %v166_v22  ;;  %v454_v34 = vand.u32 2147483648, %v1854_v12 }
  0xe6   :  { %v364_v26 = vadd.f32 %v348_v14, %v206_v23  ;;  %1422 = vrsqrt.f32 %v1856_v15  ;;  %v1863_v28 = vmax.f32 %v357_v20, 0.0  ;;  %vm451_vm2 = vcmp.eq.f32.partialorder %v1854_v12, inf }
  0xe7   :  { %v1865_v29 = vmax.f32 %v365_v21, 0.0  ;;  %1424 = vrsqrt.f32 %v1858_v16  ;;  %v1868_v30 = vmax.f32 %v356_v25, 0.0  ;;  %v1383_v32 = vpop.f32.mrb[4].mxu0  ;;  %vm397_vm3 = vcmp.eq.f32.partialorder %v1852_v11, 0.0 }
  0xe8   :  { %v1870_v31 = vmax.f32 %v364_v26, 0.0  ;;  %v1395_v33 = vpop.f32.mrb[4].mxu1  ;;  %1426 = vrsqrt.f32 %v1863_v28  ;;  %v359_v35 = vadd.f32 %v1383_v32, %v343_v62  ;;  %v176_v37 = vpop.f32.mrb[5].mxu0  ;;  %vm453_vm4 = vcmp.eq.f32.partialorder %v1854_v12, 0.0 }
  0xe9   :  { %v367_v36 = vadd.f32 %v1395_v33, %v351_v13  ;;  %v216_v38 = vpop.f32.mrb[5].mxu1  ;;  %1428 = vrsqrt.f32 %v1865_v29  ;;  %v358_v39 = vadd.f32 %v342_v4, %v176_v37  ;;  %v398_v43 = vand.u32 2147483648, %v1852_v11 }
  0xea   :  { %v366_v40 = vadd.f32 %v350_v19, %v216_v38  ;;  %1430 = vrsqrt.f32 %v1868_v30  ;;  %v1879_v41 = vmax.f32 %v359_v35, 0.0  ;;  %vm444_vm5 = vcmp.eq.f32.partialorder %v1858_v16, inf }
  0xeb   :  { %v1881_v42 = vmax.f32 %v367_v36, 0.0  ;;  %1432 = vrsqrt.f32 %v1870_v31  ;;  %v1886_v44 = vmax.f32 %v358_v39, 0.0  ;;  %v1386_v46 = vpop.f32.mrb[6].mxu0  ;;  %vm446_vm6 = vcmp.eq.f32.partialorder %v1858_v16, 0.0 }
  0xec   :  { %v1888_v45 = vmax.f32 %v366_v40, 0.0  ;;  %v1398_v47 = vpop.f32.mrb[6].mxu1  ;;  %1434 = vrsqrt.f32 %v1879_v41  ;;  %v361_v48 = vadd.f32 %v1386_v46, %v345_v3  ;;  %v186_v50 = vpop.f32.mrb[7].mxu0  ;;  %v447_v54 = vand.u32 2147483648, %v1858_v16 }
  0xed   :  { %v369_v49 = vadd.f32 %v1398_v47, %v353_v24  ;;  %v226_v51 = vpop.f32.mrb[7].mxu1  ;;  %1436 = vrsqrt.f32 %v1881_v42  ;;  %v360_v52 = vadd.f32 %v344_v8, %v186_v50  ;;  %vm388_vm7 = vcmp.eq.f32.partialorder %v1856_v15, inf }
  0xee   :  { %v368_v53 = vadd.f32 %v352_v27, %v226_v51  ;;  %v1419_v55 = vpop.eup %1418  ;;  %1438 = vrsqrt.f32 %v1886_v44  ;;  %v1896_v56 = vmax.f32 %v361_v48, 0.0  ;;  %vm390_vm8 = vcmp.eq.f32.partialorder %v1856_v15, 0.0 }
  0xef   :  { %v1898_v57 = vmax.f32 %v369_v49, 0.0  ;;  %v1421_v58 = vpop.eup %1420  ;;  %1440 = vrsqrt.f32 %v1888_v45  ;;  %v1902_v59 = vmax.f32 %v360_v52, 0.0  ;;  %v394_v60 = vmul.f32 %v1419_v55, %v1852_v11 }
  0xf0   :  { %v1423_v61 = vpop.eup %1422  ;;  %1442 = vrsqrt.f32 %v1896_v56  ;;  %v1907_v62 = vmax.f32 %v368_v53, 0.0  ;;  %v450_v63 = vmul.f32 %v1421_v58, %v1854_v12  ;;  %v391_v0 = vand.u32 2147483648, %v1856_v15 }
  0xf1   :  { %v1425_v1 = vpop.eup %1424  ;;  %1444 = vrsqrt.f32 %v1898_v57  ;;  %v396_v2 = vsel %vm395_vm1, %v1852_v11, %v394_v60  ;;  %v387_v3 = vmul.f32 %v1423_v61, %v1856_v15  ;;  %vm458_vm9 = vcmp.eq.f32.partialorder %v1870_v31, inf }
  0xf2   :  { %v1427_v4 = vpop.eup %1426  ;;  %v452_v5 = vsel %vm451_vm2, %v1854_v12, %v450_v63  ;;  %v399_v6 = vsel %vm397_vm3, %v398_v43, %v396_v2  ;;  %v443_v7 = vmul.f32 %v1425_v1, %v1858_v16  ;;  %vm460_vm10 = vcmp.eq.f32.partialorder %v1870_v31, 0.0 }
  0xf3   :  { %v1429_v8 = vpop.eup %1428  ;;  %1446 = vrsqrt.f32 %v1902_v59  ;;  %v455_v9 = vsel %vm453_vm4, %v454_v34, %v452_v5  ;;  %v1927_v10 = vsub.f32 0.0, %v399_v6  ;;  %v389_v13 = vsel %vm388_vm7, %v1856_v15, %v387_v3 }
  0xf4   :  { %v1431_v14 = vpop.eup %1430  ;;  %1448 = vrsqrt.f32 %v1907_v62  ;;  %v1933_v11 = vsub.f32 0.0, %v455_v9  ;;  %v445_v17 = vsel %vm444_vm5, %v1858_v16, %v443_v7  ;;  %v392_v18 = vsel %vm390_vm8, %v391_v0, %v389_v13 }
  0xf5   :  { %v1433_v12 = vpop.eup %1432  ;;  %532 = vmax.xlane.f32.xlu1 %v1927_v10  ;;  %515 = vst [vmem:[#allocation4 + $0x8] sm:$0xff] %v1927_v10  ;;  %v448_v19 = vsel %vm446_vm6, %v447_v54, %v445_v17  ;;  %v1944_v20 = vsub.f32 0.0, %v392_v18  ;;  %v461_v21 = vand.u32 2147483648, %v1870_v31  ;;  %v408_v22 = vmul.f32 %v1427_v4, %v1863_v28 }
  0xf6   :  { %v1435_v23 = vpop.eup %1434  ;;  %548 = vmax.xlane.f32.xlu0 %v1933_v11  ;;  %523 = vst [vmem:[#allocation4 + $0x48] sm:$0xff] %v1933_v11  ;;  %v1950_v15 = vsub.f32 0.0, %v448_v19  ;;  %v457_v24 = vmul.f32 %v1433_v12, %v1870_v31  ;;  %vm409_vm11 = vcmp.eq.f32.partialorder %v1863_v28, inf  ;;  %v412_v16 = vand.u32 2147483648, %v1863_v28 }
  0xf7   :  { %v1955_v25 = vpop.eup %1436  ;;  %514 = vst [vmem:[#allocation4] sm:$0xff] %v1944_v20  ;;  %v410_v26 = vsel %vm409_vm11, %v1863_v28, %v408_v22  ;;  %vm411_vm12 = vcmp.eq.f32.partialorder %v1863_v28, 0.0  ;;  %v464_v27 = vmul.f32 %v1429_v8, %v1865_v29  ;;  %vm465_vm13 = vcmp.eq.f32.partialorder %v1865_v29, inf }
  0xf8   :  { %v1439_v32 = vpop.eup %1438  ;;  %522 = vst [vmem:[#allocation4 + $0x40] sm:$0xff] %v1950_v15  ;;  %v459_v33 = vsel %vm458_vm9, %v1870_v31, %v457_v24  ;;  %v413_v34 = vsel %vm411_vm12, %v412_v16, %v410_v26  ;;  %vm467_vm14 = vcmp.eq.f32.partialorder %v1865_v29, 0.0  ;;  %v468_v35 = vand.u32 2147483648, %v1865_v29 }
  0xf9   :  { %v1441_v36 = vpop.eup %1440  ;;  %546 = vmax.xlane.f32.xlu1 %v1950_v15  ;;  %v462_v28 = vsel %vm460_vm10, %v461_v21, %v459_v33  ;;  %v1971_v37 = vsub.f32 0.0, %v413_v34  ;;  %v466_v38 = vsel %vm465_vm13, %v1865_v29, %v464_v27  ;;  %v415_v39 = vmul.f32 %v1439_v32, %v1886_v44 }
  0xfa   :  { %v1975_v40 = vpop.eup %1442  ;;  %530 = vmax.xlane.f32.xlu0 %v1944_v20  ;;  %v1978_v43 = vsub.f32 0.0, %v462_v28  ;;  %v469_v46 = vsel %vm467_vm14, %v468_v35, %v466_v38  ;;  %vm416_vm15 = vcmp.eq.f32.partialorder %v1886_v44, inf  ;;  %v419_v47 = vand.u32 2147483648, %v1886_v44 }
  0xfb   :  { %v1982_v48 = vpop.eup %1444  ;;  %517 = vst [vmem:[#allocation4 + $0x18] sm:$0xff] %v1971_v37  ;;  %v1985_v31 = vsub.f32 0.0, %v469_v46  ;;  %v417_v29 = vsel %vm416_vm15, %v1886_v44, %v415_v39  ;;  %vm418_vm0 = vcmp.eq.f32.partialorder %v1886_v44, 0.0  ;;  %v401_v49 = vmul.f32 %v1431_v14, %v1868_v30 }
  0xfc   :  { %524 = vst [vmem:[#allocation4 + $0x50] sm:$0xff] %v1978_v43  ;;  %v420_v50 = vsel %vm418_vm0, %v419_v47, %v417_v29  ;;  %vm402_vm1 = vcmp.eq.f32.partialorder %v1868_v30, inf  ;;  %v405_v51 = vand.u32 2147483648, %v1868_v30  ;;  %v471_v52 = vmul.f32 %v1441_v36, %v1888_v45 }
  0xfd   :  { %v1447_v53 = vpop.eup %1446  ;;  %550 = vmax.xlane.f32.xlu1 %v1978_v43  ;;  %525 = vst [vmem:[#allocation4 + $0x58] sm:$0xff] %v1985_v31  ;;  %v1996_v54 = vsub.f32 0.0, %v420_v50  ;;  %v403_v44 = vsel %vm402_vm1, %v1868_v30, %v401_v49  ;;  %vm404_vm2 = vcmp.eq.f32.partialorder %v1868_v30, 0.0  ;;  %vm472_vm3 = vcmp.eq.f32.partialorder %v1888_v45, inf }
  0xfe   :  { %v1449_v55 = vpop.eup %1448  ;;  %536 = vmax.xlane.f32.xlu0 %v1971_v37  ;;  %v406_v58 = vsel %vm404_vm2, %v405_v51, %v403_v44  ;;  %v473_v60 = vsel %vm472_vm3, %v1888_v45, %v471_v52  ;;  %v475_v61 = vand.u32 2147483648, %v1888_v45  ;;  %v422_v63 = vmul.f32 %v1435_v23, %v1879_v41 }
  0xff   :  { %518 = vst [vmem:[#allocation4 + $0x20] sm:$0xff] %v1996_v54  ;;  %v2006_v0 = vsub.f32 0.0, %v406_v58  ;;  %vm474_vm4 = vcmp.eq.f32.partialorder %v1888_v45, 0.0  ;;  %vm423_vm5 = vcmp.eq.f32.partialorder %v1879_v41, inf  ;;  %v426_v30 = vand.u32 2147483648, %v1879_v41 }
 0x100   :  { %v476_v1 = vsel %vm474_vm4, %v475_v61, %v473_v60  ;;  %v424_v2 = vsel %vm423_vm5, %v1879_v41, %v422_v63  ;;  %vm425_vm6 = vcmp.eq.f32.partialorder %v1879_v41, 0.0  ;;  %v429_v3 = vmul.f32 %v1447_v53, %v1902_v59 }
 0x101   :  { %538 = vmax.xlane.f32.xlu1 %v1996_v54  ;;  %516 = vst [vmem:[#allocation4 + $0x10] sm:$0xff] %v2006_v0  ;;  %v2016_v4 = vsub.f32 0.0, %v476_v1  ;;  %v427_v5 = vsel %vm425_vm6, %v426_v30, %v424_v2  ;;  %vm430_vm7 = vcmp.eq.f32.partialorder %v1902_v59, inf  ;;  %v433_v45 = vand.u32 2147483648, %v1902_v59 }
 0x102   :  { %552 = vmax.xlane.f32.xlu0 %v1985_v31  ;;  %v2021_v6 = vsub.f32 0.0, %v427_v5  ;;  %v431_v7 = vsel %vm430_vm7, %v1902_v59, %v429_v3  ;;  %vm432_vm8 = vcmp.eq.f32.partialorder %v1902_v59, 0.0  ;;  %v478_v41 = vmul.f32 %v1955_v25, %v1881_v42 }
 0x103   :  { %526 = vst [vmem:[#allocation4 + $0x60] sm:$0xff] %v2016_v4  ;;  %v434_v8 = vsel %vm432_vm8, %v433_v45, %v431_v7  ;;  %vm479_vm9 = vcmp.eq.f32.partialorder %v1881_v42, inf  ;;  %v482_v9 = vand.u32 2147483648, %v1881_v42  ;;  %v485_v13 = vmul.f32 %v1449_v55, %v1907_v62 }
 0x104   :  { %519 = vst [vmem:[#allocation4 + $0x28] sm:$0xff] %v2021_v6  ;;  %v2032_v14 = vsub.f32 0.0, %v434_v8  ;;  %v480_v17 = vsel %vm479_vm9, %v1881_v42, %v478_v41  ;;  %vm481_vm10 = vcmp.eq.f32.partialorder %v1881_v42, 0.0  ;;  %vm486_vm11 = vcmp.eq.f32.partialorder %v1907_v62, inf }
 0x105   :  { %554 = vmax.xlane.f32.xlu1 %v2016_v4  ;;  %v483_v59 = vsel %vm481_vm10, %v482_v9, %v480_v17  ;;  %v487_v18 = vsel %vm486_vm11, %v1907_v62, %v485_v13  ;;  %v489_v12 = vand.u32 2147483648, %v1907_v62  ;;  %v436_v19 = vmul.f32 %v1975_v40, %v1896_v56 }
 0x106   :  { %534 = vmax.xlane.f32.xlu0 %v2006_v0  ;;  %520 = vst [vmem:[#allocation4 + $0x30] sm:$0xff] %v2032_v14  ;;  %v2044_v21 = vsub.f32 0.0, %v483_v59  ;;  %vm488_vm12 = vcmp.eq.f32.partialorder %v1907_v62, 0.0  ;;  %vm437_vm13 = vcmp.eq.f32.partialorder %v1896_v56, inf  ;;  %v440_v42 = vand.u32 2147483648, %v1896_v56 }
 0x107   :  { %v490_v22 = vsel %vm488_vm12, %v489_v12, %v487_v18  ;;  %v438_v23 = vsel %vm437_vm13, %v1896_v56, %v436_v19  ;;  %vm439_vm14 = vcmp.eq.f32.partialorder %v1896_v56, 0.0  ;;  %v492_v24 = vmul.f32 %v1982_v48, %v1898_v57 }
 0x108   :  { %527 = vst [vmem:[#allocation4 + $0x68] sm:$0xff] %v2044_v21  ;;  %v2054_v16 = vsub.f32 0.0, %v490_v22  ;;  %v441_v25 = vsel %vm439_vm14, %v440_v42, %v438_v23  ;;  %vm493_vm15 = vcmp.eq.f32.partialorder %v1898_v57, inf  ;;  %v496_v62 = vand.u32 2147483648, %v1898_v57 }
 0x109   :  { %542 = vmax.xlane.f32.xlu1 %v2032_v14  ;;  %v2059_v26 = vsub.f32 0.0, %v441_v25  ;;  %v494_v27 = vsel %vm493_vm15, %v1898_v57, %v492_v24  ;;  %vm495_vm0 = vcmp.eq.f32.partialorder %v1898_v57, 0.0 }
 0x10a   :  { %540 = vmax.xlane.f32.xlu0 %v2021_v6  ;;  %528 = vst [vmem:[#allocation4 + $0x70] sm:$0xff] %v2054_v16  ;;  %v497_v56 = vsel %vm495_vm0, %v496_v62, %v494_v27 }
 0x10b   :  { %521 = vst [vmem:[#allocation4 + $0x38] sm:$0xff] %v2059_v26  ;;  %v2066_v32 = vsub.f32 0.0, %v497_v56 }
 0x10d   :  { %558 = vmax.xlane.f32.xlu1 %v2054_v16  ;;  %529 = vst [vmem:[#allocation4 + $0x78] sm:$0xff] %v2066_v32 }
 0x10e   :  { %556 = vmax.xlane.f32.xlu0 %v2044_v21 }
 0x112   :  { %544 = vmax.xlane.f32.xlu0 %v2059_v26 }
 0x116   :  { %560 = vmax.xlane.f32.xlu0 %v2066_v32 }
 0x182   :  { %v533_v57 = vpop.xlane.xlu1 %532 }
 0x183   :  { %v549_v33 = vpop.xlane.xlu0 %548  ;;  %v563_v34 = vsub.f32 %v1927_v10, %v533_v57 }
 0x184   :  { %v571_v35 = vsub.f32 %v1933_v11, %v549_v33 }
 0x185   :  { %v580_v36 = vmul.f32 1.442695, %v563_v34 }
 0x186   :  { %v547_v28 = vpop.xlane.xlu1 %546  ;;  %v596_v38 = vmul.f32 1.442695, %v571_v35 }
 0x187   :  { %1450 = vpow2.f32 %v580_v36  ;;  %v570_v39 = vsub.f32 %v1950_v15, %v547_v28  ;;  %v531_v40 = vpop.xlane.xlu0 %530 }
 0x188   :  { %v562_v46 = vsub.f32 %v1944_v20, %v531_v40  ;;  %1452 = vpow2.f32 %v596_v38 }
 0x189   :  { %v594_v29 = vmul.f32 1.442695, %v570_v39 }
 0x18a   :  { %v578_v47 = vmul.f32 1.442695, %v562_v46  ;;  %v551_v48 = vpop.xlane.xlu1 %550 }
 0x18b   :  { %v537_v49 = vpop.xlane.xlu0 %536  ;;  %v572_v20 = vsub.f32 %v1978_v43, %v551_v48 }
 0x18c   :  { %1454 = vpow2.f32 %v578_v47  ;;  %v565_v50 = vsub.f32 %v1971_v37, %v537_v49 }
 0x18d   :  { %1456 = vpow2.f32 %v594_v29 }
 0x18e   :  { %v584_v10 = vmul.f32 1.442695, %v565_v50  ;;  %v539_v51 = vpop.xlane.xlu1 %538 }
 0x18f   :  { %v553_v11 = vpop.xlane.xlu0 %552  ;;  %v566_v63 = vsub.f32 %v1996_v54, %v539_v51 }
 0x190   :  { %1458 = vpow2.f32 %v584_v10  ;;  %v573_v52 = vsub.f32 %v1985_v31, %v553_v11  ;;  %v598_v31 = vmul.f32 1.442695, %v572_v20 }
 0x191   :  { %v2079_v53 = vpop.eup %1450  ;;  %v586_v3 = vmul.f32 1.442695, %v566_v63 }
 0x192   :  { %v600_v15 = vmul.f32 1.442695, %v573_v52  ;;  %612 = vadd.xlane.f32.xlu0 %v2079_v53  ;;  %v2084_v58 = vpop.eup %1452  ;;  %v555_v37 = vpop.xlane.xlu1 %554 }
 0x193   :  { %v535_v44 = vpop.xlane.xlu0 %534  ;;  %v574_v5 = vsub.f32 %v2016_v4, %v555_v37 }
 0x194   :  { %1460 = vpow2.f32 %v600_v15  ;;  %v564_v55 = vsub.f32 %v2006_v0, %v535_v44 }
 0x195   :  { %v602_v8 = vmul.f32 1.442695, %v574_v5 }
 0x196   :  { %v2086_v60 = vpop.eup %1454  ;;  %v582_v61 = vmul.f32 1.442695, %v564_v55  ;;  %628 = vadd.xlane.f32.xlu0 %v2084_v58  ;;  %v543_v45 = vpop.xlane.xlu1 %542 }
 0x197   :  { %v541_v30 = vpop.xlane.xlu0 %540  ;;  %610 = vadd.xlane.f32.xlu1 %v2086_v60  ;;  %v2092_v1 = vpop.eup %1456  ;;  %v568_v9 = vsub.f32 %v2032_v14, %v543_v45 }
 0x198   :  { %1462 = vpow2.f32 %v582_v61  ;;  %v567_v43 = vsub.f32 %v2021_v6, %v541_v30 }
 0x199   :  { %1464 = vpow2.f32 %v598_v31  ;;  %v590_v12 = vmul.f32 1.442695, %v568_v9 }
 0x19a   :  { %v2094_v0 = vpop.eup %1458  ;;  %v588_v2 = vmul.f32 1.442695, %v567_v43  ;;  %v559_v17 = vpop.xlane.xlu1 %558 }
 0x19b   :  { %v557_v7 = vpop.xlane.xlu0 %556  ;;  %616 = vadd.xlane.f32.xlu0 %v2094_v0  ;;  %626 = vadd.xlane.f32.xlu1 %v2092_v1 }
 0x19c   :  { %1466 = vpow2.f32 %v588_v2  ;;  %v575_v54 = vsub.f32 %v2044_v21, %v557_v7  ;;  %v576_v21 = vsub.f32 %v2054_v16, %v559_v17 }
 0x19d   :  { %1468 = vpow2.f32 %v586_v3 }
 0x19e   :  { %v2100_v41 = vpop.eup %1460  ;;  %v604_v6 = vmul.f32 1.442695, %v575_v54  ;;  %v606_v24 = vmul.f32 1.442695, %v576_v21 }
 0x19f   :  { %632 = vadd.xlane.f32.xlu0 %v2100_v41  ;;  %v545_v13 = vpop.xlane.xlu0 %544 }
 0x1a0   :  { %1470 = vpow2.f32 %v604_v6  ;;  %v569_v4 = vsub.f32 %v2059_v26, %v545_v13 }
 0x1a1   :  { %1472 = vpow2.f32 %v602_v8 }
 0x1a2   :  { %v2105_v59 = vpop.eup %1462  ;;  %v592_v18 = vmul.f32 1.442695, %v569_v4 }
 0x1a3   :  { %v561_v19 = vpop.xlane.xlu0 %560  ;;  %614 = vadd.xlane.f32.xlu1 %v2105_v59  ;;  %v2110_v42 = vpop.eup %1464 }
 0x1a4   :  { %1474 = vpow2.f32 %v592_v18  ;;  %v577_v14 = vsub.f32 %v2066_v32, %v561_v19 }
 0x1a5   :  { %1476 = vpow2.f32 %v590_v12 }
 0x1a6   :  { %v2112_v22 = vpop.eup %1466  ;;  %v608_v23 = vmul.f32 1.442695, %v577_v14 }
 0x1a7   :  { %620 = vadd.xlane.f32.xlu0 %v2112_v22  ;;  %630 = vadd.xlane.f32.xlu1 %v2110_v42  ;;  %v2116_v25 = vpop.eup %1468 }
 0x1a8   :  { %1478 = vpow2.f32 %v608_v23 }
 0x1a9   :  { %1480 = vpow2.f32 %v606_v24 }
 0x1aa   :  { %v2118_v62 = vpop.eup %1470 }
 0x1ab   :  { %636 = vadd.xlane.f32.xlu0 %v2118_v62  ;;  %618 = vadd.xlane.f32.xlu1 %v2116_v25  ;;  %v2122_v16 = vpop.eup %1472 }
 0x1ae   :  { %v2124_v26 = vpop.eup %1474 }
 0x1af   :  { %624 = vadd.xlane.f32.xlu0 %v2124_v26  ;;  %634 = vadd.xlane.f32.xlu1 %v2122_v16  ;;  %v2128_v27 = vpop.eup %1476 }
 0x1b2   :  { %v2130_v56 = vpop.eup %1478 }
 0x1b3   :  { %640 = vadd.xlane.f32.xlu0 %v2130_v56  ;;  %622 = vadd.xlane.f32.xlu1 %v2128_v27  ;;  %v2134_v32 = vpop.eup %1480 }
 0x1b7   :  { %638 = vadd.xlane.f32.xlu1 %v2134_v32 }
 0x21f   :  { %v613_v57 = vpop.xlane.xlu0 %612 }
 0x220   :  { %v643_v33 = vmax.f32 %v613_v57, 1.1754944e-38 }
 0x222   :  { %1482 = vrcp.f32 %v643_v33 }
 0x223   :  { %v629_v34 = vpop.xlane.xlu0 %628 }
 0x224   :  { %v651_v35 = vmax.f32 %v629_v34, 1.1754944e-38  ;;  %v611_v36 = vpop.xlane.xlu1 %610 }
 0x225   :  { %v642_v28 = vmax.f32 %v611_v36, 1.1754944e-38 }
 0x226   :  { %1484 = vrcp.f32 %v651_v35 }
 0x227   :  { %1486 = vrcp.f32 %v642_v28 }
 0x228   :  { %v617_v38 = vpop.xlane.xlu0 %616  ;;  %v627_v39 = vpop.xlane.xlu1 %626 }
 0x229   :  { %v645_v40 = vmax.f32 %v617_v38, 1.1754944e-38  ;;  %v650_v46 = vmax.f32 %v627_v39, 1.1754944e-38 }
 0x22b   :  { %1488 = vrcp.f32 %v645_v40 }
 0x22c   :  { %v1483_v47 = vpop.eup %1482  ;;  %1490 = vrcp.f32 %v650_v46  ;;  %v633_v48 = vpop.xlane.xlu0 %632 }
 0x22d   :  { %v653_v29 = vmax.f32 %v633_v48, 1.1754944e-38  ;;  %v2138_v49 = vmul.f32 %v1483_v47, %v2079_v53 }
 0x22f   :  { %1492 = vrcp.f32 %v653_v29  ;;  %v707_v50 = vsub.f32 1.0, %v2138_v49 }
 0x230   :  { %v1485_v10 = vpop.eup %1484  ;;  %v615_v11 = vpop.xlane.xlu1 %614 }
 0x231   :  { %v1487_v51 = vpop.eup %1486  ;;  %v644_v52 = vmax.f32 %v615_v11, 1.1754944e-38  ;;  %v723_v15 = vmax.f32 %v707_v50, 1.1754944e-38  ;;  %v2142_v20 = vmul.f32 %v1485_v10, %v2084_v58 }
 0x232   :  { %v2145_v44 = vmul.f32 %v1487_v51, %v2086_v60 }
 0x233   :  { %1494 = vrcp.f32 %v644_v52  ;;  %v2148_v55 = vmul.f32 %v2079_v53, %v723_v15  ;;  %v715_v37 = vsub.f32 1.0, %v2142_v20 }
 0x234   :  { %v621_v61 = vpop.xlane.xlu0 %620  ;;  %v631_v31 = vpop.xlane.xlu1 %630  ;;  %v706_v63 = vsub.f32 1.0, %v2145_v44 }
 0x235   :  { %v1489_v30 = vpop.eup %1488  ;;  %v647_v43 = vmax.f32 %v621_v61, 1.1754944e-38  ;;  %v652_v2 = vmax.f32 %v631_v31, 1.1754944e-38  ;;  %756 = vadd.xlane.f32.xlu0 %v2148_v55  ;;  %v731_v3 = vmax.f32 %v715_v37, 1.1754944e-38 }
 0x236   :  { %v1491_v5 = vpop.eup %1490  ;;  %v722_v45 = vmax.f32 %v706_v63, 1.1754944e-38  ;;  %v2154_v7 = vmul.f32 %v1489_v30, %v2094_v0 }
 0x237   :  { %1496 = vrcp.f32 %v647_v43  ;;  %v2157_v53 = vmul.f32 %v2084_v58, %v731_v3  ;;  %v2160_v54 = vmul.f32 %v1491_v5, %v2092_v1 }
 0x238   :  { %1498 = vrcp.f32 %v652_v2  ;;  %v637_v6 = vpop.xlane.xlu0 %636  ;;  %v619_v8 = vpop.xlane.xlu1 %618  ;;  %v2163_v9 = vmul.f32 %v2086_v60, %v722_v45  ;;  %v709_v13 = vsub.f32 1.0, %v2154_v7 }
 0x239   :  { %v1493_v4 = vpop.eup %1492  ;;  %v655_v17 = vmax.f32 %v637_v6, 1.1754944e-38  ;;  %v646_v18 = vmax.f32 %v619_v8, 1.1754944e-38  ;;  %772 = vadd.xlane.f32.xlu0 %v2157_v53  ;;  %v714_v12 = vsub.f32 1.0, %v2160_v54 }
 0x23a   :  { %754 = vadd.xlane.f32.xlu1 %v2163_v9  ;;  %v725_v58 = vmax.f32 %v709_v13, 1.1754944e-38  ;;  %v2170_v19 = vmul.f32 %v1493_v4, %v2100_v41 }
 0x23b   :  { %1500 = vrcp.f32 %v655_v17  ;;  %v730_v21 = vmax.f32 %v714_v12, 1.1754944e-38 }
 0x23c   :  { %1502 = vrcp.f32 %v646_v18  ;;  %v625_v60 = vpop.xlane.xlu0 %624  ;;  %v635_v14 = vpop.xlane.xlu1 %634  ;;  %v2173_v23 = vmul.f32 %v2094_v0, %v725_v58  ;;  %v717_v24 = vsub.f32 1.0, %v2170_v19 }
 0x23d   :  { %v1495_v57 = vpop.eup %1494  ;;  %v649_v33 = vmax.f32 %v625_v60, 1.1754944e-38  ;;  %v654_v34 = vmax.f32 %v635_v14, 1.1754944e-38  ;;  %v2177_v35 = vmul.f32 %v2092_v1, %v730_v21 }
 0x23e   :  { %760 = vadd.xlane.f32.xlu0 %v2173_v23  ;;  %v733_v36 = vmax.f32 %v717_v24, 1.1754944e-38  ;;  %v2181_v28 = vmul.f32 %v1495_v57, %v2105_v59 }
 0x23f   :  { %1504 = vrcp.f32 %v649_v33  ;;  %770 = vadd.xlane.f32.xlu1 %v2177_v35 }
 0x240   :  { %1506 = vrcp.f32 %v654_v34  ;;  %v641_v0 = vpop.xlane.xlu0 %640  ;;  %v623_v38 = vpop.xlane.xlu1 %622  ;;  %v2185_v39 = vmul.f32 %v2100_v41, %v733_v36  ;;  %v708_v40 = vsub.f32 1.0, %v2181_v28 }
 0x241   :  { %v1497_v46 = vpop.eup %1496  ;;  %v657_v1 = vmax.f32 %v641_v0, 1.1754944e-38  ;;  %v648_v47 = vmax.f32 %v623_v38, 1.1754944e-38 }
 0x242   :  { %v1499_v48 = vpop.eup %1498  ;;  %776 = vadd.xlane.f32.xlu0 %v2185_v39  ;;  %v724_v29 = vmax.f32 %v708_v40, 1.1754944e-38  ;;  %v2190_v50 = vmul.f32 %v1497_v46, %v2112_v22 }
 0x243   :  { %1508 = vrcp.f32 %v657_v1  ;;  %v2193_v10 = vmul.f32 %v1499_v48, %v2110_v42 }
 0x244   :  { %1510 = vrcp.f32 %v648_v47  ;;  %v639_v11 = vpop.xlane.xlu1 %638  ;;  %v2196_v41 = vmul.f32 %v2105_v59, %v724_v29  ;;  %v711_v51 = vsub.f32 1.0, %v2190_v50 }
 0x245   :  { %v1501_v52 = vpop.eup %1500  ;;  %v656_v15 = vmax.f32 %v639_v11, 1.1754944e-38  ;;  %v716_v37 = vsub.f32 1.0, %v2193_v10 }
 0x246   :  { %v1503_v61 = vpop.eup %1502  ;;  %758 = vadd.xlane.f32.xlu1 %v2196_v41  ;;  %v727_v31 = vmax.f32 %v711_v51, 1.1754944e-38  ;;  %v2202_v63 = vmul.f32 %v1501_v52, %v2118_v62 }
 0x247   :  { %1512 = vrcp.f32 %v656_v15  ;;  %v732_v30 = vmax.f32 %v716_v37, 1.1754944e-38  ;;  %v2205_v43 = vmul.f32 %v1503_v61, %v2116_v25 }
 0x248   :  { %v2208_v59 = vmul.f32 %v2112_v22, %v727_v31  ;;  %v719_v2 = vsub.f32 1.0, %v2202_v63 }
 0x249   :  { %v1505_v3 = vpop.eup %1504  ;;  %v2212_v5 = vmul.f32 %v2110_v42, %v732_v30  ;;  %v710_v45 = vsub.f32 1.0, %v2205_v43 }
 0x24a   :  { %v1507_v6 = vpop.eup %1506  ;;  %764 = vadd.xlane.f32.xlu0 %v2208_v59  ;;  %v735_v8 = vmax.f32 %v719_v2, 1.1754944e-38  ;;  %v2217_v13 = vmul.f32 %v1505_v3, %v2124_v26 }
 0x24b   :  { %774 = vadd.xlane.f32.xlu1 %v2212_v5  ;;  %v726_v4 = vmax.f32 %v710_v45, 1.1754944e-38  ;;  %v2221_v22 = vmul.f32 %v1507_v6, %v2122_v16 }
 0x24c   :  { %v2224_v17 = vmul.f32 %v2118_v62, %v735_v8  ;;  %v713_v42 = vsub.f32 1.0, %v2217_v13 }
 0x24d   :  { %v1509_v18 = vpop.eup %1508  ;;  %v2228_v12 = vmul.f32 %v2116_v25, %v726_v4  ;;  %v718_v58 = vsub.f32 1.0, %v2221_v22 }
 0x24e   :  { %v1511_v21 = vpop.eup %1510  ;;  %780 = vadd.xlane.f32.xlu0 %v2224_v17  ;;  %v729_v60 = vmax.f32 %v713_v42, 1.1754944e-38  ;;  %v2233_v14 = vmul.f32 %v1509_v18, %v2130_v56 }
 0x24f   :  { %762 = vadd.xlane.f32.xlu1 %v2228_v12  ;;  %v734_v24 = vmax.f32 %v718_v58, 1.1754944e-38  ;;  %v2237_v62 = vmul.f32 %v1511_v21, %v2128_v27 }
 0x250   :  { %v2240_v57 = vmul.f32 %v2124_v26, %v729_v60  ;;  %v721_v25 = vsub.f32 1.0, %v2233_v14 }
 0x251   :  { %v1513_v33 = vpop.eup %1512  ;;  %v2244_v34 = vmul.f32 %v2122_v16, %v734_v24  ;;  %v712_v36 = vsub.f32 1.0, %v2237_v62 }
 0x252   :  { %768 = vadd.xlane.f32.xlu0 %v2240_v57  ;;  %v737_v0 = vmax.f32 %v721_v25, 1.1754944e-38  ;;  %v2249_v38 = vmul.f32 %v1513_v33, %v2134_v32 }
 0x253   :  { %778 = vadd.xlane.f32.xlu1 %v2244_v34  ;;  %v728_v40 = vmax.f32 %v712_v36, 1.1754944e-38 }
 0x254   :  { %v2253_v26 = vmul.f32 %v2130_v56, %v737_v0  ;;  %v720_v46 = vsub.f32 1.0, %v2249_v38 }
 0x255   :  { %v2257_v1 = vmul.f32 %v2128_v27, %v728_v40 }
 0x256   :  { %784 = vadd.xlane.f32.xlu0 %v2253_v26  ;;  %v736_v16 = vmax.f32 %v720_v46, 1.1754944e-38 }
 0x257   :  { %766 = vadd.xlane.f32.xlu1 %v2257_v1 }
 0x258   :  { %v2262_v47 = vmul.f32 %v2134_v32, %v736_v16 }
 0x25b   :  { %782 = vadd.xlane.f32.xlu1 %v2262_v47 }
 0x2c2   :  { %v757_v48 = vpop.xlane.xlu0 %756 }
 0x2c3   :  { %v787_v29 = vmax.f32 %v757_v48, 1.1754944e-38 }
 0x2c5   :  { %1514 = vrcp.f32 %v787_v29 }
 0x2c6   :  { %v773_v56 = vpop.xlane.xlu0 %772 }
 0x2c7   :  { %v795_v11 = vmax.f32 %v773_v56, 1.1754944e-38  ;;  %v755_v51 = vpop.xlane.xlu1 %754 }
 0x2c8   :  { %v786_v52 = vmax.f32 %v755_v51, 1.1754944e-38 }
 0x2c9   :  { %1516 = vrcp.f32 %v795_v11 }
 0x2ca   :  { %1518 = vrcp.f32 %v786_v52 }
 0x2cb   :  { %v761_v27 = vpop.xlane.xlu0 %760 }
 0x2cc   :  { %v789_v15 = vmax.f32 %v761_v27, 1.1754944e-38  ;;  %v771_v37 = vpop.xlane.xlu1 %770 }
 0x2cd   :  { %v794_v61 = vmax.f32 %v771_v37, 1.1754944e-38 }
 0x2ce   :  { %1520 = vrcp.f32 %v789_v15 }
 0x2cf   :  { %v1515_v31 = vpop.eup %1514  ;;  %1522 = vrcp.f32 %v794_v61  ;;  %v777_v32 = vpop.xlane.xlu0 %776 }
 0x2d0   :  { %v797_v30 = vmax.f32 %v777_v32, 1.1754944e-38  ;;  %v2266_v2 = vmul.f32 %v1515_v31, %v2148_v55 }
 0x2d2   :  { %1524 = vrcp.f32 %v797_v30  ;;  %v851_v3 = vsub.f32 1.0, %v2266_v2 }
 0x2d3   :  { %v1517_v45 = vpop.eup %1516  ;;  %v759_v6 = vpop.xlane.xlu1 %758 }
 0x2d4   :  { %v1519_v8 = vpop.eup %1518  ;;  %v788_v4 = vmax.f32 %v759_v6, 1.1754944e-38  ;;  %v867_v42 = vmax.f32 %v851_v3, 1.1754944e-38  ;;  %v2270_v18 = vmul.f32 %v1517_v45, %v2157_v53 }
 0x2d5   :  { %v2273_v58 = vmul.f32 %v1519_v8, %v2163_v9 }
 0x2d6   :  { %1526 = vrcp.f32 %v788_v4  ;;  %v2276_v21 = vmul.f32 %v867_v42, %v2148_v55  ;;  %v859_v60 = vsub.f32 1.0, %v2270_v18 }
 0x2d7   :  { %v765_v24 = vpop.xlane.xlu0 %764  ;;  %v850_v25 = vsub.f32 1.0, %v2273_v58 }
 0x2d8   :  { %v1521_v33 = vpop.eup %1520  ;;  %v791_v36 = vmax.f32 %v765_v24, 1.1754944e-38  ;;  %v775_v0 = vpop.xlane.xlu1 %774  ;;  %900 = vadd.xlane.f32.xlu0 %v2276_v21  ;;  %v875_v40 = vmax.f32 %v859_v60, 1.1754944e-38 }
 0x2d9   :  { %v1523_v46 = vpop.eup %1522  ;;  %v796_v16 = vmax.f32 %v775_v0, 1.1754944e-38  ;;  %v866_v48 = vmax.f32 %v850_v25, 1.1754944e-38  ;;  %v2282_v29 = vmul.f32 %v1521_v33, %v2173_v23 }
 0x2da   :  { %1528 = vrcp.f32 %v791_v36  ;;  %v2285_v55 = vmul.f32 %v875_v40, %v2157_v53  ;;  %v2288_v56 = vmul.f32 %v1523_v46, %v2177_v35 }
 0x2db   :  { %1530 = vrcp.f32 %v796_v16  ;;  %v781_v11 = vpop.xlane.xlu0 %780  ;;  %v2291_v51 = vmul.f32 %v866_v48, %v2163_v9  ;;  %v853_v52 = vsub.f32 1.0, %v2282_v29 }
 0x2dc   :  { %v1525_v27 = vpop.eup %1524  ;;  %v799_v15 = vmax.f32 %v781_v11, 1.1754944e-38  ;;  %v763_v37 = vpop.xlane.xlu1 %762  ;;  %916 = vadd.xlane.f32.xlu0 %v2285_v55  ;;  %v858_v61 = vsub.f32 1.0, %v2288_v56 }
 0x2dd   :  { %v790_v31 = vmax.f32 %v763_v37, 1.1754944e-38  ;;  %898 = vadd.xlane.f32.xlu1 %v2291_v51  ;;  %v869_v53 = vmax.f32 %v853_v52, 1.1754944e-38  ;;  %v2298_v32 = vmul.f32 %v1525_v27, %v2185_v39 }
 0x2de   :  { %1532 = vrcp.f32 %v799_v15  ;;  %v874_v30 = vmax.f32 %v858_v61, 1.1754944e-38 }
 0x2df   :  { %1534 = vrcp.f32 %v790_v31  ;;  %v769_v9 = vpop.xlane.xlu0 %768  ;;  %v2301_v3 = vmul.f32 %v869_v53, %v2173_v23  ;;  %v861_v45 = vsub.f32 1.0, %v2298_v32 }
 0x2e0   :  { %v1527_v6 = vpop.eup %1526  ;;  %v793_v8 = vmax.f32 %v769_v9, 1.1754944e-38  ;;  %v779_v4 = vpop.xlane.xlu1 %778  ;;  %v2305_v42 = vmul.f32 %v874_v30, %v2177_v35 }
 0x2e1   :  { %v798_v60 = vmax.f32 %v779_v4, 1.1754944e-38  ;;  %904 = vadd.xlane.f32.xlu0 %v2301_v3  ;;  %v877_v24 = vmax.f32 %v861_v45, 1.1754944e-38  ;;  %v2309_v25 = vmul.f32 %v1527_v6, %v2196_v41 }
 0x2e2   :  { %1536 = vrcp.f32 %v793_v8  ;;  %914 = vadd.xlane.f32.xlu1 %v2305_v42 }
 0x2e3   :  { %1538 = vrcp.f32 %v798_v60  ;;  %v785_v23 = vpop.xlane.xlu0 %784  ;;  %v2313_v33 = vmul.f32 %v877_v24, %v2185_v39  ;;  %v852_v36 = vsub.f32 1.0, %v2309_v25 }
 0x2e4   :  { %v1529_v0 = vpop.eup %1528  ;;  %v801_v35 = vmax.f32 %v785_v23, 1.1754944e-38  ;;  %v767_v40 = vpop.xlane.xlu1 %766 }
 0x2e5   :  { %v1531_v46 = vpop.eup %1530  ;;  %v792_v16 = vmax.f32 %v767_v40, 1.1754944e-38  ;;  %920 = vadd.xlane.f32.xlu0 %v2313_v33  ;;  %v868_v48 = vmax.f32 %v852_v36, 1.1754944e-38  ;;  %v2318_v11 = vmul.f32 %v1529_v0, %v2208_v59 }
 0x2e6   :  { %1540 = vrcp.f32 %v801_v35  ;;  %v2321_v52 = vmul.f32 %v1531_v46, %v2212_v5 }
 0x2e7   :  { %1542 = vrcp.f32 %v792_v16  ;;  %v2324_v39 = vmul.f32 %v868_v48, %v2196_v41  ;;  %v855_v27 = vsub.f32 1.0, %v2318_v11 }
 0x2e8   :  { %v1533_v15 = vpop.eup %1532  ;;  %v783_v37 = vpop.xlane.xlu1 %782  ;;  %v860_v61 = vsub.f32 1.0, %v2321_v52 }
 0x2e9   :  { %v1535_v31 = vpop.eup %1534  ;;  %v800_v53 = vmax.f32 %v783_v37, 1.1754944e-38  ;;  %902 = vadd.xlane.f32.xlu1 %v2324_v39  ;;  %v871_v30 = vmax.f32 %v855_v27, 1.1754944e-38  ;;  %v2330_v9 = vmul.f32 %v1533_v15, %v2224_v17 }
 0x2ea   :  { %v876_v45 = vmax.f32 %v860_v61, 1.1754944e-38  ;;  %v2333_v6 = vmul.f32 %v1535_v31, %v2228_v12 }
 0x2eb   :  { %1544 = vrcp.f32 %v800_v53  ;;  %v2336_v41 = vmul.f32 %v871_v30, %v2208_v59  ;;  %v863_v8 = vsub.f32 1.0, %v2330_v9 }
 0x2ec   :  { %v1537_v4 = vpop.eup %1536  ;;  %v2340_v60 = vmul.f32 %v876_v45, %v2212_v5  ;;  %v854_v24 = vsub.f32 1.0, %v2333_v6 }
 0x2ed   :  { %v1539_v23 = vpop.eup %1538  ;;  %908 = vadd.xlane.f32.xlu0 %v2336_v41  ;;  %v879_v36 = vmax.f32 %v863_v8, 1.1754944e-38  ;;  %v2345_v0 = vmul.f32 %v1537_v4, %v2240_v57 }
 0x2ee   :  { %918 = vadd.xlane.f32.xlu1 %v2340_v60  ;;  %v870_v35 = vmax.f32 %v854_v24, 1.1754944e-38  ;;  %v2349_v59 = vmul.f32 %v1539_v23, %v2244_v34 }
 0x2ef   :  { %v2352_v40 = vmul.f32 %v879_v36, %v2224_v17  ;;  %v857_v5 = vsub.f32 1.0, %v2345_v0 }
 0x2f0   :  { %v1541_v46 = vpop.eup %1540  ;;  %v2356_v16 = vmul.f32 %v870_v35, %v2228_v12  ;;  %v862_v48 = vsub.f32 1.0, %v2349_v59 }
 0x2f1   :  { %v1543_v27 = vpop.eup %1542  ;;  %924 = vadd.xlane.f32.xlu0 %v2352_v40  ;;  %v873_v15 = vmax.f32 %v857_v5, 1.1754944e-38  ;;  %v2361_v37 = vmul.f32 %v1541_v46, %v2253_v26 }
 0x2f2   :  { %906 = vadd.xlane.f32.xlu1 %v2356_v16  ;;  %v878_v61 = vmax.f32 %v862_v48, 1.1754944e-38  ;;  %v2365_v17 = vmul.f32 %v1543_v27, %v2257_v1 }
 0x2f3   :  { %v2368_v31 = vmul.f32 %v873_v15, %v2240_v57  ;;  %v865_v12 = vsub.f32 1.0, %v2361_v37 }
 0x2f4   :  { %v2372_v53 = vmul.f32 %v878_v61, %v2244_v34  ;;  %v856_v30 = vsub.f32 1.0, %v2365_v17 }
 0x2f5   :  { %v1545_v45 = vpop.eup %1544  ;;  %912 = vadd.xlane.f32.xlu0 %v2368_v31  ;;  %v881_v8 = vmax.f32 %v865_v12, 1.1754944e-38 }
 0x2f6   :  { %922 = vadd.xlane.f32.xlu1 %v2372_v53  ;;  %v872_v4 = vmax.f32 %v856_v30, 1.1754944e-38  ;;  %v2378_v24 = vmul.f32 %v1545_v45, %v2262_v47 }
 0x2f7   :  { %v2381_v57 = vmul.f32 %v881_v8, %v2253_v26  ;;  %v835_v8 = vadd.f32 %v2266_v2, %v2138_v49  ;;  %v834_v49 = vadd.f32 %v2273_v58, %v2145_v44  ;;  %v837_v58 = vadd.f32 %v2282_v29, %v2154_v7 }
 0x2f8   :  { %v2384_v23 = vmul.f32 %v872_v4, %v2257_v1  ;;  %v864_v34 = vsub.f32 1.0, %v2378_v24 }
 0x2f9   :  { %928 = vadd.xlane.f32.xlu0 %v2381_v57 }
 0x2fa   :  { %910 = vadd.xlane.f32.xlu1 %v2384_v23  ;;  %v880_v36 = vmax.f32 %v864_v34, 1.1754944e-38 }
 0x2fc   :  { %v2390_v35 = vmul.f32 %v880_v36, %v2262_v47 }
 0x2fe   :  { %926 = vadd.xlane.f32.xlu1 %v2390_v35 }
 0x365   :  { %v901_v5 = vpop.xlane.xlu0 %900 }
 0x366   :  { %v931_v46 = vmax.f32 %v901_v5, 1.1754944e-38 }
 0x368   :  { %1546 = vrcp.f32 %v931_v46 }
 0x369   :  { %v917_v26 = vpop.xlane.xlu0 %916 }
 0x36a   :  { %v939_v48 = vmax.f32 %v917_v26, 1.1754944e-38  ;;  %v899_v27 = vpop.xlane.xlu1 %898 }
 0x36b   :  { %v930_v1 = vmax.f32 %v899_v27, 1.1754944e-38  ;;  %v843_v27 = vadd.f32 %v2270_v18, %v2142_v20 }
 0x36c   :  { %1548 = vrcp.f32 %v939_v48 }
 0x36d   :  { %1550 = vrcp.f32 %v930_v1 }
 0x36e   :  { %v905_v15 = vpop.xlane.xlu0 %904 }
 0x36f   :  { %v933_v61 = vmax.f32 %v905_v15, 1.1754944e-38  ;;  %v915_v12 = vpop.xlane.xlu1 %914 }
 0x370   :  { %v938_v30 = vmax.f32 %v915_v12, 1.1754944e-38 }
 0x371   :  { %1552 = vrcp.f32 %v933_v61 }
 0x372   :  { %v1547_v45 = vpop.eup %1546  ;;  %1554 = vrcp.f32 %v938_v30  ;;  %v921_v47 = vpop.xlane.xlu0 %920 }
 0x373   :  { %v941_v4 = vmax.f32 %v921_v47, 1.1754944e-38  ;;  %v963_v34 = vmul.f32 %v1547_v45, %v2276_v21 }
 0x375   :  { %1556 = vrcp.f32 %v941_v4  ;;  %v995_v36 = vsub.f32 1.0, %v963_v34  ;;  %v2396_v5 = vadd.f32 %v963_v34, %v835_v8 }
 0x376   :  { %v1549_v46 = vpop.eup %1548  ;;  %v903_v26 = vpop.xlane.xlu1 %902 }
 0x377   :  { %v1551_v48 = vpop.eup %1550  ;;  %v932_v1 = vmax.f32 %v903_v26, 1.1754944e-38  ;;  %v1011_v15 = vmax.f32 %v995_v36, 1.1754944e-38  ;;  %v971_v61 = vmul.f32 %v1549_v46, %v2285_v55 }
 0x378   :  { %v962_v2 = vmul.f32 %v1551_v48, %v2291_v51  ;;  %v842_v48 = vadd.f32 %v2288_v56, %v2160_v54 }
 0x379   :  { %1558 = vrcp.f32 %v932_v1  ;;  %v2405_v12 = vmul.f32 %v1011_v15, %v2276_v21  ;;  %v1003_v30 = vsub.f32 1.0, %v971_v61  ;;  %v2407_v45 = vadd.f32 %v971_v61, %v843_v27 }
 0x37a   :  { %v909_v47 = vpop.xlane.xlu0 %908  ;;  %v994_v8 = vsub.f32 1.0, %v962_v2  ;;  %v2409_v4 = vadd.f32 %v962_v2, %v834_v49 }
 0x37b   :  { %v1553_v20 = vpop.eup %1552  ;;  %v935_v18 = vmax.f32 %v909_v47, 1.1754944e-38  ;;  %v919_v34 = vpop.xlane.xlu1 %918  ;;  %1044 = vadd.xlane.f32.xlu0 %v2405_v12  ;;  %v1019_v36 = vmax.f32 %v1003_v30, 1.1754944e-38 }
 0x37c   :  { %v1555_v44 = vpop.eup %1554  ;;  %v940_v46 = vmax.f32 %v919_v34, 1.1754944e-38  ;;  %v1010_v21 = vmax.f32 %v994_v8, 1.1754944e-38  ;;  %v965_v26 = vmul.f32 %v1553_v20, %v2301_v3 }
 0x37d   :  { %1560 = vrcp.f32 %v935_v18  ;;  %v2418_v27 = vmul.f32 %v1019_v36, %v2285_v55  ;;  %v970_v1 = vmul.f32 %v1555_v44, %v2305_v42  ;;  %v845_v55 = vadd.f32 %v2298_v32, %v2170_v19 }
 0x37e   :  { %1562 = vrcp.f32 %v940_v46  ;;  %v925_v15 = vpop.xlane.xlu0 %924  ;;  %v2422_v61 = vmul.f32 %v1010_v21, %v2291_v51  ;;  %v997_v49 = vsub.f32 1.0, %v965_v26  ;;  %v2424_v7 = vadd.f32 %v965_v26, %v837_v58 }
 0x37f   :  { %v1557_v29 = vpop.eup %1556  ;;  %v943_v2 = vmax.f32 %v925_v15, 1.1754944e-38  ;;  %v907_v30 = vpop.xlane.xlu1 %906  ;;  %1060 = vadd.xlane.f32.xlu0 %v2418_v27  ;;  %v1002_v54 = vsub.f32 1.0, %v970_v1  ;;  %v2427_v56 = vadd.f32 %v970_v1, %v842_v48  ;;  %v836_v32 = vadd.f32 %v2309_v25, %v2181_v28 }
 0x380   :  { %v934_v47 = vmax.f32 %v907_v30, 1.1754944e-38  ;;  %1042 = vadd.xlane.f32.xlu1 %v2422_v61  ;;  %v1013_v8 = vmax.f32 %v997_v49, 1.1754944e-38  ;;  %v973_v51 = vmul.f32 %v1557_v29, %v2313_v33  ;;  %v839_v30 = vadd.f32 %v2318_v11, %v2190_v50 }
 0x381   :  { %1564 = vrcp.f32 %v943_v2  ;;  %v1018_v20 = vmax.f32 %v1002_v54, 1.1754944e-38 }
 0x382   :  { %1566 = vrcp.f32 %v934_v47  ;;  %v913_v18 = vpop.xlane.xlu0 %912  ;;  %v2434_v34 = vmul.f32 %v1013_v8, %v2301_v3  ;;  %v1005_v36 = vsub.f32 1.0, %v973_v51  ;;  %v2436_v44 = vadd.f32 %v973_v51, %v845_v55 }
 0x383   :  { %v1559_v58 = vpop.eup %1558  ;;  %v937_v46 = vmax.f32 %v913_v18, 1.1754944e-38  ;;  %v923_v21 = vpop.xlane.xlu1 %922  ;;  %v2439_v19 = vmul.f32 %v1018_v20, %v2305_v42 }
 0x384   :  { %v942_v26 = vmax.f32 %v923_v21, 1.1754944e-38  ;;  %1048 = vadd.xlane.f32.xlu0 %v2434_v34  ;;  %v1021_v48 = vmax.f32 %v1005_v36, 1.1754944e-38  ;;  %v964_v1 = vmul.f32 %v1559_v58, %v2324_v39  ;;  %v847_v21 = vadd.f32 %v2330_v9, %v2202_v63 }
 0x385   :  { %1568 = vrcp.f32 %v937_v46  ;;  %1058 = vadd.xlane.f32.xlu1 %v2439_v19 }
 0x386   :  { %1570 = vrcp.f32 %v942_v26  ;;  %v929_v3 = vpop.xlane.xlu0 %928  ;;  %v2447_v15 = vmul.f32 %v1021_v48, %v2313_v33  ;;  %v996_v49 = vsub.f32 1.0, %v964_v1  ;;  %v2449_v42 = vadd.f32 %v964_v1, %v836_v32 }
 0x387   :  { %v1561_v29 = vpop.eup %1560  ;;  %v945_v2 = vmax.f32 %v929_v3, 1.1754944e-38  ;;  %v911_v28 = vpop.xlane.xlu1 %910  ;;  %v844_v33 = vadd.f32 %v2321_v52, %v2193_v10 }
 0x388   :  { %v1563_v25 = vpop.eup %1562  ;;  %v936_v54 = vmax.f32 %v911_v28, 1.1754944e-38  ;;  %1064 = vadd.xlane.f32.xlu0 %v2447_v15  ;;  %v1012_v55 = vmax.f32 %v996_v49, 1.1754944e-38  ;;  %v967_v47 = vmul.f32 %v1561_v29, %v2336_v41 }
 0x389   :  { %1572 = vrcp.f32 %v945_v2  ;;  %v972_v8 = vmul.f32 %v1563_v25, %v2340_v60  ;;  %v846_v25 = vadd.f32 %v2349_v59, %v2221_v22  ;;  %v849_v22 = vadd.f32 %v2361_v37, %v2233_v14 }
 0x38a   :  { %1574 = vrcp.f32 %v936_v54  ;;  %v2459_v51 = vmul.f32 %v1012_v55, %v2324_v39  ;;  %v999_v20 = vsub.f32 1.0, %v967_v47  ;;  %v2461_v18 = vadd.f32 %v967_v47, %v839_v30 }
 0x38b   :  { %v1565_v50 = vpop.eup %1564  ;;  %v927_v11 = vpop.xlane.xlu1 %926  ;;  %v1004_v36 = vsub.f32 1.0, %v972_v8  ;;  %v2463_v58 = vadd.f32 %v972_v8, %v844_v33  ;;  %v838_v39 = vadd.f32 %v2333_v6, %v2205_v43  ;;  %v841_v43 = vadd.f32 %v2345_v0, %v2217_v13 }
 0x38c   :  { %v1567_v46 = vpop.eup %1566  ;;  %v944_v10 = vmax.f32 %v927_v11, 1.1754944e-38  ;;  %1046 = vadd.xlane.f32.xlu1 %v2459_v51  ;;  %v1015_v52 = vmax.f32 %v999_v20, 1.1754944e-38  ;;  %v975_v32 = vmul.f32 %v1565_v50, %v2352_v40  ;;  %v840_v50 = vadd.f32 %v2365_v17, %v2237_v62 }
 0x38d   :  { %v1020_v26 = vmax.f32 %v1004_v36, 1.1754944e-38  ;;  %v966_v48 = vmul.f32 %v1567_v46, %v2356_v16  ;;  %v848_v17 = vadd.f32 %v2378_v24, %v2249_v38 }
 0x38e   :  { %1576 = vrcp.f32 %v944_v10  ;;  %v2473_v1 = vmul.f32 %v1015_v52, %v2336_v41  ;;  %v1007_v3 = vsub.f32 1.0, %v975_v32  ;;  %v2475_v49 = vadd.f32 %v975_v32, %v847_v21 }
 0x38f   :  { %v1569_v63 = vpop.eup %1568  ;;  %v2478_v9 = vmul.f32 %v1020_v26, %v2340_v60  ;;  %v998_v29 = vsub.f32 1.0, %v966_v48  ;;  %v2480_v2 = vadd.f32 %v966_v48, %v838_v39 }
 0x390   :  { %v1571_v28 = vpop.eup %1570  ;;  %1052 = vadd.xlane.f32.xlu0 %v2473_v1  ;;  %v1023_v6 = vmax.f32 %v1007_v3, 1.1754944e-38  ;;  %v969_v41 = vmul.f32 %v1569_v63, %v2368_v31 }
 0x391   :  { %1062 = vadd.xlane.f32.xlu1 %v2478_v9  ;;  %v1014_v30 = vmax.f32 %v998_v29, 1.1754944e-38  ;;  %v974_v60 = vmul.f32 %v1571_v28, %v2372_v53 }
 0x392   :  { %v2491_v54 = vmul.f32 %v1023_v6, %v2352_v40  ;;  %v1001_v55 = vsub.f32 1.0, %v969_v41  ;;  %v2493_v47 = vadd.f32 %v969_v41, %v841_v43 }
 0x393   :  { %v1573_v13 = vpop.eup %1572  ;;  %v2496_v0 = vmul.f32 %v1014_v30, %v2356_v16  ;;  %v1006_v33 = vsub.f32 1.0, %v974_v60  ;;  %v2498_v8 = vadd.f32 %v974_v60, %v846_v25 }
 0x394   :  { %v1575_v20 = vpop.eup %1574  ;;  %1068 = vadd.xlane.f32.xlu0 %v2491_v54  ;;  %v1017_v59 = vmax.f32 %v1001_v55, 1.1754944e-38  ;;  %v977_v40 = vmul.f32 %v1573_v13, %v2381_v57 }
 0x395   :  { %1050 = vadd.xlane.f32.xlu1 %v2496_v0  ;;  %v1022_v11 = vmax.f32 %v1006_v33, 1.1754944e-38  ;;  %v968_v16 = vmul.f32 %v1575_v20, %v2384_v23 }
 0x396   :  { %v2509_v36 = vmul.f32 %v1017_v59, %v2368_v31  ;;  %v1009_v46 = vsub.f32 1.0, %v977_v40  ;;  %v2511_v21 = vadd.f32 %v977_v40, %v849_v22 }
 0x397   :  { %v2514_v14 = vmul.f32 %v1022_v11, %v2372_v53  ;;  %v1000_v37 = vsub.f32 1.0, %v968_v16  ;;  %v2516_v10 = vadd.f32 %v968_v16, %v840_v50 }
 0x398   :  { %v1577_v52 = vpop.eup %1576  ;;  %1056 = vadd.xlane.f32.xlu0 %v2509_v36  ;;  %v1025_v62 = vmax.f32 %v1009_v46, 1.1754944e-38 }
 0x399   :  { %1066 = vadd.xlane.f32.xlu1 %v2514_v14  ;;  %v1016_v31 = vmax.f32 %v1000_v37, 1.1754944e-38  ;;  %v976_v32 = vmul.f32 %v1577_v52, %v2390_v35 }
 0x39a   :  { %v2524_v39 = vmul.f32 %v1025_v62, %v2381_v57 }
 0x39b   :  { %v2527_v53 = vmul.f32 %v1016_v31, %v2384_v23  ;;  %v1008_v26 = vsub.f32 1.0, %v976_v32  ;;  %v2529_v48 = vadd.f32 %v976_v32, %v848_v17 }
 0x39c   :  { %1072 = vadd.xlane.f32.xlu0 %v2524_v39 }
 0x39d   :  { %1054 = vadd.xlane.f32.xlu1 %v2527_v53  ;;  %v1024_v3 = vmax.f32 %v1008_v26, 1.1754944e-38 }
 0x39f   :  { %v2534_v38 = vmul.f32 %v1024_v3, %v2390_v35 }
 0x3a1   :  { %1070 = vadd.xlane.f32.xlu1 %v2534_v38 }
 0x408   :  { %v1045_v24 = vpop.xlane.xlu0 %1044 }
 0x409   :  { %v1075_v63 = vmax.f32 %v1045_v24, 1.1754944e-38 }
 0x40b   :  { %1578 = vrcp.f32 %v1075_v63 }
 0x40c   :  { %v1061_v57 = vpop.xlane.xlu0 %1060 }
 0x40d   :  { %v1083_v29 = vmax.f32 %v1061_v57, 1.1754944e-38  ;;  %v1043_v23 = vpop.xlane.xlu1 %1042 }
 0x40e   :  { %v1074_v28 = vmax.f32 %v1043_v23, 1.1754944e-38 }
 0x40f   :  { %1580 = vrcp.f32 %v1083_v29 }
 0x410   :  { %1582 = vrcp.f32 %v1074_v28 }
 0x411   :  { %v1049_v43 = vpop.xlane.xlu0 %1048 }
 0x412   :  { %v1077_v6 = vmax.f32 %v1049_v43, 1.1754944e-38  ;;  %v1059_v41 = vpop.xlane.xlu1 %1058 }
 0x413   :  { %v1082_v25 = vmax.f32 %v1059_v41, 1.1754944e-38 }
 0x414   :  { %1584 = vrcp.f32 %v1077_v6 }
 0x415   :  { %v1579_v30 = vpop.eup %1578  ;;  %1586 = vrcp.f32 %v1082_v25  ;;  %v1065_v35 = vpop.xlane.xlu0 %1064 }
 0x416   :  { %v1085_v60 = vmax.f32 %v1065_v35, 1.1754944e-38  ;;  %v1107_v55 = vmul.f32 %v1579_v30, %v2405_v12 }
 0x418   :  { %1588 = vrcp.f32 %v1085_v60  ;;  %v1139_v13 = vsub.f32 1.0, %v1107_v55  ;;  %v2539_v33 = vadd.f32 %v1107_v55, %v2396_v5 }
 0x419   :  { %v1581_v20 = vpop.eup %1580  ;;  %v1047_v22 = vpop.xlane.xlu1 %1046 }
 0x41a   :  { %v1583_v59 = vpop.eup %1582  ;;  %v1076_v40 = vmax.f32 %v1047_v22, 1.1754944e-38  ;;  %v1155_v50 = vmax.f32 %v1139_v13, 1.1754944e-38  ;;  %v1115_v11 = vmul.f32 %v1581_v20, %v2418_v27 }
 0x41b   :  { %v1106_v16 = vmul.f32 %v1583_v59, %v2422_v61 }
 0x41c   :  { %1590 = vrcp.f32 %v1076_v40  ;;  %v2544_v46 = vmul.f32 %v1155_v50, %v2405_v12  ;;  %v1147_v37 = vsub.f32 1.0, %v1115_v11  ;;  %v2547_v52 = vadd.f32 %v1115_v11, %v2407_v45 }
 0x41d   :  { %v1053_v62 = vpop.xlane.xlu0 %1052  ;;  %v1138_v5 = vsub.f32 1.0, %v1106_v16  ;;  %v2550_v17 = vadd.f32 %v1106_v16, %v2409_v4 }
 0x41e   :  { %v1585_v31 = vpop.eup %1584  ;;  %v1079_v32 = vmax.f32 %v1053_v62, 1.1754944e-38  ;;  %v1063_v26 = vpop.xlane.xlu1 %1062  ;;  %1188 = vadd.xlane.f32.xlu0 %v2544_v46  ;;  %v1163_v3 = vmax.f32 %v1147_v37, 1.1754944e-38 }
 0x41f   :  { %v1587_v24 = vpop.eup %1586  ;;  %v1084_v63 = vmax.f32 %v1063_v26, 1.1754944e-38  ;;  %v1154_v57 = vmax.f32 %v1138_v5, 1.1754944e-38  ;;  %v1109_v12 = vmul.f32 %v1585_v31, %v2434_v34 }
 0x420   :  { %1592 = vrcp.f32 %v1079_v32  ;;  %v2555_v45 = vmul.f32 %v1163_v3, %v2418_v27  ;;  %v1114_v29 = vmul.f32 %v1587_v24, %v2439_v19 }
 0x421   :  { %1594 = vrcp.f32 %v1084_v63  ;;  %v1069_v4 = vpop.xlane.xlu0 %1068  ;;  %v2559_v23 = vmul.f32 %v1154_v57, %v2422_v61  ;;  %v1141_v28 = vsub.f32 1.0, %v1109_v12  ;;  %v2562_v43 = vadd.f32 %v1109_v12, %v2424_v7 }
 0x422   :  { %v1589_v6 = vpop.eup %1588  ;;  %v1087_v41 = vmax.f32 %v1069_v4, 1.1754944e-38  ;;  %v1051_v25 = vpop.xlane.xlu1 %1050  ;;  %1204 = vadd.xlane.f32.xlu0 %v2555_v45  ;;  %v1146_v30 = vsub.f32 1.0, %v1114_v29  ;;  %v2566_v27 = vadd.f32 %v1114_v29, %v2427_v56 }
 0x423   :  { %v1078_v35 = vmax.f32 %v1051_v25, 1.1754944e-38  ;;  %1186 = vadd.xlane.f32.xlu1 %v2559_v23  ;;  %v1157_v60 = vmax.f32 %v1141_v28, 1.1754944e-38  ;;  %v1117_v61 = vmul.f32 %v1589_v6, %v2447_v15 }
 0x424   :  { %1596 = vrcp.f32 %v1087_v41  ;;  %v1162_v55 = vmax.f32 %v1146_v30, 1.1754944e-38 }
 0x425   :  { %1598 = vrcp.f32 %v1078_v35  ;;  %v1057_v7 = vpop.xlane.xlu0 %1056  ;;  %v2571_v13 = vmul.f32 %v1157_v60, %v2434_v34  ;;  %v1149_v20 = vsub.f32 1.0, %v1117_v61  ;;  %v2574_v22 = vadd.f32 %v1117_v61, %v2436_v44 }
 0x426   :  { %v1591_v59 = vpop.eup %1590  ;;  %v1081_v56 = vmax.f32 %v1057_v7, 1.1754944e-38  ;;  %v1067_v40 = vpop.xlane.xlu1 %1066  ;;  %v2577_v50 = vmul.f32 %v1162_v55, %v2439_v19 }
 0x427   :  { %v1086_v11 = vmax.f32 %v1067_v40, 1.1754944e-38  ;;  %1192 = vadd.xlane.f32.xlu0 %v2571_v13  ;;  %v1165_v16 = vmax.f32 %v1149_v20, 1.1754944e-38  ;;  %v1108_v37 = vmul.f32 %v1591_v59, %v2459_v51 }
 0x428   :  { %1600 = vrcp.f32 %v1081_v56  ;;  %1202 = vadd.xlane.f32.xlu1 %v2577_v50 }
 0x429   :  { %1602 = vrcp.f32 %v1086_v11  ;;  %v1073_v34 = vpop.xlane.xlu0 %1072  ;;  %v2583_v44 = vmul.f32 %v1165_v16, %v2447_v15  ;;  %v1140_v62 = vsub.f32 1.0, %v1108_v37  ;;  %v2586_v5 = vadd.f32 %v1108_v37, %v2449_v42 }
 0x42a   :  { %v1593_v19 = vpop.eup %1592  ;;  %v1089_v31 = vmax.f32 %v1073_v34, 1.1754944e-38  ;;  %v1055_v32 = vpop.xlane.xlu1 %1054 }
 0x42b   :  { %v1595_v26 = vpop.eup %1594  ;;  %v1080_v3 = vmax.f32 %v1055_v32, 1.1754944e-38  ;;  %1208 = vadd.xlane.f32.xlu0 %v2583_v44  ;;  %v1156_v24 = vmax.f32 %v1140_v62, 1.1754944e-38  ;;  %v1111_v63 = vmul.f32 %v1593_v19, %v2473_v1 }
 0x42c   :  { %1604 = vrcp.f32 %v1089_v31  ;;  %v1116_v57 = vmul.f32 %v1595_v26, %v2478_v9 }
 0x42d   :  { %1606 = vrcp.f32 %v1080_v3  ;;  %v2592_v15 = vmul.f32 %v1156_v24, %v2459_v51  ;;  %v1143_v12 = vsub.f32 1.0, %v1111_v63  ;;  %v2595_v42 = vadd.f32 %v1111_v63, %v2461_v18 }
 0x42e   :  { %v1597_v29 = vpop.eup %1596  ;;  %v1071_v4 = vpop.xlane.xlu1 %1070  ;;  %v1148_v28 = vsub.f32 1.0, %v1116_v57  ;;  %v2598_v6 = vadd.f32 %v1116_v57, %v2463_v58 }
 0x42f   :  { %v1599_v41 = vpop.eup %1598  ;;  %v1088_v25 = vmax.f32 %v1071_v4, 1.1754944e-38  ;;  %1190 = vadd.xlane.f32.xlu1 %v2592_v15  ;;  %v1159_v30 = vmax.f32 %v1143_v12, 1.1754944e-38  ;;  %v1119_v35 = vmul.f32 %v1597_v29, %v2491_v54 }
 0x430   :  { %v1164_v60 = vmax.f32 %v1148_v28, 1.1754944e-38  ;;  %v1110_v51 = vmul.f32 %v1599_v41, %v2496_v0 }
 0x431   :  { %1608 = vrcp.f32 %v1088_v25  ;;  %v2604_v18 = vmul.f32 %v1159_v30, %v2473_v1  ;;  %v1151_v61 = vsub.f32 1.0, %v1119_v35  ;;  %v2607_v55 = vadd.f32 %v1119_v35, %v2475_v49 }
 0x432   :  { %v1601_v58 = vpop.eup %1600  ;;  %v2610_v7 = vmul.f32 %v1164_v60, %v2478_v9  ;;  %v1142_v20 = vsub.f32 1.0, %v1110_v51  ;;  %v2613_v59 = vadd.f32 %v1110_v51, %v2480_v2 }
 0x433   :  { %v1603_v56 = vpop.eup %1602  ;;  %1196 = vadd.xlane.f32.xlu0 %v2604_v18  ;;  %v1167_v40 = vmax.f32 %v1151_v61, 1.1754944e-38  ;;  %v1113_v11 = vmul.f32 %v1601_v58, %v2509_v36 }
 0x434   :  { %1206 = vadd.xlane.f32.xlu1 %v2610_v7  ;;  %v1158_v1 = vmax.f32 %v1142_v20, 1.1754944e-38  ;;  %v1118_v49 = vmul.f32 %v1603_v56, %v2514_v14 }
 0x435   :  { %v2620_v16 = vmul.f32 %v1167_v40, %v2491_v54  ;;  %v1145_v9 = vsub.f32 1.0, %v1113_v11  ;;  %v2623_v37 = vadd.f32 %v1113_v11, %v2493_v47 }
 0x436   :  { %v1605_v2 = vpop.eup %1604  ;;  %v2626_v34 = vmul.f32 %v1158_v1, %v2496_v0  ;;  %v1150_v62 = vsub.f32 1.0, %v1118_v49  ;;  %v2629_v19 = vadd.f32 %v1118_v49, %v2498_v8 }
 0x437   :  { %v1607_v31 = vpop.eup %1606  ;;  %1212 = vadd.xlane.f32.xlu0 %v2620_v16  ;;  %v1161_v32 = vmax.f32 %v1145_v9, 1.1754944e-38  ;;  %v1121_v26 = vmul.f32 %v1605_v2, %v2524_v39 }
 0x438   :  { %1194 = vadd.xlane.f32.xlu1 %v2626_v34  ;;  %v1166_v54 = vmax.f32 %v1150_v62, 1.1754944e-38  ;;  %v1112_v47 = vmul.f32 %v1607_v31, %v2527_v53 }
 0x439   :  { %v2636_v3 = vmul.f32 %v1161_v32, %v2509_v36  ;;  %v1153_v0 = vsub.f32 1.0, %v1121_v26  ;;  %v2639_v24 = vadd.f32 %v1121_v26, %v2511_v21 }
 0x43a   :  { %v2642_v8 = vmul.f32 %v1166_v54, %v2514_v14  ;;  %v1144_v63 = vsub.f32 1.0, %v1112_v47  ;;  %v2645_v57 = vadd.f32 %v1112_v47, %v2516_v10 }
 0x43b   :  { %v1609_v12 = vpop.eup %1608  ;;  %1200 = vadd.xlane.f32.xlu0 %v2636_v3  ;;  %v1169_v29 = vmax.f32 %v1153_v0, 1.1754944e-38 }
 0x43c   :  { %1210 = vadd.xlane.f32.xlu1 %v2642_v8  ;;  %v1160_v4 = vmax.f32 %v1144_v63, 1.1754944e-38  ;;  %v1120_v36 = vmul.f32 %v1609_v12, %v2534_v38 }
 0x43d   :  { %v2651_v28 = vmul.f32 %v1169_v29, %v2524_v39 }
 0x43e   :  { %v2654_v21 = vmul.f32 %v1160_v4, %v2527_v53  ;;  %v1152_v14 = vsub.f32 1.0, %v1120_v36  ;;  %v2657_v41 = vadd.f32 %v1120_v36, %v2529_v48 }
 0x43f   :  { %1216 = vadd.xlane.f32.xlu0 %v2651_v28 }
 0x440   :  { %1198 = vadd.xlane.f32.xlu1 %v2654_v21  ;;  %v1168_v10 = vmax.f32 %v1152_v14, 1.1754944e-38 }
 0x442   :  { %v2662_v25 = vmul.f32 %v1168_v10, %v2534_v38 }
 0x444   :  { %1214 = vadd.xlane.f32.xlu1 %v2662_v25 }
 0x445   :  { %1653 = shalt.err (!%p1650_p4)
}
 0x446   :  { %s1654_s16 = scalar_lea.hbm %s2732_s5, 2048 }
 0x447   :  { %p1655_p5 = scmp.ne.s32.totalorder %s2732_s5, %s1654_s16  ;;  %p1658_p6 = scmp.lt.u32.totalorder %s1654_s16, %s2732_s5 }
 0x449   :  { %p1660_p7 = pnand %p1658_p6, %p1655_p5 }
 0x44b   :  { %1663 = shalt.err (!%p1660_p7)
}
 0x44c   :  { %s1692_s21 = smov 128   ;;  %s1693_s22 = smov 8  }
 0x44d   :  { %1321 = dma.vmem_to_hbm [thread:$0]  %s1316_s3, 2048, %s2732_s5, [#allocation5], %s1692_s21, %s1692_s21, %s1693_s22  }
 0x44e   :  { %s1694_s5 = smov [#allocation2]  }
 0x44f   :  { %s1303_s25 = sshll.u32 %s1694_s5, 4  ;;  %s1304_s25 = int_to_ptr.vmem [resolvable:$true] %s1303_s25 }
 0x450   :  { %s1664_s26 = scalar_lea.vmem %s1304_s25, 2048  ;;  %p1669_p9 = scmp.lt.s32.totalorder %s1304_s25, %s1304_s25 }
 0x451   :  { %p1665_p8 = scmp.ne.s32.totalorder %s1304_s25, %s1664_s26  ;;  %p1670_p10 = scmp.lt.s32.totalorder %s1664_s26, %s1664_s26 }
 0x453   :  { %p1671_p11 = por %p1670_p10, %p1669_p9 }
 0x455   :  { %p1672_p12 = pnand %p1671_p11, %p1665_p8 }
 0x4ab   :  { %v1189_v39 = vpop.xlane.xlu0 %1188 }
 0x4ac   :  { %v1219_v53 = vmax.f32 %v1189_v39, 1.1754944e-38 }
 0x4ae   :  { %1610 = vrcp.f32 %v1219_v53 }
 0x4af   :  { %v1205_v48 = vpop.xlane.xlu0 %1204 }
 0x4b0   :  { %v1227_v38 = vmax.f32 %v1205_v48, 1.1754944e-38  ;;  %v1187_v30 = vpop.xlane.xlu1 %1186 }
 0x4b1   :  { %v1218_v35 = vmax.f32 %v1187_v30, 1.1754944e-38 }
 0x4b2   :  { %1612 = vrcp.f32 %v1227_v38 }
 0x4b3   :  { %1614 = vrcp.f32 %v1218_v35 }
 0x4b4   :  { %v1193_v60 = vpop.xlane.xlu0 %1192 }
 0x4b5   :  { %v1221_v51 = vmax.f32 %v1193_v60, 1.1754944e-38  ;;  %v1203_v61 = vpop.xlane.xlu1 %1202 }
 0x4b6   :  { %v1226_v58 = vmax.f32 %v1203_v61, 1.1754944e-38 }
 0x4b7   :  { %1616 = vrcp.f32 %v1221_v51 }
 0x4b8   :  { %v1611_v20 = vpop.eup %1610  ;;  %1618 = vrcp.f32 %v1226_v58  ;;  %v1209_v56 = vpop.xlane.xlu0 %1208 }
 0x4b9   :  { %v1251_v40 = vmul.f32 %v1611_v20, %v2544_v46  ;;  %v1229_v11 = vmax.f32 %v1209_v56, 1.1754944e-38 }
 0x4bb   :  { %v1267_v1 = vadd.f32 %v1251_v40, %v2539_v33  ;;  %1620 = vrcp.f32 %v1229_v11 }
 0x4bc   :  { %v1613_v49 = vpop.eup %1612  ;;  %v1191_v9 = vpop.xlane.xlu1 %1190 }
 0x4bd   :  { %v1615_v2 = vpop.eup %1614  ;;  %1283 = vst [vmem:[#allocation2 + $0x8] sm:$0xff] %v1267_v1  ;;  %v1259_v62 = vmul.f32 %v1613_v49, %v2555_v45  ;;  %v1220_v31 = vmax.f32 %v1191_v9, 1.1754944e-38 }
 0x4be   :  { %v1250_v32 = vmul.f32 %v1615_v2, %v2559_v23 }
 0x4bf   :  { %v1275_v26 = vadd.f32 %v1259_v62, %v2547_v52  ;;  %1622 = vrcp.f32 %v1220_v31 }
 0x4c0   :  { %v1266_v54 = vadd.f32 %v1250_v32, %v2550_v17  ;;  %v1197_v47 = vpop.xlane.xlu0 %1196 }
 0x4c1   :  { %v1617_v46 = vpop.eup %1616  ;;  %1291 = vst [vmem:[#allocation2 + $0x48] sm:$0xff] %v1275_v26  ;;  %v1223_v0 = vmax.f32 %v1197_v47, 1.1754944e-38  ;;  %v1207_v33 = vpop.xlane.xlu1 %1206 }
 0x4c2   :  { %v1619_v63 = vpop.eup %1618  ;;  %1282 = vst [vmem:[#allocation2] sm:$0xff] %v1266_v54  ;;  %v1253_v12 = vmul.f32 %v1617_v46, %v2571_v13  ;;  %v1228_v29 = vmax.f32 %v1207_v33, 1.1754944e-38 }
 0x4c3   :  { %v1258_v45 = vmul.f32 %v1619_v63, %v2577_v50  ;;  %1624 = vrcp.f32 %v1223_v0 }
 0x4c4   :  { %v1269_v23 = vadd.f32 %v1253_v12, %v2562_v43  ;;  %1626 = vrcp.f32 %v1228_v29  ;;  %v1213_v52 = vpop.xlane.xlu0 %1212 }
 0x4c5   :  { %v1621_v4 = vpop.eup %1620  ;;  %v1274_v17 = vadd.f32 %v1258_v45, %v2566_v27  ;;  %v1231_v36 = vmax.f32 %v1213_v52, 1.1754944e-38  ;;  %v1195_v14 = vpop.xlane.xlu1 %1194 }
 0x4c6   :  { %1285 = vst [vmem:[#allocation2 + $0x18] sm:$0xff] %v1269_v23  ;;  %v1261_v10 = vmul.f32 %v1621_v4, %v2583_v44  ;;  %v1222_v39 = vmax.f32 %v1195_v14, 1.1754944e-38 }
 0x4c7   :  { %1290 = vst [vmem:[#allocation2 + $0x40] sm:$0xff] %v1274_v17  ;;  %1628 = vrcp.f32 %v1231_v36 }
 0x4c8   :  { %v1277_v13 = vadd.f32 %v1261_v10, %v2574_v22  ;;  %1630 = vrcp.f32 %v1222_v39  ;;  %v1201_v50 = vpop.xlane.xlu0 %1200 }
 0x4c9   :  { %v1623_v53 = vpop.eup %1622  ;;  %v1225_v48 = vmax.f32 %v1201_v50, 1.1754944e-38  ;;  %v1211_v43 = vpop.xlane.xlu1 %1210 }
 0x4ca   :  { %1293 = vst [vmem:[#allocation2 + $0x58] sm:$0xff] %v1277_v13  ;;  %v1252_v38 = vmul.f32 %v1623_v53, %v2592_v15  ;;  %v1230_v30 = vmax.f32 %v1211_v43, 1.1754944e-38 }
 0x4cb   :  { %1632 = vrcp.f32 %v1225_v48 }
 0x4cc   :  { %v1268_v27 = vadd.f32 %v1252_v38, %v2586_v5  ;;  %1634 = vrcp.f32 %v1230_v30  ;;  %v1217_v35 = vpop.xlane.xlu0 %1216 }
 0x4cd   :  { %v1625_v44 = vpop.eup %1624  ;;  %v1233_v60 = vmax.f32 %v1217_v35, 1.1754944e-38  ;;  %v1199_v51 = vpop.xlane.xlu1 %1198 }
 0x4ce   :  { %v1627_v61 = vpop.eup %1626  ;;  %1284 = vst [vmem:[#allocation2 + $0x10] sm:$0xff] %v1268_v27  ;;  %v1255_v22 = vmul.f32 %v1625_v44, %v2604_v18  ;;  %v1224_v58 = vmax.f32 %v1199_v51, 1.1754944e-38 }
 0x4cf   :  { %v1260_v20 = vmul.f32 %v1627_v61, %v2610_v7  ;;  %1636 = vrcp.f32 %v1233_v60 }
 0x4d0   :  { %v1271_v56 = vadd.f32 %v1255_v22, %v2595_v42  ;;  %1638 = vrcp.f32 %v1224_v58 }
 0x4d1   :  { %v1629_v15 = vpop.eup %1628  ;;  %v1276_v40 = vadd.f32 %v1260_v20, %v2598_v6  ;;  %v1215_v5 = vpop.xlane.xlu1 %1214 }
 0x4d2   :  { %v1631_v11 = vpop.eup %1630  ;;  %1287 = vst [vmem:[#allocation2 + $0x28] sm:$0xff] %v1271_v56  ;;  %v1263_v1 = vmul.f32 %v1629_v15, %v2620_v16  ;;  %v1232_v49 = vmax.f32 %v1215_v5, 1.1754944e-38 }
 0x4d3   :  { %1292 = vst [vmem:[#allocation2 + $0x50] sm:$0xff] %v1276_v40  ;;  %v1254_v9 = vmul.f32 %v1631_v11, %v2626_v34 }
 0x4d4   :  { %v1279_v18 = vadd.f32 %v1263_v1, %v2607_v55  ;;  %1640 = vrcp.f32 %v1232_v49 }
 0x4d5   :  { %v1633_v7 = vpop.eup %1632  ;;  %v1270_v2 = vadd.f32 %v1254_v9, %v2613_v59 }
 0x4d6   :  { %v1635_v42 = vpop.eup %1634  ;;  %1295 = vst [vmem:[#allocation2 + $0x68] sm:$0xff] %v1279_v18  ;;  %v1257_v62 = vmul.f32 %v1633_v7, %v2636_v3 }
 0x4d7   :  { %1286 = vst [vmem:[#allocation2 + $0x20] sm:$0xff] %v1270_v2  ;;  %v1262_v6 = vmul.f32 %v1635_v42, %v2642_v8 }
 0x4d8   :  { %v1273_v31 = vadd.f32 %v1257_v62, %v2623_v37 }
 0x4d9   :  { %v1637_v16 = vpop.eup %1636  ;;  %v1278_v32 = vadd.f32 %v1262_v6, %v2629_v19 }
 0x4da   :  { %v1639_v26 = vpop.eup %1638  ;;  %1289 = vst [vmem:[#allocation2 + $0x38] sm:$0xff] %v1273_v31  ;;  %v1265_v55 = vmul.f32 %v1637_v16, %v2651_v28 }
 0x4db   :  { %1294 = vst [vmem:[#allocation2 + $0x60] sm:$0xff] %v1278_v32  ;;  %v1256_v34 = vmul.f32 %v1639_v26, %v2654_v21 }
 0x4dc   :  { %v1281_v59 = vadd.f32 %v1265_v55, %v2639_v24 }
 0x4dd   :  { %v1272_v54 = vadd.f32 %v1256_v34, %v2645_v57 }
 0x4de   :  { %v1641_v3 = vpop.eup %1640  ;;  %1297 = vst [vmem:[#allocation2 + $0x78] sm:$0xff] %v1281_v59 }
 0x4df   :  { %1288 = vst [vmem:[#allocation2 + $0x30] sm:$0xff] %v1272_v54  ;;  %v1264_v37 = vmul.f32 %v1641_v3, %v2662_v25 }
 0x4e1   :  { %v1280_v19 = vadd.f32 %v1264_v37, %v2657_v41 }
 0x4e3   :  { %1296 = vst [vmem:[#allocation2 + $0x70] sm:$0xff] %v1280_v19 }
 0x4e4   :  { %1675 = shalt.err (!%p1672_p12)
}
 0x4e5   :  { %s1676_s28 = scalar_lea.hbm %s2731_s4, 2048 }
 0x4e6   :  { %p1677_p13 = scmp.ne.s32.totalorder %s2731_s4, %s1676_s28  ;;  %p1680_p0 = scmp.lt.u32.totalorder %s1676_s28, %s2731_s4 }
 0x4e8   :  { %p1682_p1 = pnand %p1680_p0, %p1677_p13 }
 0x4ea   :  { %1685 = shalt.err (!%p1682_p1)
}
 0x4eb   :  { %1309 = dma.vmem_to_hbm [thread:$0]  %s1304_s25, 2048, %s2731_s4, [#allocation3], %s1692_s21, %s1692_s21, %s1693_s22  }
 0x4ec   :  { %1686 = dma.done.wait [#allocation3], 2048  }
 0x4ed   :  { %1687 = vsyncadd [#allocation3], 4294965248 }
 0x4ee   :  { %1688 = dma.done.wait [#allocation5], 2048  }
 0x4ef   :  { %1689 = vsyncadd [#allocation5], 4294965248 }
 0x4f0   :  { %1328 = vsyncpa [#allocation3], 1 }
 0x4f1   :  { %1329 = vsyncpa [#allocation5], 1 }

// kernel: tpu_custom_call.1
= control target key start
LH: loop header
LB: loop body
LE: loop exit
PB: predicated region body
PF: predicated region fallthrough
CT: control target
= control target key end

     0   :  { %11 = vsyncpa [#allocation3], 0  ;;  %vm41_vm0 = vcmask 261120   ;;  %v1690_v7 = vmov 0   ;;  %s2727_s0 = inlined_call_operand.vmem [shape: f32[128,32], index: 0, kind: input, shape index: {}]   ;;  %s2728_s1 = inlined_call_operand.vmem [shape: f32[128,1], index: 1, kind: input, shape index: {}]   ;;  %s2729_s2 = inlined_call_operand.vmem [shape: f32[32,128], index: 2, kind: input, shape index: {}]   ;;  %s2730_s3 = inlined_call_operand.vmem [shape: f32[1,128], index: 3, kind: input, shape index: {}]   ;;  %s2731_s4 = inlined_call_operand.hbm [shape: f32[128,128], index: 4, kind: output, shape index: {0}]   ;;  %s2732_s5 = inlined_call_operand.hbm [shape: f32[128,128], index: 5, kind: output, shape index: {1}]  }
   0x1   :  { %v37_v0 = vld [vmem:[%s2729_s2] sm:$0xff]  ;;  %v38_v1 = vld [vmem:[%s2729_s2 + $0x8] sm:$0xff]  ;;  %v39_v2 = vld [vmem:[%s2729_s2 + $0x10] sm:$0xff]  ;;  %1417 = vset.pattern.permute.xlu1 %v1690_v7  ;;  %1416 = vset.pattern.permute.xlu0 %v1690_v7 }
   0x2   :  { %v1399_v3 = vpack.c.bf16 %v38_v1, %v37_v0  ;;  %v40_v4 = vld [vmem:[%s2729_s2 + $0x18] sm:$0xff]  ;;  %v21_v5 = vld [vmem:[%s2727_s0] sm:$0xff]  ;;  %v237_v9 = vld [vmem:[%s2728_s1 + $0x10] sm:$0xff] }
   0x3   :  { %v29_v6 = vld [vmem:[%s2727_s0 + $0x40] sm:$0xff]  ;;  %v1403_v8 = vpack.c.bf16 %v40_v4, %v39_v2  ;;  %1375 = vmatprep.mubr.msk.f32.mxu0 %vm41_vm0, %v21_v5  ;;  %264 = vperm.xlu1 %1417, %v237_v9   ;;  %v22_v10 = vld [vmem:[%s2727_s0 + $0x8] sm:$0xff]  ;;  %v23_v13 = vld [vmem:[%s2727_s0 + $0x10] sm:$0xff] }
   0x4   :  { %1387 = vmatprep.mubr.msk.f32.mxu1 %vm41_vm0, %v29_v6  ;;  %1400 = vmatprep.subr.bf16.mxu0 %v1399_v3  ;;  %v30_v11 = vld [vmem:[%s2727_s0 + $0x48] sm:$0xff]  ;;  %v235_v12 = vld [vmem:[%s2728_s1] sm:$0xff]  ;;  %v31_v14 = vld [vmem:[%s2727_s0 + $0x50] sm:$0xff] }
   0x5   :  { %1407 = vmatprep.subr.bf16.mxu1 %v1399_v3  ;;  %1402 = vmatpush3.bf16.msra.mxu0 %v1399_v3  ;;  %v238_v15 = vld [vmem:[%s2728_s1 + $0x18] sm:$0xff]  ;;  %v236_v16 = vld [vmem:[%s2728_s1 + $0x8] sm:$0xff] }
   0x6   :  { %1409 = vmatpush3.bf16.msra.mxu1 %v1399_v3  ;;  %1404 = vmatprep.subr.bf16.mxu0 %v1403_v8  ;;  %v24_v17 = vld [vmem:[%s2727_s0 + $0x18] sm:$0xff] }
   0x7   :  { %1408 = vmatprep.subr.bf16.mxu1 %v1403_v8  ;;  %254 = vperm.xlu0 %1416, %v235_v12   ;;  %v32_v18 = vld [vmem:[%s2727_s0 + $0x58] sm:$0xff] }
   0x9   :  { %1406 = vmatpush3.bf16.msra.mxu0 %v1403_v8 }
   0xa   :  { %1410 = vmatpush3.bf16.msra.mxu1 %v1403_v8 }
   0xc   :  { %1376 = vmatmul.mubr.msk.f32.vlgmr.msra.gmra.mrb[0].mxu0 %vm41_vm0, %v22_v10 }
   0xd   :  { %1388 = vmatmul.mubr.msk.f32.vlgmr.msra.gmra.mrb[0].mxu1 %vm41_vm0, %v30_v11  ;;  %1378 = vmatprep.mubr.msk.f32.mxu0 %vm41_vm0, %v23_v13 }
   0xe   :  { %1390 = vmatprep.mubr.msk.f32.mxu1 %vm41_vm0, %v31_v14 }
   0xf   :  { %12 = vsyncpa [#allocation5], 0  ;;  %v25_v19 = vld [vmem:[%s2727_s0 + $0x20] sm:$0xff]  ;;  %269 = vperm.xlu1 %1417, %v238_v15   ;;  %259 = vperm.xlu0 %1416, %v236_v16   ;;  %v240_v21 = vld [vmem:[%s2728_s1 + $0x28] sm:$0xff] }
  0x10   :  { %v33_v20 = vld [vmem:[%s2727_s0 + $0x60] sm:$0xff]  ;;  %1379 = vmatmul.mubr.msk.f32.gmra.mrb[2].mxu0 %vm41_vm0, %v24_v17  ;;  %v26_v23 = vld [vmem:[%s2727_s0 + $0x28] sm:$0xff]  ;;  %v27_v25 = vld [vmem:[%s2727_s0 + $0x30] sm:$0xff] }
  0x11   :  { %v239_v22 = vld [vmem:[%s2728_s1 + $0x20] sm:$0xff]  ;;  %1391 = vmatmul.mubr.msk.f32.gmra.mrb[2].mxu1 %vm41_vm0, %v32_v18  ;;  %1381 = vmatprep.mubr.msk.f32.mxu0 %vm41_vm0, %v25_v19  ;;  %v34_v24 = vld [vmem:[%s2727_s0 + $0x68] sm:$0xff]  ;;  %v35_v26 = vld [vmem:[%s2727_s0 + $0x70] sm:$0xff] }
  0x12   :  { %1393 = vmatprep.mubr.msk.f32.mxu1 %vm41_vm0, %v33_v20  ;;  %v242_v27 = vld [vmem:[%s2728_s1 + $0x38] sm:$0xff]  ;;  %v241_v28 = vld [vmem:[%s2728_s1 + $0x30] sm:$0xff]  ;;  %v244_v31 = vld [vmem:[%s2728_s1 + $0x48] sm:$0xff] }
  0x13   :  { %279 = vperm.xlu1 %1417, %v240_v21   ;;  %274 = vperm.xlu0 %1416, %v239_v22   ;;  %v28_v29 = vld [vmem:[%s2727_s0 + $0x38] sm:$0xff]  ;;  %v243_v32 = vld [vmem:[%s2728_s1 + $0x40] sm:$0xff]  ;;  %v245_v34 = vld [vmem:[%s2728_s1 + $0x50] sm:$0xff] }
  0x14   :  { %1382 = vmatmul.mubr.msk.f32.gmra.mrb[4].mxu0 %vm41_vm0, %v26_v23  ;;  %v36_v30 = vld [vmem:[%s2727_s0 + $0x78] sm:$0xff]  ;;  %v248_v35 = vld [vmem:[%s2728_s1 + $0x68] sm:$0xff]  ;;  %v247_v36 = vld [vmem:[%s2728_s1 + $0x60] sm:$0xff] }
  0x15   :  { %1394 = vmatmul.mubr.msk.f32.gmra.mrb[4].mxu1 %vm41_vm0, %v34_v24  ;;  %1384 = vmatprep.mubr.msk.f32.mxu0 %vm41_vm0, %v27_v25  ;;  %v246_v33 = vld [vmem:[%s2728_s1 + $0x58] sm:$0xff]  ;;  %v249_v38 = vld [vmem:[%s2728_s1 + $0x70] sm:$0xff]  ;;  %v1346_v51 = vld [vmem:[%s2730_s3] ss:$0 sm:$0xff] }
  0x16   :  { %1396 = vmatprep.mubr.msk.f32.mxu1 %vm41_vm0, %v35_v26  ;;  %v250_v37 = vld [vmem:[%s2728_s1 + $0x78] sm:$0xff]  ;;  %s1691_s1 = smov [#allocation4]  }
  0x17   :  { %289 = vperm.xlu1 %1417, %v242_v27   ;;  %284 = vperm.xlu0 %1416, %v241_v28   ;;  %s1315_s3 = sshll.u32 %s1691_s1, 4  ;;  %s1316_s3 = int_to_ptr.vmem [resolvable:$true] %s1315_s3 }
  0x18   :  { %1385 = vmatmul.mubr.msk.f32.gmra.mrb[6].mxu0 %vm41_vm0, %v28_v29  ;;  %s1642_s13 = scalar_lea.vmem %s1316_s3, 2048  ;;  %p1647_p1 = scmp.lt.s32.totalorder %s1316_s3, %s1316_s3 }
  0x19   :  { %1397 = vmatmul.mubr.msk.f32.gmra.mrb[6].mxu1 %vm41_vm0, %v36_v30  ;;  %p1643_p0 = scmp.ne.s32.totalorder %s1316_s3, %s1642_s13  ;;  %p1648_p2 = scmp.lt.s32.totalorder %s1642_s13, %s1642_s13 }
  0x1b   :  { %299 = vperm.xlu1 %1417, %v244_v31   ;;  %294 = vperm.xlu0 %1416, %v243_v32   ;;  %p1649_p3 = por %p1648_p2, %p1647_p1 }
  0x1d   :  { %p1650_p4 = pnand %p1649_p3, %p1643_p0 }
  0x1f   :  { %309 = vperm.xlu1 %1417, %v246_v33   ;;  %304 = vperm.xlu0 %1416, %v245_v34  }
  0x23   :  { %319 = vperm.xlu1 %1417, %v248_v35   ;;  %314 = vperm.xlu0 %1416, %v247_v36  }
  0x27   :  { %329 = vperm.xlu1 %1417, %v250_v37   ;;  %324 = vperm.xlu0 %1416, %v249_v38  }
  0x82   :  { %v265_v39 = vpop.permute.xlu1 %264 }
  0x83   :  { %v340_v56 = vadd.f32 %v1346_v51, %v265_v39 }
  0x86   :  { %v255_v40 = vpop.permute.xlu0 %254 }
  0x87   :  { %v338_v57 = vadd.f32 %v1346_v51, %v255_v40 }
  0x8e   :  { %v270_v41 = vpop.permute.xlu1 %269  ;;  %v260_v42 = vpop.permute.xlu0 %259 }
  0x8f   :  { %v339_v55 = vadd.f32 %v1346_v51, %v260_v42  ;;  %v341_v61 = vadd.f32 %v1346_v51, %v270_v41 }
  0x92   :  { %v280_v43 = vpop.permute.xlu1 %279  ;;  %v275_v44 = vpop.permute.xlu0 %274 }
  0x93   :  { %v343_v62 = vadd.f32 %v1346_v51, %v280_v43  ;;  %v342_v4 = vadd.f32 %v1346_v51, %v275_v44 }
  0x96   :  { %v290_v45 = vpop.permute.xlu1 %289  ;;  %v285_v46 = vpop.permute.xlu0 %284 }
  0x97   :  { %v345_v3 = vadd.f32 %v1346_v51, %v290_v45  ;;  %v344_v8 = vadd.f32 %v1346_v51, %v285_v46 }
  0x9a   :  { %v300_v47 = vpop.permute.xlu1 %299  ;;  %v295_v48 = vpop.permute.xlu0 %294 }
  0x9b   :  { %v347_v54 = vadd.f32 %v1346_v51, %v300_v47  ;;  %v346_v58 = vadd.f32 %v1346_v51, %v295_v48 }
  0x9e   :  { %v310_v49 = vpop.permute.xlu1 %309  ;;  %v305_v50 = vpop.permute.xlu0 %304 }
  0x9f   :  { %v349_v7 = vadd.f32 %v1346_v51, %v310_v49  ;;  %v348_v14 = vadd.f32 %v1346_v51, %v305_v50 }
  0xa2   :  { %v320_v52 = vpop.permute.xlu1 %319  ;;  %v315_v53 = vpop.permute.xlu0 %314 }
  0xa3   :  { %v351_v13 = vadd.f32 %v1346_v51, %v320_v52  ;;  %v350_v19 = vadd.f32 %v1346_v51, %v315_v53 }
  0xa6   :  { %v330_v9 = vpop.permute.xlu1 %329  ;;  %v325_v10 = vpop.permute.xlu0 %324 }
  0xa7   :  { %v353_v24 = vadd.f32 %v1346_v51, %v330_v9  ;;  %v352_v27 = vadd.f32 %v1346_v51, %v325_v10 }
  0xdf   :  { %v1377_v59 = vpop.f32.mrb[0].mxu0 }
  0xe0   :  { %v1389_v60 = vpop.f32.mrb[0].mxu1  ;;  %v355_v63 = vadd.f32 %v1377_v59, %v339_v55  ;;  %v156_v1 = vpop.f32.mrb[1].mxu0 }
  0xe1   :  { %v363_v0 = vadd.f32 %v1389_v60, %v347_v54  ;;  %v196_v2 = vpop.f32.mrb[1].mxu1  ;;  %v354_v5 = vadd.f32 %v338_v57, %v156_v1 }
  0xe2   :  { %v362_v6 = vadd.f32 %v346_v58, %v196_v2  ;;  %v1852_v11 = vmax.f32 %v355_v63, 0.0 }
  0xe3   :  { %v1854_v12 = vmax.f32 %v363_v0, 0.0  ;;  %v1856_v15 = vmax.f32 %v354_v5, 0.0  ;;  %v1380_v17 = vpop.f32.mrb[2].mxu0 }
  0xe4   :  { %v1858_v16 = vmax.f32 %v362_v6, 0.0  ;;  %v1392_v18 = vpop.f32.mrb[2].mxu1  ;;  %1418 = vrsqrt.f32 %v1852_v11  ;;  %v357_v20 = vadd.f32 %v1380_v17, %v341_v61  ;;  %v166_v22 = vpop.f32.mrb[3].mxu0  ;;  %vm395_vm1 = vcmp.eq.f32.partialorder %v1852_v11, inf }
  0xe5   :  { %v365_v21 = vadd.f32 %v1392_v18, %v349_v7  ;;  %v206_v23 = vpop.f32.mrb[3].mxu1  ;;  %1420 = vrsqrt.f32 %v1854_v12  ;;  %v356_v25 = vadd.f32 %v340_v56, %v166_v22  ;;  %v454_v34 = vand.u32 2147483648, %v1854_v12 }
  0xe6   :  { %v364_v26 = vadd.f32 %v348_v14, %v206_v23  ;;  %1422 = vrsqrt.f32 %v1856_v15  ;;  %v1863_v28 = vmax.f32 %v357_v20, 0.0  ;;  %vm451_vm2 = vcmp.eq.f32.partialorder %v1854_v12, inf }
  0xe7   :  { %v1865_v29 = vmax.f32 %v365_v21, 0.0  ;;  %1424 = vrsqrt.f32 %v1858_v16  ;;  %v1868_v30 = vmax.f32 %v356_v25, 0.0  ;;  %v1383_v32 = vpop.f32.mrb[4].mxu0  ;;  %vm397_vm3 = vcmp.eq.f32.partialorder %v1852_v11, 0.0 }
  0xe8   :  { %v1870_v31 = vmax.f32 %v364_v26, 0.0  ;;  %v1395_v33 = vpop.f32.mrb[4].mxu1  ;;  %1426 = vrsqrt.f32 %v1863_v28  ;;  %v359_v35 = vadd.f32 %v1383_v32, %v343_v62  ;;  %v176_v37 = vpop.f32.mrb[5].mxu0  ;;  %vm453_vm4 = vcmp.eq.f32.partialorder %v1854_v12, 0.0 }
  0xe9   :  { %v367_v36 = vadd.f32 %v1395_v33, %v351_v13  ;;  %v216_v38 = vpop.f32.mrb[5].mxu1  ;;  %1428 = vrsqrt.f32 %v1865_v29  ;;  %v358_v39 = vadd.f32 %v342_v4, %v176_v37  ;;  %v398_v43 = vand.u32 2147483648, %v1852_v11 }
  0xea   :  { %v366_v40 = vadd.f32 %v350_v19, %v216_v38  ;;  %1430 = vrsqrt.f32 %v1868_v30  ;;  %v1879_v41 = vmax.f32 %v359_v35, 0.0  ;;  %vm444_vm5 = vcmp.eq.f32.partialorder %v1858_v16, inf }
  0xeb   :  { %v1881_v42 = vmax.f32 %v367_v36, 0.0  ;;  %1432 = vrsqrt.f32 %v1870_v31  ;;  %v1886_v44 = vmax.f32 %v358_v39, 0.0  ;;  %v1386_v46 = vpop.f32.mrb[6].mxu0  ;;  %vm446_vm6 = vcmp.eq.f32.partialorder %v1858_v16, 0.0 }
  0xec   :  { %v1888_v45 = vmax.f32 %v366_v40, 0.0  ;;  %v1398_v47 = vpop.f32.mrb[6].mxu1  ;;  %1434 = vrsqrt.f32 %v1879_v41  ;;  %v361_v48 = vadd.f32 %v1386_v46, %v345_v3  ;;  %v186_v50 = vpop.f32.mrb[7].mxu0  ;;  %v447_v54 = vand.u32 2147483648, %v1858_v16 }
  0xed   :  { %v369_v49 = vadd.f32 %v1398_v47, %v353_v24  ;;  %v226_v51 = vpop.f32.mrb[7].mxu1  ;;  %1436 = vrsqrt.f32 %v1881_v42  ;;  %v360_v52 = vadd.f32 %v344_v8, %v186_v50  ;;  %vm388_vm7 = vcmp.eq.f32.partialorder %v1856_v15, inf }
  0xee   :  { %v368_v53 = vadd.f32 %v352_v27, %v226_v51  ;;  %v1419_v55 = vpop.eup %1418  ;;  %1438 = vrsqrt.f32 %v1886_v44  ;;  %v1896_v56 = vmax.f32 %v361_v48, 0.0  ;;  %vm390_vm8 = vcmp.eq.f32.partialorder %v1856_v15, 0.0 }
  0xef   :  { %v1898_v57 = vmax.f32 %v369_v49, 0.0  ;;  %v1421_v58 = vpop.eup %1420  ;;  %1440 = vrsqrt.f32 %v1888_v45  ;;  %v1902_v59 = vmax.f32 %v360_v52, 0.0  ;;  %v394_v60 = vmul.f32 %v1419_v55, %v1852_v11 }
  0xf0   :  { %v1423_v61 = vpop.eup %1422  ;;  %1442 = vrsqrt.f32 %v1896_v56  ;;  %v1907_v62 = vmax.f32 %v368_v53, 0.0  ;;  %v450_v63 = vmul.f32 %v1421_v58, %v1854_v12  ;;  %v391_v0 = vand.u32 2147483648, %v1856_v15 }
  0xf1   :  { %v1425_v1 = vpop.eup %1424  ;;  %1444 = vrsqrt.f32 %v1898_v57  ;;  %v396_v2 = vsel %vm395_vm1, %v1852_v11, %v394_v60  ;;  %v387_v3 = vmul.f32 %v1423_v61, %v1856_v15  ;;  %vm458_vm9 = vcmp.eq.f32.partialorder %v1870_v31, inf }
  0xf2   :  { %v1427_v4 = vpop.eup %1426  ;;  %v452_v5 = vsel %vm451_vm2, %v1854_v12, %v450_v63  ;;  %v399_v6 = vsel %vm397_vm3, %v398_v43, %v396_v2  ;;  %v443_v7 = vmul.f32 %v1425_v1, %v1858_v16  ;;  %vm460_vm10 = vcmp.eq.f32.partialorder %v1870_v31, 0.0 }
  0xf3   :  { %v1429_v8 = vpop.eup %1428  ;;  %1446 = vrsqrt.f32 %v1902_v59  ;;  %v455_v9 = vsel %vm453_vm4, %v454_v34, %v452_v5  ;;  %v1927_v10 = vsub.f32 0.0, %v399_v6  ;;  %v389_v13 = vsel %vm388_vm7, %v1856_v15, %v387_v3 }
  0xf4   :  { %v1431_v14 = vpop.eup %1430  ;;  %1448 = vrsqrt.f32 %v1907_v62  ;;  %v1933_v11 = vsub.f32 0.0, %v455_v9  ;;  %v445_v17 = vsel %vm444_vm5, %v1858_v16, %v443_v7  ;;  %v392_v18 = vsel %vm390_vm8, %v391_v0, %v389_v13 }
  0xf5   :  { %v1433_v12 = vpop.eup %1432  ;;  %532 = vmax.xlane.f32.xlu1 %v1927_v10  ;;  %515 = vst [vmem:[#allocation4 + $0x8] sm:$0xff] %v1927_v10  ;;  %v448_v19 = vsel %vm446_vm6, %v447_v54, %v445_v17  ;;  %v1944_v20 = vsub.f32 0.0, %v392_v18  ;;  %v461_v21 = vand.u32 2147483648, %v1870_v31  ;;  %v408_v22 = vmul.f32 %v1427_v4, %v1863_v28 }
  0xf6   :  { %v1435_v23 = vpop.eup %1434  ;;  %548 = vmax.xlane.f32.xlu0 %v1933_v11  ;;  %523 = vst [vmem:[#allocation4 + $0x48] sm:$0xff] %v1933_v11  ;;  %v1950_v15 = vsub.f32 0.0, %v448_v19  ;;  %v457_v24 = vmul.f32 %v1433_v12, %v1870_v31  ;;  %vm409_vm11 = vcmp.eq.f32.partialorder %v1863_v28, inf  ;;  %v412_v16 = vand.u32 2147483648, %v1863_v28 }
  0xf7   :  { %v1955_v25 = vpop.eup %1436  ;;  %514 = vst [vmem:[#allocation4] sm:$0xff] %v1944_v20  ;;  %v410_v26 = vsel %vm409_vm11, %v1863_v28, %v408_v22  ;;  %vm411_vm12 = vcmp.eq.f32.partialorder %v1863_v28, 0.0  ;;  %v464_v27 = vmul.f32 %v1429_v8, %v1865_v29  ;;  %vm465_vm13 = vcmp.eq.f32.partialorder %v1865_v29, inf }
  0xf8   :  { %v1439_v32 = vpop.eup %1438  ;;  %522 = vst [vmem:[#allocation4 + $0x40] sm:$0xff] %v1950_v15  ;;  %v459_v33 = vsel %vm458_vm9, %v1870_v31, %v457_v24  ;;  %v413_v34 = vsel %vm411_vm12, %v412_v16, %v410_v26  ;;  %vm467_vm14 = vcmp.eq.f32.partialorder %v1865_v29, 0.0  ;;  %v468_v35 = vand.u32 2147483648, %v1865_v29 }
  0xf9   :  { %v1441_v36 = vpop.eup %1440  ;;  %546 = vmax.xlane.f32.xlu1 %v1950_v15  ;;  %v462_v28 = vsel %vm460_vm10, %v461_v21, %v459_v33  ;;  %v1971_v37 = vsub.f32 0.0, %v413_v34  ;;  %v466_v38 = vsel %vm465_vm13, %v1865_v29, %v464_v27  ;;  %v415_v39 = vmul.f32 %v1439_v32, %v1886_v44 }
  0xfa   :  { %v1975_v40 = vpop.eup %1442  ;;  %530 = vmax.xlane.f32.xlu0 %v1944_v20  ;;  %v1978_v43 = vsub.f32 0.0, %v462_v28  ;;  %v469_v46 = vsel %vm467_vm14, %v468_v35, %v466_v38  ;;  %vm416_vm15 = vcmp.eq.f32.partialorder %v1886_v44, inf  ;;  %v419_v47 = vand.u32 2147483648, %v1886_v44 }
  0xfb   :  { %v1982_v48 = vpop.eup %1444  ;;  %517 = vst [vmem:[#allocation4 + $0x18] sm:$0xff] %v1971_v37  ;;  %v1985_v31 = vsub.f32 0.0, %v469_v46  ;;  %v417_v29 = vsel %vm416_vm15, %v1886_v44, %v415_v39  ;;  %vm418_vm0 = vcmp.eq.f32.partialorder %v1886_v44, 0.0  ;;  %v401_v49 = vmul.f32 %v1431_v14, %v1868_v30 }
  0xfc   :  { %524 = vst [vmem:[#allocation4 + $0x50] sm:$0xff] %v1978_v43  ;;  %v420_v50 = vsel %vm418_vm0, %v419_v47, %v417_v29  ;;  %vm402_vm1 = vcmp.eq.f32.partialorder %v1868_v30, inf  ;;  %v405_v51 = vand.u32 2147483648, %v1868_v30  ;;  %v471_v52 = vmul.f32 %v1441_v36, %v1888_v45 }
  0xfd   :  { %v1447_v53 = vpop.eup %1446  ;;  %550 = vmax.xlane.f32.xlu1 %v1978_v43  ;;  %525 = vst [vmem:[#allocation4 + $0x58] sm:$0xff] %v1985_v31  ;;  %v1996_v54 = vsub.f32 0.0, %v420_v50  ;;  %v403_v44 = vsel %vm402_vm1, %v1868_v30, %v401_v49  ;;  %vm404_vm2 = vcmp.eq.f32.partialorder %v1868_v30, 0.0  ;;  %vm472_vm3 = vcmp.eq.f32.partialorder %v1888_v45, inf }
  0xfe   :  { %v1449_v55 = vpop.eup %1448  ;;  %536 = vmax.xlane.f32.xlu0 %v1971_v37  ;;  %v406_v58 = vsel %vm404_vm2, %v405_v51, %v403_v44  ;;  %v473_v60 = vsel %vm472_vm3, %v1888_v45, %v471_v52  ;;  %v475_v61 = vand.u32 2147483648, %v1888_v45  ;;  %v422_v63 = vmul.f32 %v1435_v23, %v1879_v41 }
  0xff   :  { %518 = vst [vmem:[#allocation4 + $0x20] sm:$0xff] %v1996_v54  ;;  %v2006_v0 = vsub.f32 0.0, %v406_v58  ;;  %vm474_vm4 = vcmp.eq.f32.partialorder %v1888_v45, 0.0  ;;  %vm423_vm5 = vcmp.eq.f32.partialorder %v1879_v41, inf  ;;  %v426_v30 = vand.u32 2147483648, %v1879_v41 }
 0x100   :  { %v476_v1 = vsel %vm474_vm4, %v475_v61, %v473_v60  ;;  %v424_v2 = vsel %vm423_vm5, %v1879_v41, %v422_v63  ;;  %vm425_vm6 = vcmp.eq.f32.partialorder %v1879_v41, 0.0  ;;  %v429_v3 = vmul.f32 %v1447_v53, %v1902_v59 }
 0x101   :  { %538 = vmax.xlane.f32.xlu1 %v1996_v54  ;;  %516 = vst [vmem:[#allocation4 + $0x10] sm:$0xff] %v2006_v0  ;;  %v2016_v4 = vsub.f32 0.0, %v476_v1  ;;  %v427_v5 = vsel %vm425_vm6, %v426_v30, %v424_v2  ;;  %vm430_vm7 = vcmp.eq.f32.partialorder %v1902_v59, inf  ;;  %v433_v45 = vand.u32 2147483648, %v1902_v59 }
 0x102   :  { %552 = vmax.xlane.f32.xlu0 %v1985_v31  ;;  %v2021_v6 = vsub.f32 0.0, %v427_v5  ;;  %v431_v7 = vsel %vm430_vm7, %v1902_v59, %v429_v3  ;;  %vm432_vm8 = vcmp.eq.f32.partialorder %v1902_v59, 0.0  ;;  %v478_v41 = vmul.f32 %v1955_v25, %v1881_v42 }
 0x103   :  { %526 = vst [vmem:[#allocation4 + $0x60] sm:$0xff] %v2016_v4  ;;  %v434_v8 = vsel %vm432_vm8, %v433_v45, %v431_v7  ;;  %vm479_vm9 = vcmp.eq.f32.partialorder %v1881_v42, inf  ;;  %v482_v9 = vand.u32 2147483648, %v1881_v42  ;;  %v485_v13 = vmul.f32 %v1449_v55, %v1907_v62 }
 0x104   :  { %519 = vst [vmem:[#allocation4 + $0x28] sm:$0xff] %v2021_v6  ;;  %v2032_v14 = vsub.f32 0.0, %v434_v8  ;;  %v480_v17 = vsel %vm479_vm9, %v1881_v42, %v478_v41  ;;  %vm481_vm10 = vcmp.eq.f32.partialorder %v1881_v42, 0.0  ;;  %vm486_vm11 = vcmp.eq.f32.partialorder %v1907_v62, inf }
 0x105   :  { %554 = vmax.xlane.f32.xlu1 %v2016_v4  ;;  %v483_v59 = vsel %vm481_vm10, %v482_v9, %v480_v17  ;;  %v487_v18 = vsel %vm486_vm11, %v1907_v62, %v485_v13  ;;  %v489_v12 = vand.u32 2147483648, %v1907_v62  ;;  %v436_v19 = vmul.f32 %v1975_v40, %v1896_v56 }
 0x106   :  { %534 = vmax.xlane.f32.xlu0 %v2006_v0  ;;  %520 = vst [vmem:[#allocation4 + $0x30] sm:$0xff] %v2032_v14  ;;  %v2044_v21 = vsub.f32 0.0, %v483_v59  ;;  %vm488_vm12 = vcmp.eq.f32.partialorder %v1907_v62, 0.0  ;;  %vm437_vm13 = vcmp.eq.f32.partialorder %v1896_v56, inf  ;;  %v440_v42 = vand.u32 2147483648, %v1896_v56 }
 0x107   :  { %v490_v22 = vsel %vm488_vm12, %v489_v12, %v487_v18  ;;  %v438_v23 = vsel %vm437_vm13, %v1896_v56, %v436_v19  ;;  %vm439_vm14 = vcmp.eq.f32.partialorder %v1896_v56, 0.0  ;;  %v492_v24 = vmul.f32 %v1982_v48, %v1898_v57 }
 0x108   :  { %527 = vst [vmem:[#allocation4 + $0x68] sm:$0xff] %v2044_v21  ;;  %v2054_v16 = vsub.f32 0.0, %v490_v22  ;;  %v441_v25 = vsel %vm439_vm14, %v440_v42, %v438_v23  ;;  %vm493_vm15 = vcmp.eq.f32.partialorder %v1898_v57, inf  ;;  %v496_v62 = vand.u32 2147483648, %v1898_v57 }
 0x109   :  { %542 = vmax.xlane.f32.xlu1 %v2032_v14  ;;  %v2059_v26 = vsub.f32 0.0, %v441_v25  ;;  %v494_v27 = vsel %vm493_vm15, %v1898_v57, %v492_v24  ;;  %vm495_vm0 = vcmp.eq.f32.partialorder %v1898_v57, 0.0 }
 0x10a   :  { %540 = vmax.xlane.f32.xlu0 %v2021_v6  ;;  %528 = vst [vmem:[#allocation4 + $0x70] sm:$0xff] %v2054_v16  ;;  %v497_v56 = vsel %vm495_vm0, %v496_v62, %v494_v27 }
 0x10b   :  { %521 = vst [vmem:[#allocation4 + $0x38] sm:$0xff] %v2059_v26  ;;  %v2066_v32 = vsub.f32 0.0, %v497_v56 }
 0x10d   :  { %558 = vmax.xlane.f32.xlu1 %v2054_v16  ;;  %529 = vst [vmem:[#allocation4 + $0x78] sm:$0xff] %v2066_v32 }
 0x10e   :  { %556 = vmax.xlane.f32.xlu0 %v2044_v21 }
 0x112   :  { %544 = vmax.xlane.f32.xlu0 %v2059_v26 }
 0x116   :  { %560 = vmax.xlane.f32.xlu0 %v2066_v32 }
 0x182   :  { %v533_v57 = vpop.xlane.xlu1 %532 }
 0x183   :  { %v549_v33 = vpop.xlane.xlu0 %548  ;;  %v563_v34 = vsub.f32 %v1927_v10, %v533_v57 }
 0x184   :  { %v571_v35 = vsub.f32 %v1933_v11, %v549_v33 }
 0x185   :  { %v580_v36 = vmul.f32 1.442695, %v563_v34 }
 0x186   :  { %v547_v28 = vpop.xlane.xlu1 %546  ;;  %v596_v38 = vmul.f32 1.442695, %v571_v35 }
 0x187   :  { %1450 = vpow2.f32 %v580_v36  ;;  %v570_v39 = vsub.f32 %v1950_v15, %v547_v28  ;;  %v531_v40 = vpop.xlane.xlu0 %530 }
 0x188   :  { %v562_v46 = vsub.f32 %v1944_v20, %v531_v40  ;;  %1452 = vpow2.f32 %v596_v38 }
 0x189   :  { %v594_v29 = vmul.f32 1.442695, %v570_v39 }
 0x18a   :  { %v578_v47 = vmul.f32 1.442695, %v562_v46  ;;  %v551_v48 = vpop.xlane.xlu1 %550 }
 0x18b   :  { %v537_v49 = vpop.xlane.xlu0 %536  ;;  %v572_v20 = vsub.f32 %v1978_v43, %v551_v48 }
 0x18c   :  { %1454 = vpow2.f32 %v578_v47  ;;  %v565_v50 = vsub.f32 %v1971_v37, %v537_v49 }
 0x18d   :  { %1456 = vpow2.f32 %v594_v29 }
 0x18e   :  { %v584_v10 = vmul.f32 1.442695, %v565_v50  ;;  %v539_v51 = vpop.xlane.xlu1 %538 }
 0x18f   :  { %v553_v11 = vpop.xlane.xlu0 %552  ;;  %v566_v63 = vsub.f32 %v1996_v54, %v539_v51 }
 0x190   :  { %1458 = vpow2.f32 %v584_v10  ;;  %v573_v52 = vsub.f32 %v1985_v31, %v553_v11  ;;  %v598_v31 = vmul.f32 1.442695, %v572_v20 }
 0x191   :  { %v2079_v53 = vpop.eup %1450  ;;  %v586_v3 = vmul.f32 1.442695, %v566_v63 }
 0x192   :  { %v600_v15 = vmul.f32 1.442695, %v573_v52  ;;  %612 = vadd.xlane.f32.xlu0 %v2079_v53  ;;  %v2084_v58 = vpop.eup %1452  ;;  %v555_v37 = vpop.xlane.xlu1 %554 }
 0x193   :  { %v535_v44 = vpop.xlane.xlu0 %534  ;;  %v574_v5 = vsub.f32 %v2016_v4, %v555_v37 }
 0x194   :  { %1460 = vpow2.f32 %v600_v15  ;;  %v564_v55 = vsub.f32 %v2006_v0, %v535_v44 }
 0x195   :  { %v602_v8 = vmul.f32 1.442695, %v574_v5 }
 0x196   :  { %v2086_v60 = vpop.eup %1454  ;;  %v582_v61 = vmul.f32 1.442695, %v564_v55  ;;  %628 = vadd.xlane.f32.xlu0 %v2084_v58  ;;  %v543_v45 = vpop.xlane.xlu1 %542 }
 0x197   :  { %v541_v30 = vpop.xlane.xlu0 %540  ;;  %610 = vadd.xlane.f32.xlu1 %v2086_v60  ;;  %v2092_v1 = vpop.eup %1456  ;;  %v568_v9 = vsub.f32 %v2032_v14, %v543_v45 }
 0x198   :  { %1462 = vpow2.f32 %v582_v61  ;;  %v567_v43 = vsub.f32 %v2021_v6, %v541_v30 }
 0x199   :  { %1464 = vpow2.f32 %v598_v31  ;;  %v590_v12 = vmul.f32 1.442695, %v568_v9 }
 0x19a   :  { %v2094_v0 = vpop.eup %1458  ;;  %v588_v2 = vmul.f32 1.442695, %v567_v43  ;;  %v559_v17 = vpop.xlane.xlu1 %558 }
 0x19b   :  { %v557_v7 = vpop.xlane.xlu0 %556  ;;  %616 = vadd.xlane.f32.xlu0 %v2094_v0  ;;  %626 = vadd.xlane.f32.xlu1 %v2092_v1 }
 0x19c   :  { %1466 = vpow2.f32 %v588_v2  ;;  %v575_v54 = vsub.f32 %v2044_v21, %v557_v7  ;;  %v576_v21 = vsub.f32 %v2054_v16, %v559_v17 }
 0x19d   :  { %1468 = vpow2.f32 %v586_v3 }
 0x19e   :  { %v2100_v41 = vpop.eup %1460  ;;  %v604_v6 = vmul.f32 1.442695, %v575_v54  ;;  %v606_v24 = vmul.f32 1.442695, %v576_v21 }
 0x19f   :  { %632 = vadd.xlane.f32.xlu0 %v2100_v41  ;;  %v545_v13 = vpop.xlane.xlu0 %544 }
 0x1a0   :  { %1470 = vpow2.f32 %v604_v6  ;;  %v569_v4 = vsub.f32 %v2059_v26, %v545_v13 }
 0x1a1   :  { %1472 = vpow2.f32 %v602_v8 }
 0x1a2   :  { %v2105_v59 = vpop.eup %1462  ;;  %v592_v18 = vmul.f32 1.442695, %v569_v4 }
 0x1a3   :  { %v561_v19 = vpop.xlane.xlu0 %560  ;;  %614 = vadd.xlane.f32.xlu1 %v2105_v59  ;;  %v2110_v42 = vpop.eup %1464 }
 0x1a4   :  { %1474 = vpow2.f32 %v592_v18  ;;  %v577_v14 = vsub.f32 %v2066_v32, %v561_v19 }
 0x1a5   :  { %1476 = vpow2.f32 %v590_v12 }
 0x1a6   :  { %v2112_v22 = vpop.eup %1466  ;;  %v608_v23 = vmul.f32 1.442695, %v577_v14 }
 0x1a7   :  { %620 = vadd.xlane.f32.xlu0 %v2112_v22  ;;  %630 = vadd.xlane.f32.xlu1 %v2110_v42  ;;  %v2116_v25 = vpop.eup %1468 }
 0x1a8   :  { %1478 = vpow2.f32 %v608_v23 }
 0x1a9   :  { %1480 = vpow2.f32 %v606_v24 }
 0x1aa   :  { %v2118_v62 = vpop.eup %1470 }
 0x1ab   :  { %636 = vadd.xlane.f32.xlu0 %v2118_v62  ;;  %618 = vadd.xlane.f32.xlu1 %v2116_v25  ;;  %v2122_v16 = vpop.eup %1472 }
 0x1ae   :  { %v2124_v26 = vpop.eup %1474 }
 0x1af   :  { %624 = vadd.xlane.f32.xlu0 %v2124_v26  ;;  %634 = vadd.xlane.f32.xlu1 %v2122_v16  ;;  %v2128_v27 = vpop.eup %1476 }
 0x1b2   :  { %v2130_v56 = vpop.eup %1478 }
 0x1b3   :  { %640 = vadd.xlane.f32.xlu0 %v2130_v56  ;;  %622 = vadd.xlane.f32.xlu1 %v2128_v27  ;;  %v2134_v32 = vpop.eup %1480 }
 0x1b7   :  { %638 = vadd.xlane.f32.xlu1 %v2134_v32 }
 0x21f   :  { %v613_v57 = vpop.xlane.xlu0 %612 }
 0x220   :  { %v643_v33 = vmax.f32 %v613_v57, 1.1754944e-38 }
 0x222   :  { %1482 = vrcp.f32 %v643_v33 }
 0x223   :  { %v629_v34 = vpop.xlane.xlu0 %628 }
 0x224   :  { %v651_v35 = vmax.f32 %v629_v34, 1.1754944e-38  ;;  %v611_v36 = vpop.xlane.xlu1 %610 }
 0x225   :  { %v642_v28 = vmax.f32 %v611_v36, 1.1754944e-38 }
 0x226   :  { %1484 = vrcp.f32 %v651_v35 }
 0x227   :  { %1486 = vrcp.f32 %v642_v28 }
 0x228   :  { %v617_v38 = vpop.xlane.xlu0 %616  ;;  %v627_v39 = vpop.xlane.xlu1 %626 }
 0x229   :  { %v645_v40 = vmax.f32 %v617_v38, 1.1754944e-38  ;;  %v650_v46 = vmax.f32 %v627_v39, 1.1754944e-38 }
 0x22b   :  { %1488 = vrcp.f32 %v645_v40 }
 0x22c   :  { %v1483_v47 = vpop.eup %1482  ;;  %1490 = vrcp.f32 %v650_v46  ;;  %v633_v48 = vpop.xlane.xlu0 %632 }
 0x22d   :  { %v653_v29 = vmax.f32 %v633_v48, 1.1754944e-38  ;;  %v2138_v49 = vmul.f32 %v1483_v47, %v2079_v53 }
 0x22f   :  { %1492 = vrcp.f32 %v653_v29  ;;  %v707_v50 = vsub.f32 1.0, %v2138_v49 }
 0x230   :  { %v1485_v10 = vpop.eup %1484  ;;  %v615_v11 = vpop.xlane.xlu1 %614 }
 0x231   :  { %v1487_v51 = vpop.eup %1486  ;;  %v644_v52 = vmax.f32 %v615_v11, 1.1754944e-38  ;;  %v723_v15 = vmax.f32 %v707_v50, 1.1754944e-38  ;;  %v2142_v20 = vmul.f32 %v1485_v10, %v2084_v58 }
 0x232   :  { %v2145_v44 = vmul.f32 %v1487_v51, %v2086_v60 }
 0x233   :  { %1494 = vrcp.f32 %v644_v52  ;;  %v2148_v55 = vmul.f32 %v2079_v53, %v723_v15  ;;  %v715_v37 = vsub.f32 1.0, %v2142_v20 }
 0x234   :  { %v621_v61 = vpop.xlane.xlu0 %620  ;;  %v631_v31 = vpop.xlane.xlu1 %630  ;;  %v706_v63 = vsub.f32 1.0, %v2145_v44 }
 0x235   :  { %v1489_v30 = vpop.eup %1488  ;;  %v647_v43 = vmax.f32 %v621_v61, 1.1754944e-38  ;;  %v652_v2 = vmax.f32 %v631_v31, 1.1754944e-38  ;;  %756 = vadd.xlane.f32.xlu0 %v2148_v55  ;;  %v731_v3 = vmax.f32 %v715_v37, 1.1754944e-38 }
 0x236   :  { %v1491_v5 = vpop.eup %1490  ;;  %v722_v45 = vmax.f32 %v706_v63, 1.1754944e-38  ;;  %v2154_v7 = vmul.f32 %v1489_v30, %v2094_v0 }
 0x237   :  { %1496 = vrcp.f32 %v647_v43  ;;  %v2157_v53 = vmul.f32 %v2084_v58, %v731_v3  ;;  %v2160_v54 = vmul.f32 %v1491_v5, %v2092_v1 }
 0x238   :  { %1498 = vrcp.f32 %v652_v2  ;;  %v637_v6 = vpop.xlane.xlu0 %636  ;;  %v619_v8 = vpop.xlane.xlu1 %618  ;;  %v2163_v9 = vmul.f32 %v2086_v60, %v722_v45  ;;  %v709_v13 = vsub.f32 1.0, %v2154_v7 }
 0x239   :  { %v1493_v4 = vpop.eup %1492  ;;  %v655_v17 = vmax.f32 %v637_v6, 1.1754944e-38  ;;  %v646_v18 = vmax.f32 %v619_v8, 1.1754944e-38  ;;  %772 = vadd.xlane.f32.xlu0 %v2157_v53  ;;  %v714_v12 = vsub.f32 1.0, %v2160_v54 }
 0x23a   :  { %754 = vadd.xlane.f32.xlu1 %v2163_v9  ;;  %v725_v58 = vmax.f32 %v709_v13, 1.1754944e-38  ;;  %v2170_v19 = vmul.f32 %v1493_v4, %v2100_v41 }
 0x23b   :  { %1500 = vrcp.f32 %v655_v17  ;;  %v730_v21 = vmax.f32 %v714_v12, 1.1754944e-38 }
 0x23c   :  { %1502 = vrcp.f32 %v646_v18  ;;  %v625_v60 = vpop.xlane.xlu0 %624  ;;  %v635_v14 = vpop.xlane.xlu1 %634  ;;  %v2173_v23 = vmul.f32 %v2094_v0, %v725_v58  ;;  %v717_v24 = vsub.f32 1.0, %v2170_v19 }
 0x23d   :  { %v1495_v57 = vpop.eup %1494  ;;  %v649_v33 = vmax.f32 %v625_v60, 1.1754944e-38  ;;  %v654_v34 = vmax.f32 %v635_v14, 1.1754944e-38  ;;  %v2177_v35 = vmul.f32 %v2092_v1, %v730_v21 }
 0x23e   :  { %760 = vadd.xlane.f32.xlu0 %v2173_v23  ;;  %v733_v36 = vmax.f32 %v717_v24, 1.1754944e-38  ;;  %v2181_v28 = vmul.f32 %v1495_v57, %v2105_v59 }
 0x23f   :  { %1504 = vrcp.f32 %v649_v33  ;;  %770 = vadd.xlane.f32.xlu1 %v2177_v35 }
 0x240   :  { %1506 = vrcp.f32 %v654_v34  ;;  %v641_v0 = vpop.xlane.xlu0 %640  ;;  %v623_v38 = vpop.xlane.xlu1 %622  ;;  %v2185_v39 = vmul.f32 %v2100_v41, %v733_v36  ;;  %v708_v40 = vsub.f32 1.0, %v2181_v28 }
 0x241   :  { %v1497_v46 = vpop.eup %1496  ;;  %v657_v1 = vmax.f32 %v641_v0, 1.1754944e-38  ;;  %v648_v47 = vmax.f32 %v623_v38, 1.1754944e-38 }
 0x242   :  { %v1499_v48 = vpop.eup %1498  ;;  %776 = vadd.xlane.f32.xlu0 %v2185_v39  ;;  %v724_v29 = vmax.f32 %v708_v40, 1.1754944e-38  ;;  %v2190_v50 = vmul.f32 %v1497_v46, %v2112_v22 }
 0x243   :  { %1508 = vrcp.f32 %v657_v1  ;;  %v2193_v10 = vmul.f32 %v1499_v48, %v2110_v42 }
 0x244   :  { %1510 = vrcp.f32 %v648_v47  ;;  %v639_v11 = vpop.xlane.xlu1 %638  ;;  %v2196_v41 = vmul.f32 %v2105_v59, %v724_v29  ;;  %v711_v51 = vsub.f32 1.0, %v2190_v50 }
 0x245   :  { %v1501_v52 = vpop.eup %1500  ;;  %v656_v15 = vmax.f32 %v639_v11, 1.1754944e-38  ;;  %v716_v37 = vsub.f32 1.0, %v2193_v10 }
 0x246   :  { %v1503_v61 = vpop.eup %1502  ;;  %758 = vadd.xlane.f32.xlu1 %v2196_v41  ;;  %v727_v31 = vmax.f32 %v711_v51, 1.1754944e-38  ;;  %v2202_v63 = vmul.f32 %v1501_v52, %v2118_v62 }
 0x247   :  { %1512 = vrcp.f32 %v656_v15  ;;  %v732_v30 = vmax.f32 %v716_v37, 1.1754944e-38  ;;  %v2205_v43 = vmul.f32 %v1503_v61, %v2116_v25 }
 0x248   :  { %v2208_v59 = vmul.f32 %v2112_v22, %v727_v31  ;;  %v719_v2 = vsub.f32 1.0, %v2202_v63 }
 0x249   :  { %v1505_v3 = vpop.eup %1504  ;;  %v2212_v5 = vmul.f32 %v2110_v42, %v732_v30  ;;  %v710_v45 = vsub.f32 1.0, %v2205_v43 }
 0x24a   :  { %v1507_v6 = vpop.eup %1506  ;;  %764 = vadd.xlane.f32.xlu0 %v2208_v59  ;;  %v735_v8 = vmax.f32 %v719_v2, 1.1754944e-38  ;;  %v2217_v13 = vmul.f32 %v1505_v3, %v2124_v26 }
 0x24b   :  { %774 = vadd.xlane.f32.xlu1 %v2212_v5  ;;  %v726_v4 = vmax.f32 %v710_v45, 1.1754944e-38  ;;  %v2221_v22 = vmul.f32 %v1507_v6, %v2122_v16 }
 0x24c   :  { %v2224_v17 = vmul.f32 %v2118_v62, %v735_v8  ;;  %v713_v42 = vsub.f32 1.0, %v2217_v13 }
 0x24d   :  { %v1509_v18 = vpop.eup %1508  ;;  %v2228_v12 = vmul.f32 %v2116_v25, %v726_v4  ;;  %v718_v58 = vsub.f32 1.0, %v2221_v22 }
 0x24e   :  { %v1511_v21 = vpop.eup %1510  ;;  %780 = vadd.xlane.f32.xlu0 %v2224_v17  ;;  %v729_v60 = vmax.f32 %v713_v42, 1.1754944e-38  ;;  %v2233_v14 = vmul.f32 %v1509_v18, %v2130_v56 }
 0x24f   :  { %762 = vadd.xlane.f32.xlu1 %v2228_v12  ;;  %v734_v24 = vmax.f32 %v718_v58, 1.1754944e-38  ;;  %v2237_v62 = vmul.f32 %v1511_v21, %v2128_v27 }
 0x250   :  { %v2240_v57 = vmul.f32 %v2124_v26, %v729_v60  ;;  %v721_v25 = vsub.f32 1.0, %v2233_v14 }
 0x251   :  { %v1513_v33 = vpop.eup %1512  ;;  %v2244_v34 = vmul.f32 %v2122_v16, %v734_v24  ;;  %v712_v36 = vsub.f32 1.0, %v2237_v62 }
 0x252   :  { %768 = vadd.xlane.f32.xlu0 %v2240_v57  ;;  %v737_v0 = vmax.f32 %v721_v25, 1.1754944e-38  ;;  %v2249_v38 = vmul.f32 %v1513_v33, %v2134_v32 }
 0x253   :  { %778 = vadd.xlane.f32.xlu1 %v2244_v34  ;;  %v728_v40 = vmax.f32 %v712_v36, 1.1754944e-38 }
 0x254   :  { %v2253_v26 = vmul.f32 %v2130_v56, %v737_v0  ;;  %v720_v46 = vsub.f32 1.0, %v2249_v38 }
 0x255   :  { %v2257_v1 = vmul.f32 %v2128_v27, %v728_v40 }
 0x256   :  { %784 = vadd.xlane.f32.xlu0 %v2253_v26  ;;  %v736_v16 = vmax.f32 %v720_v46, 1.1754944e-38 }
 0x257   :  { %766 = vadd.xlane.f32.xlu1 %v2257_v1 }
 0x258   :  { %v2262_v47 = vmul.f32 %v2134_v32, %v736_v16 }
 0x25b   :  { %782 = vadd.xlane.f32.xlu1 %v2262_v47 }
 0x2c2   :  { %v757_v48 = vpop.xlane.xlu0 %756 }
 0x2c3   :  { %v787_v29 = vmax.f32 %v757_v48, 1.1754944e-38 }
 0x2c5   :  { %1514 = vrcp.f32 %v787_v29 }
 0x2c6   :  { %v773_v56 = vpop.xlane.xlu0 %772 }
 0x2c7   :  { %v795_v11 = vmax.f32 %v773_v56, 1.1754944e-38  ;;  %v755_v51 = vpop.xlane.xlu1 %754 }
 0x2c8   :  { %v786_v52 = vmax.f32 %v755_v51, 1.1754944e-38 }
 0x2c9   :  { %1516 = vrcp.f32 %v795_v11 }
 0x2ca   :  { %1518 = vrcp.f32 %v786_v52 }
 0x2cb   :  { %v761_v27 = vpop.xlane.xlu0 %760 }
 0x2cc   :  { %v789_v15 = vmax.f32 %v761_v27, 1.1754944e-38  ;;  %v771_v37 = vpop.xlane.xlu1 %770 }
 0x2cd   :  { %v794_v61 = vmax.f32 %v771_v37, 1.1754944e-38 }
 0x2ce   :  { %1520 = vrcp.f32 %v789_v15 }
 0x2cf   :  { %v1515_v31 = vpop.eup %1514  ;;  %1522 = vrcp.f32 %v794_v61  ;;  %v777_v32 = vpop.xlane.xlu0 %776 }
 0x2d0   :  { %v797_v30 = vmax.f32 %v777_v32, 1.1754944e-38  ;;  %v2266_v2 = vmul.f32 %v1515_v31, %v2148_v55 }
 0x2d2   :  { %1524 = vrcp.f32 %v797_v30  ;;  %v851_v3 = vsub.f32 1.0, %v2266_v2 }
 0x2d3   :  { %v1517_v45 = vpop.eup %1516  ;;  %v759_v6 = vpop.xlane.xlu1 %758 }
 0x2d4   :  { %v1519_v8 = vpop.eup %1518  ;;  %v788_v4 = vmax.f32 %v759_v6, 1.1754944e-38  ;;  %v867_v42 = vmax.f32 %v851_v3, 1.1754944e-38  ;;  %v2270_v18 = vmul.f32 %v1517_v45, %v2157_v53 }
 0x2d5   :  { %v2273_v58 = vmul.f32 %v1519_v8, %v2163_v9 }
 0x2d6   :  { %1526 = vrcp.f32 %v788_v4  ;;  %v2276_v21 = vmul.f32 %v867_v42, %v2148_v55  ;;  %v859_v60 = vsub.f32 1.0, %v2270_v18 }
 0x2d7   :  { %v765_v24 = vpop.xlane.xlu0 %764  ;;  %v850_v25 = vsub.f32 1.0, %v2273_v58 }
 0x2d8   :  { %v1521_v33 = vpop.eup %1520  ;;  %v791_v36 = vmax.f32 %v765_v24, 1.1754944e-38  ;;  %v775_v0 = vpop.xlane.xlu1 %774  ;;  %900 = vadd.xlane.f32.xlu0 %v2276_v21  ;;  %v875_v40 = vmax.f32 %v859_v60, 1.1754944e-38 }
 0x2d9   :  { %v1523_v46 = vpop.eup %1522  ;;  %v796_v16 = vmax.f32 %v775_v0, 1.1754944e-38  ;;  %v866_v48 = vmax.f32 %v850_v25, 1.1754944e-38  ;;  %v2282_v29 = vmul.f32 %v1521_v33, %v2173_v23 }
 0x2da   :  { %1528 = vrcp.f32 %v791_v36  ;;  %v2285_v55 = vmul.f32 %v875_v40, %v2157_v53  ;;  %v2288_v56 = vmul.f32 %v1523_v46, %v2177_v35 }
 0x2db   :  { %1530 = vrcp.f32 %v796_v16  ;;  %v781_v11 = vpop.xlane.xlu0 %780  ;;  %v2291_v51 = vmul.f32 %v866_v48, %v2163_v9  ;;  %v853_v52 = vsub.f32 1.0, %v2282_v29 }
 0x2dc   :  { %v1525_v27 = vpop.eup %1524  ;;  %v799_v15 = vmax.f32 %v781_v11, 1.1754944e-38  ;;  %v763_v37 = vpop.xlane.xlu1 %762  ;;  %916 = vadd.xlane.f32.xlu0 %v2285_v55  ;;  %v858_v61 = vsub.f32 1.0, %v2288_v56 }
 0x2dd   :  { %v790_v31 = vmax.f32 %v763_v37, 1.1754944e-38  ;;  %898 = vadd.xlane.f32.xlu1 %v2291_v51  ;;  %v869_v53 = vmax.f32 %v853_v52, 1.1754944e-38  ;;  %v2298_v32 = vmul.f32 %v1525_v27, %v2185_v39 }
 0x2de   :  { %1532 = vrcp.f32 %v799_v15  ;;  %v874_v30 = vmax.f32 %v858_v61, 1.1754944e-38 }
 0x2df   :  { %1534 = vrcp.f32 %v790_v31  ;;  %v769_v9 = vpop.xlane.xlu0 %768  ;;  %v2301_v3 = vmul.f32 %v869_v53, %v2173_v23  ;;  %v861_v45 = vsub.f32 1.0, %v2298_v32 }
 0x2e0   :  { %v1527_v6 = vpop.eup %1526  ;;  %v793_v8 = vmax.f32 %v769_v9, 1.1754944e-38  ;;  %v779_v4 = vpop.xlane.xlu1 %778  ;;  %v2305_v42 = vmul.f32 %v874_v30, %v2177_v35 }
 0x2e1   :  { %v798_v60 = vmax.f32 %v779_v4, 1.1754944e-38  ;;  %904 = vadd.xlane.f32.xlu0 %v2301_v3  ;;  %v877_v24 = vmax.f32 %v861_v45, 1.1754944e-38  ;;  %v2309_v25 = vmul.f32 %v1527_v6, %v2196_v41 }
 0x2e2   :  { %1536 = vrcp.f32 %v793_v8  ;;  %914 = vadd.xlane.f32.xlu1 %v2305_v42 }
 0x2e3   :  { %1538 = vrcp.f32 %v798_v60  ;;  %v785_v23 = vpop.xlane.xlu0 %784  ;;  %v2313_v33 = vmul.f32 %v877_v24, %v2185_v39  ;;  %v852_v36 = vsub.f32 1.0, %v2309_v25 }
 0x2e4   :  { %v1529_v0 = vpop.eup %1528  ;;  %v801_v35 = vmax.f32 %v785_v23, 1.1754944e-38  ;;  %v767_v40 = vpop.xlane.xlu1 %766 }
 0x2e5   :  { %v1531_v46 = vpop.eup %1530  ;;  %v792_v16 = vmax.f32 %v767_v40, 1.1754944e-38  ;;  %920 = vadd.xlane.f32.xlu0 %v2313_v33  ;;  %v868_v48 = vmax.f32 %v852_v36, 1.1754944e-38  ;;  %v2318_v11 = vmul.f32 %v1529_v0, %v2208_v59 }
 0x2e6   :  { %1540 = vrcp.f32 %v801_v35  ;;  %v2321_v52 = vmul.f32 %v1531_v46, %v2212_v5 }
 0x2e7   :  { %1542 = vrcp.f32 %v792_v16  ;;  %v2324_v39 = vmul.f32 %v868_v48, %v2196_v41  ;;  %v855_v27 = vsub.f32 1.0, %v2318_v11 }
 0x2e8   :  { %v1533_v15 = vpop.eup %1532  ;;  %v783_v37 = vpop.xlane.xlu1 %782  ;;  %v860_v61 = vsub.f32 1.0, %v2321_v52 }
 0x2e9   :  { %v1535_v31 = vpop.eup %1534  ;;  %v800_v53 = vmax.f32 %v783_v37, 1.1754944e-38  ;;  %902 = vadd.xlane.f32.xlu1 %v2324_v39  ;;  %v871_v30 = vmax.f32 %v855_v27, 1.1754944e-38  ;;  %v2330_v9 = vmul.f32 %v1533_v15, %v2224_v17 }
 0x2ea   :  { %v876_v45 = vmax.f32 %v860_v61, 1.1754944e-38  ;;  %v2333_v6 = vmul.f32 %v1535_v31, %v2228_v12 }
 0x2eb   :  { %1544 = vrcp.f32 %v800_v53  ;;  %v2336_v41 = vmul.f32 %v871_v30, %v2208_v59  ;;  %v863_v8 = vsub.f32 1.0, %v2330_v9 }
 0x2ec   :  { %v1537_v4 = vpop.eup %1536  ;;  %v2340_v60 = vmul.f32 %v876_v45, %v2212_v5  ;;  %v854_v24 = vsub.f32 1.0, %v2333_v6 }
 0x2ed   :  { %v1539_v23 = vpop.eup %1538  ;;  %908 = vadd.xlane.f32.xlu0 %v2336_v41  ;;  %v879_v36 = vmax.f32 %v863_v8, 1.1754944e-38  ;;  %v2345_v0 = vmul.f32 %v1537_v4, %v2240_v57 }
 0x2ee   :  { %918 = vadd.xlane.f32.xlu1 %v2340_v60  ;;  %v870_v35 = vmax.f32 %v854_v24, 1.1754944e-38  ;;  %v2349_v59 = vmul.f32 %v1539_v23, %v2244_v34 }
 0x2ef   :  { %v2352_v40 = vmul.f32 %v879_v36, %v2224_v17  ;;  %v857_v5 = vsub.f32 1.0, %v2345_v0 }
 0x2f0   :  { %v1541_v46 = vpop.eup %1540  ;;  %v2356_v16 = vmul.f32 %v870_v35, %v2228_v12  ;;  %v862_v48 = vsub.f32 1.0, %v2349_v59 }
 0x2f1   :  { %v1543_v27 = vpop.eup %1542  ;;  %924 = vadd.xlane.f32.xlu0 %v2352_v40  ;;  %v873_v15 = vmax.f32 %v857_v5, 1.1754944e-38  ;;  %v2361_v37 = vmul.f32 %v1541_v46, %v2253_v26 }
 0x2f2   :  { %906 = vadd.xlane.f32.xlu1 %v2356_v16  ;;  %v878_v61 = vmax.f32 %v862_v48, 1.1754944e-38  ;;  %v2365_v17 = vmul.f32 %v1543_v27, %v2257_v1 }
 0x2f3   :  { %v2368_v31 = vmul.f32 %v873_v15, %v2240_v57  ;;  %v865_v12 = vsub.f32 1.0, %v2361_v37 }
 0x2f4   :  { %v2372_v53 = vmul.f32 %v878_v61, %v2244_v34  ;;  %v856_v30 = vsub.f32 1.0, %v2365_v17 }
 0x2f5   :  { %v1545_v45 = vpop.eup %1544  ;;  %912 = vadd.xlane.f32.xlu0 %v2368_v31  ;;  %v881_v8 = vmax.f32 %v865_v12, 1.1754944e-38 }
 0x2f6   :  { %922 = vadd.xlane.f32.xlu1 %v2372_v53  ;;  %v872_v4 = vmax.f32 %v856_v30, 1.1754944e-38  ;;  %v2378_v24 = vmul.f32 %v1545_v45, %v2262_v47 }
 0x2f7   :  { %v2381_v57 = vmul.f32 %v881_v8, %v2253_v26  ;;  %v835_v8 = vadd.f32 %v2266_v2, %v2138_v49  ;;  %v834_v49 = vadd.f32 %v2273_v58, %v2145_v44  ;;  %v837_v58 = vadd.f32 %v2282_v29, %v2154_v7 }
 0x2f8   :  { %v2384_v23 = vmul.f32 %v872_v4, %v2257_v1  ;;  %v864_v34 = vsub.f32 1.0, %v2378_v24 }
 0x2f9   :  { %928 = vadd.xlane.f32.xlu0 %v2381_v57 }
 0x2fa   :  { %910 = vadd.xlane.f32.xlu1 %v2384_v23  ;;  %v880_v36 = vmax.f32 %v864_v34, 1.1754944e-38 }
 0x2fc   :  { %v2390_v35 = vmul.f32 %v880_v36, %v2262_v47 }
 0x2fe   :  { %926 = vadd.xlane.f32.xlu1 %v2390_v35 }
 0x365   :  { %v901_v5 = vpop.xlane.xlu0 %900 }
 0x366   :  { %v931_v46 = vmax.f32 %v901_v5, 1.1754944e-38 }
 0x368   :  { %1546 = vrcp.f32 %v931_v46 }
 0x369   :  { %v917_v26 = vpop.xlane.xlu0 %916 }
 0x36a   :  { %v939_v48 = vmax.f32 %v917_v26, 1.1754944e-38  ;;  %v899_v27 = vpop.xlane.xlu1 %898 }
 0x36b   :  { %v930_v1 = vmax.f32 %v899_v27, 1.1754944e-38  ;;  %v843_v27 = vadd.f32 %v2270_v18, %v2142_v20 }
 0x36c   :  { %1548 = vrcp.f32 %v939_v48 }
 0x36d   :  { %1550 = vrcp.f32 %v930_v1 }
 0x36e   :  { %v905_v15 = vpop.xlane.xlu0 %904 }
 0x36f   :  { %v933_v61 = vmax.f32 %v905_v15, 1.1754944e-38  ;;  %v915_v12 = vpop.xlane.xlu1 %914 }
 0x370   :  { %v938_v30 = vmax.f32 %v915_v12, 1.1754944e-38 }
 0x371   :  { %1552 = vrcp.f32 %v933_v61 }
 0x372   :  { %v1547_v45 = vpop.eup %1546  ;;  %1554 = vrcp.f32 %v938_v30  ;;  %v921_v47 = vpop.xlane.xlu0 %920 }
 0x373   :  { %v941_v4 = vmax.f32 %v921_v47, 1.1754944e-38  ;;  %v963_v34 = vmul.f32 %v1547_v45, %v2276_v21 }
 0x375   :  { %1556 = vrcp.f32 %v941_v4  ;;  %v995_v36 = vsub.f32 1.0, %v963_v34  ;;  %v2396_v5 = vadd.f32 %v963_v34, %v835_v8 }
 0x376   :  { %v1549_v46 = vpop.eup %1548  ;;  %v903_v26 = vpop.xlane.xlu1 %902 }
 0x377   :  { %v1551_v48 = vpop.eup %1550  ;;  %v932_v1 = vmax.f32 %v903_v26, 1.1754944e-38  ;;  %v1011_v15 = vmax.f32 %v995_v36, 1.1754944e-38  ;;  %v971_v61 = vmul.f32 %v1549_v46, %v2285_v55 }
 0x378   :  { %v962_v2 = vmul.f32 %v1551_v48, %v2291_v51  ;;  %v842_v48 = vadd.f32 %v2288_v56, %v2160_v54 }
 0x379   :  { %1558 = vrcp.f32 %v932_v1  ;;  %v2405_v12 = vmul.f32 %v1011_v15, %v2276_v21  ;;  %v1003_v30 = vsub.f32 1.0, %v971_v61  ;;  %v2407_v45 = vadd.f32 %v971_v61, %v843_v27 }
 0x37a   :  { %v909_v47 = vpop.xlane.xlu0 %908  ;;  %v994_v8 = vsub.f32 1.0, %v962_v2  ;;  %v2409_v4 = vadd.f32 %v962_v2, %v834_v49 }
 0x37b   :  { %v1553_v20 = vpop.eup %1552  ;;  %v935_v18 = vmax.f32 %v909_v47, 1.1754944e-38  ;;  %v919_v34 = vpop.xlane.xlu1 %918  ;;  %1044 = vadd.xlane.f32.xlu0 %v2405_v12  ;;  %v1019_v36 = vmax.f32 %v1003_v30, 1.1754944e-38 }
 0x37c   :  { %v1555_v44 = vpop.eup %1554  ;;  %v940_v46 = vmax.f32 %v919_v34, 1.1754944e-38  ;;  %v1010_v21 = vmax.f32 %v994_v8, 1.1754944e-38  ;;  %v965_v26 = vmul.f32 %v1553_v20, %v2301_v3 }
 0x37d   :  { %1560 = vrcp.f32 %v935_v18  ;;  %v2418_v27 = vmul.f32 %v1019_v36, %v2285_v55  ;;  %v970_v1 = vmul.f32 %v1555_v44, %v2305_v42  ;;  %v845_v55 = vadd.f32 %v2298_v32, %v2170_v19 }
 0x37e   :  { %1562 = vrcp.f32 %v940_v46  ;;  %v925_v15 = vpop.xlane.xlu0 %924  ;;  %v2422_v61 = vmul.f32 %v1010_v21, %v2291_v51  ;;  %v997_v49 = vsub.f32 1.0, %v965_v26  ;;  %v2424_v7 = vadd.f32 %v965_v26, %v837_v58 }
 0x37f   :  { %v1557_v29 = vpop.eup %1556  ;;  %v943_v2 = vmax.f32 %v925_v15, 1.1754944e-38  ;;  %v907_v30 = vpop.xlane.xlu1 %906  ;;  %1060 = vadd.xlane.f32.xlu0 %v2418_v27  ;;  %v1002_v54 = vsub.f32 1.0, %v970_v1  ;;  %v2427_v56 = vadd.f32 %v970_v1, %v842_v48  ;;  %v836_v32 = vadd.f32 %v2309_v25, %v2181_v28 }
 0x380   :  { %v934_v47 = vmax.f32 %v907_v30, 1.1754944e-38  ;;  %1042 = vadd.xlane.f32.xlu1 %v2422_v61  ;;  %v1013_v8 = vmax.f32 %v997_v49, 1.1754944e-38  ;;  %v973_v51 = vmul.f32 %v1557_v29, %v2313_v33  ;;  %v839_v30 = vadd.f32 %v2318_v11, %v2190_v50 }
 0x381   :  { %1564 = vrcp.f32 %v943_v2  ;;  %v1018_v20 = vmax.f32 %v1002_v54, 1.1754944e-38 }
 0x382   :  { %1566 = vrcp.f32 %v934_v47  ;;  %v913_v18 = vpop.xlane.xlu0 %912  ;;  %v2434_v34 = vmul.f32 %v1013_v8, %v2301_v3  ;;  %v1005_v36 = vsub.f32 1.0, %v973_v51  ;;  %v2436_v44 = vadd.f32 %v973_v51, %v845_v55 }
 0x383   :  { %v1559_v58 = vpop.eup %1558  ;;  %v937_v46 = vmax.f32 %v913_v18, 1.1754944e-38  ;;  %v923_v21 = vpop.xlane.xlu1 %922  ;;  %v2439_v19 = vmul.f32 %v1018_v20, %v2305_v42 }
 0x384   :  { %v942_v26 = vmax.f32 %v923_v21, 1.1754944e-38  ;;  %1048 = vadd.xlane.f32.xlu0 %v2434_v34  ;;  %v1021_v48 = vmax.f32 %v1005_v36, 1.1754944e-38  ;;  %v964_v1 = vmul.f32 %v1559_v58, %v2324_v39  ;;  %v847_v21 = vadd.f32 %v2330_v9, %v2202_v63 }
 0x385   :  { %1568 = vrcp.f32 %v937_v46  ;;  %1058 = vadd.xlane.f32.xlu1 %v2439_v19 }
 0x386   :  { %1570 = vrcp.f32 %v942_v26  ;;  %v929_v3 = vpop.xlane.xlu0 %928  ;;  %v2447_v15 = vmul.f32 %v1021_v48, %v2313_v33  ;;  %v996_v49 = vsub.f32 1.0, %v964_v1  ;;  %v2449_v42 = vadd.f32 %v964_v1, %v836_v32 }
 0x387   :  { %v1561_v29 = vpop.eup %1560  ;;  %v945_v2 = vmax.f32 %v929_v3, 1.1754944e-38  ;;  %v911_v28 = vpop.xlane.xlu1 %910  ;;  %v844_v33 = vadd.f32 %v2321_v52, %v2193_v10 }
 0x388   :  { %v1563_v25 = vpop.eup %1562  ;;  %v936_v54 = vmax.f32 %v911_v28, 1.1754944e-38  ;;  %1064 = vadd.xlane.f32.xlu0 %v2447_v15  ;;  %v1012_v55 = vmax.f32 %v996_v49, 1.1754944e-38  ;;  %v967_v47 = vmul.f32 %v1561_v29, %v2336_v41 }
 0x389   :  { %1572 = vrcp.f32 %v945_v2  ;;  %v972_v8 = vmul.f32 %v1563_v25, %v2340_v60  ;;  %v846_v25 = vadd.f32 %v2349_v59, %v2221_v22  ;;  %v849_v22 = vadd.f32 %v2361_v37, %v2233_v14 }
 0x38a   :  { %1574 = vrcp.f32 %v936_v54  ;;  %v2459_v51 = vmul.f32 %v1012_v55, %v2324_v39  ;;  %v999_v20 = vsub.f32 1.0, %v967_v47  ;;  %v2461_v18 = vadd.f32 %v967_v47, %v839_v30 }
 0x38b   :  { %v1565_v50 = vpop.eup %1564  ;;  %v927_v11 = vpop.xlane.xlu1 %926  ;;  %v1004_v36 = vsub.f32 1.0, %v972_v8  ;;  %v2463_v58 = vadd.f32 %v972_v8, %v844_v33  ;;  %v838_v39 = vadd.f32 %v2333_v6, %v2205_v43  ;;  %v841_v43 = vadd.f32 %v2345_v0, %v2217_v13 }
 0x38c   :  { %v1567_v46 = vpop.eup %1566  ;;  %v944_v10 = vmax.f32 %v927_v11, 1.1754944e-38  ;;  %1046 = vadd.xlane.f32.xlu1 %v2459_v51  ;;  %v1015_v52 = vmax.f32 %v999_v20, 1.1754944e-38  ;;  %v975_v32 = vmul.f32 %v1565_v50, %v2352_v40  ;;  %v840_v50 = vadd.f32 %v2365_v17, %v2237_v62 }
 0x38d   :  { %v1020_v26 = vmax.f32 %v1004_v36, 1.1754944e-38  ;;  %v966_v48 = vmul.f32 %v1567_v46, %v2356_v16  ;;  %v848_v17 = vadd.f32 %v2378_v24, %v2249_v38 }
 0x38e   :  { %1576 = vrcp.f32 %v944_v10  ;;  %v2473_v1 = vmul.f32 %v1015_v52, %v2336_v41  ;;  %v1007_v3 = vsub.f32 1.0, %v975_v32  ;;  %v2475_v49 = vadd.f32 %v975_v32, %v847_v21 }
 0x38f   :  { %v1569_v63 = vpop.eup %1568  ;;  %v2478_v9 = vmul.f32 %v1020_v26, %v2340_v60  ;;  %v998_v29 = vsub.f32 1.0, %v966_v48  ;;  %v2480_v2 = vadd.f32 %v966_v48, %v838_v39 }
 0x390   :  { %v1571_v28 = vpop.eup %1570  ;;  %1052 = vadd.xlane.f32.xlu0 %v2473_v1  ;;  %v1023_v6 = vmax.f32 %v1007_v3, 1.1754944e-38  ;;  %v969_v41 = vmul.f32 %v1569_v63, %v2368_v31 }
 0x391   :  { %1062 = vadd.xlane.f32.xlu1 %v2478_v9  ;;  %v1014_v30 = vmax.f32 %v998_v29, 1.1754944e-38  ;;  %v974_v60 = vmul.f32 %v1571_v28, %v2372_v53 }
 0x392   :  { %v2491_v54 = vmul.f32 %v1023_v6, %v2352_v40  ;;  %v1001_v55 = vsub.f32 1.0, %v969_v41  ;;  %v2493_v47 = vadd.f32 %v969_v41, %v841_v43 }
 0x393   :  { %v1573_v13 = vpop.eup %1572  ;;  %v2496_v0 = vmul.f32 %v1014_v30, %v2356_v16  ;;  %v1006_v33 = vsub.f32 1.0, %v974_v60  ;;  %v2498_v8 = vadd.f32 %v974_v60, %v846_v25 }
 0x394   :  { %v1575_v20 = vpop.eup %1574  ;;  %1068 = vadd.xlane.f32.xlu0 %v2491_v54  ;;  %v1017_v59 = vmax.f32 %v1001_v55, 1.1754944e-38  ;;  %v977_v40 = vmul.f32 %v1573_v13, %v2381_v57 }
 0x395   :  { %1050 = vadd.xlane.f32.xlu1 %v2496_v0  ;;  %v1022_v11 = vmax.f32 %v1006_v33, 1.1754944e-38  ;;  %v968_v16 = vmul.f32 %v1575_v20, %v2384_v23 }
 0x396   :  { %v2509_v36 = vmul.f32 %v1017_v59, %v2368_v31  ;;  %v1009_v46 = vsub.f32 1.0, %v977_v40  ;;  %v2511_v21 = vadd.f32 %v977_v40, %v849_v22 }
 0x397   :  { %v2514_v14 = vmul.f32 %v1022_v11, %v2372_v53  ;;  %v1000_v37 = vsub.f32 1.0, %v968_v16  ;;  %v2516_v10 = vadd.f32 %v968_v16, %v840_v50 }
 0x398   :  { %v1577_v52 = vpop.eup %1576  ;;  %1056 = vadd.xlane.f32.xlu0 %v2509_v36  ;;  %v1025_v62 = vmax.f32 %v1009_v46, 1.1754944e-38 }
 0x399   :  { %1066 = vadd.xlane.f32.xlu1 %v2514_v14  ;;  %v1016_v31 = vmax.f32 %v1000_v37, 1.1754944e-38  ;;  %v976_v32 = vmul.f32 %v1577_v52, %v2390_v35 }
 0x39a   :  { %v2524_v39 = vmul.f32 %v1025_v62, %v2381_v57 }
 0x39b   :  { %v2527_v53 = vmul.f32 %v1016_v31, %v2384_v23  ;;  %v1008_v26 = vsub.f32 1.0, %v976_v32  ;;  %v2529_v48 = vadd.f32 %v976_v32, %v848_v17 }
 0x39c   :  { %1072 = vadd.xlane.f32.xlu0 %v2524_v39 }
 0x39d   :  { %1054 = vadd.xlane.f32.xlu1 %v2527_v53  ;;  %v1024_v3 = vmax.f32 %v1008_v26, 1.1754944e-38 }
 0x39f   :  { %v2534_v38 = vmul.f32 %v1024_v3, %v2390_v35 }
 0x3a1   :  { %1070 = vadd.xlane.f32.xlu1 %v2534_v38 }
 0x408   :  { %v1045_v24 = vpop.xlane.xlu0 %1044 }
 0x409   :  { %v1075_v63 = vmax.f32 %v1045_v24, 1.1754944e-38 }
 0x40b   :  { %1578 = vrcp.f32 %v1075_v63 }
 0x40c   :  { %v1061_v57 = vpop.xlane.xlu0 %1060 }
 0x40d   :  { %v1083_v29 = vmax.f32 %v1061_v57, 1.1754944e-38  ;;  %v1043_v23 = vpop.xlane.xlu1 %1042 }
 0x40e   :  { %v1074_v28 = vmax.f32 %v1043_v23, 1.1754944e-38 }
 0x40f   :  { %1580 = vrcp.f32 %v1083_v29 }
 0x410   :  { %1582 = vrcp.f32 %v1074_v28 }
 0x411   :  { %v1049_v43 = vpop.xlane.xlu0 %1048 }
 0x412   :  { %v1077_v6 = vmax.f32 %v1049_v43, 1.1754944e-38  ;;  %v1059_v41 = vpop.xlane.xlu1 %1058 }
 0x413   :  { %v1082_v25 = vmax.f32 %v1059_v41, 1.1754944e-38 }
 0x414   :  { %1584 = vrcp.f32 %v1077_v6 }
 0x415   :  { %v1579_v30 = vpop.eup %1578  ;;  %1586 = vrcp.f32 %v1082_v25  ;;  %v1065_v35 = vpop.xlane.xlu0 %1064 }
 0x416   :  { %v1085_v60 = vmax.f32 %v1065_v35, 1.1754944e-38  ;;  %v1107_v55 = vmul.f32 %v1579_v30, %v2405_v12 }
 0x418   :  { %1588 = vrcp.f32 %v1085_v60  ;;  %v1139_v13 = vsub.f32 1.0, %v1107_v55  ;;  %v2539_v33 = vadd.f32 %v1107_v55, %v2396_v5 }
 0x419   :  { %v1581_v20 = vpop.eup %1580  ;;  %v1047_v22 = vpop.xlane.xlu1 %1046 }
 0x41a   :  { %v1583_v59 = vpop.eup %1582  ;;  %v1076_v40 = vmax.f32 %v1047_v22, 1.1754944e-38  ;;  %v1155_v50 = vmax.f32 %v1139_v13, 1.1754944e-38  ;;  %v1115_v11 = vmul.f32 %v1581_v20, %v2418_v27 }
 0x41b   :  { %v1106_v16 = vmul.f32 %v1583_v59, %v2422_v61 }
 0x41c   :  { %1590 = vrcp.f32 %v1076_v40  ;;  %v2544_v46 = vmul.f32 %v1155_v50, %v2405_v12  ;;  %v1147_v37 = vsub.f32 1.0, %v1115_v11  ;;  %v2547_v52 = vadd.f32 %v1115_v11, %v2407_v45 }
 0x41d   :  { %v1053_v62 = vpop.xlane.xlu0 %1052  ;;  %v1138_v5 = vsub.f32 1.0, %v1106_v16  ;;  %v2550_v17 = vadd.f32 %v1106_v16, %v2409_v4 }
 0x41e   :  { %v1585_v31 = vpop.eup %1584  ;;  %v1079_v32 = vmax.f32 %v1053_v62, 1.1754944e-38  ;;  %v1063_v26 = vpop.xlane.xlu1 %1062  ;;  %1188 = vadd.xlane.f32.xlu0 %v2544_v46  ;;  %v1163_v3 = vmax.f32 %v1147_v37, 1.1754944e-38 }
 0x41f   :  { %v1587_v24 = vpop.eup %1586  ;;  %v1084_v63 = vmax.f32 %v1063_v26, 1.1754944e-38  ;;  %v1154_v57 = vmax.f32 %v1138_v5, 1.1754944e-38  ;;  %v1109_v12 = vmul.f32 %v1585_v31, %v2434_v34 }
 0x420   :  { %1592 = vrcp.f32 %v1079_v32  ;;  %v2555_v45 = vmul.f32 %v1163_v3, %v2418_v27  ;;  %v1114_v29 = vmul.f32 %v1587_v24, %v2439_v19 }
 0x421   :  { %1594 = vrcp.f32 %v1084_v63  ;;  %v1069_v4 = vpop.xlane.xlu0 %1068  ;;  %v2559_v23 = vmul.f32 %v1154_v57, %v2422_v61  ;;  %v1141_v28 = vsub.f32 1.0, %v1109_v12  ;;  %v2562_v43 = vadd.f32 %v1109_v12, %v2424_v7 }
 0x422   :  { %v1589_v6 = vpop.eup %1588  ;;  %v1087_v41 = vmax.f32 %v1069_v4, 1.1754944e-38  ;;  %v1051_v25 = vpop.xlane.xlu1 %1050  ;;  %1204 = vadd.xlane.f32.xlu0 %v2555_v45  ;;  %v1146_v30 = vsub.f32 1.0, %v1114_v29  ;;  %v2566_v27 = vadd.f32 %v1114_v29, %v2427_v56 }
 0x423   :  { %v1078_v35 = vmax.f32 %v1051_v25, 1.1754944e-38  ;;  %1186 = vadd.xlane.f32.xlu1 %v2559_v23  ;;  %v1157_v60 = vmax.f32 %v1141_v28, 1.1754944e-38  ;;  %v1117_v61 = vmul.f32 %v1589_v6, %v2447_v15 }
 0x424   :  { %1596 = vrcp.f32 %v1087_v41  ;;  %v1162_v55 = vmax.f32 %v1146_v30, 1.1754944e-38 }
 0x425   :  { %1598 = vrcp.f32 %v1078_v35  ;;  %v1057_v7 = vpop.xlane.xlu0 %1056  ;;  %v2571_v13 = vmul.f32 %v1157_v60, %v2434_v34  ;;  %v1149_v20 = vsub.f32 1.0, %v1117_v61  ;;  %v2574_v22 = vadd.f32 %v1117_v61, %v2436_v44 }
 0x426   :  { %v1591_v59 = vpop.eup %1590  ;;  %v1081_v56 = vmax.f32 %v1057_v7, 1.1754944e-38  ;;  %v1067_v40 = vpop.xlane.xlu1 %1066  ;;  %v2577_v50 = vmul.f32 %v1162_v55, %v2439_v19 }
 0x427   :  { %v1086_v11 = vmax.f32 %v1067_v40, 1.1754944e-38  ;;  %1192 = vadd.xlane.f32.xlu0 %v2571_v13  ;;  %v1165_v16 = vmax.f32 %v1149_v20, 1.1754944e-38  ;;  %v1108_v37 = vmul.f32 %v1591_v59, %v2459_v51 }
 0x428   :  { %1600 = vrcp.f32 %v1081_v56  ;;  %1202 = vadd.xlane.f32.xlu1 %v2577_v50 }
 0x429   :  { %1602 = vrcp.f32 %v1086_v11  ;;  %v1073_v34 = vpop.xlane.xlu0 %1072  ;;  %v2583_v44 = vmul.f32 %v1165_v16, %v2447_v15  ;;  %v1140_v62 = vsub.f32 1.0, %v1108_v37  ;;  %v2586_v5 = vadd.f32 %v1108_v37, %v2449_v42 }
 0x42a   :  { %v1593_v19 = vpop.eup %1592  ;;  %v1089_v31 = vmax.f32 %v1073_v34, 1.1754944e-38  ;;  %v1055_v32 = vpop.xlane.xlu1 %1054 }
 0x42b   :  { %v1595_v26 = vpop.eup %1594  ;;  %v1080_v3 = vmax.f32 %v1055_v32, 1.1754944e-38  ;;  %1208 = vadd.xlane.f32.xlu0 %v2583_v44  ;;  %v1156_v24 = vmax.f32 %v1140_v62, 1.1754944e-38  ;;  %v1111_v63 = vmul.f32 %v1593_v19, %v2473_v1 }
 0x42c   :  { %1604 = vrcp.f32 %v1089_v31  ;;  %v1116_v57 = vmul.f32 %v1595_v26, %v2478_v9 }
 0x42d   :  { %1606 = vrcp.f32 %v1080_v3  ;;  %v2592_v15 = vmul.f32 %v1156_v24, %v2459_v51  ;;  %v1143_v12 = vsub.f32 1.0, %v1111_v63  ;;  %v2595_v42 = vadd.f32 %v1111_v63, %v2461_v18 }
 0x42e   :  { %v1597_v29 = vpop.eup %1596  ;;  %v1071_v4 = vpop.xlane.xlu1 %1070  ;;  %v1148_v28 = vsub.f32 1.0, %v1116_v57  ;;  %v2598_v6 = vadd.f32 %v1116_v57, %v2463_v58 }
 0x42f   :  { %v1599_v41 = vpop.eup %1598  ;;  %v1088_v25 = vmax.f32 %v1071_v4, 1.1754944e-38  ;;  %1190 = vadd.xlane.f32.xlu1 %v2592_v15  ;;  %v1159_v30 = vmax.f32 %v1143_v12, 1.1754944e-38  ;;  %v1119_v35 = vmul.f32 %v1597_v29, %v2491_v54 }
 0x430   :  { %v1164_v60 = vmax.f32 %v1148_v28, 1.1754944e-38  ;;  %v1110_v51 = vmul.f32 %v1599_v41, %v2496_v0 }
 0x431   :  { %1608 = vrcp.f32 %v1088_v25  ;;  %v2604_v18 = vmul.f32 %v1159_v30, %v2473_v1  ;;  %v1151_v61 = vsub.f32 1.0, %v1119_v35  ;;  %v2607_v55 = vadd.f32 %v1119_v35, %v2475_v49 }
 0x432   :  { %v1601_v58 = vpop.eup %1600  ;;  %v2610_v7 = vmul.f32 %v1164_v60, %v2478_v9  ;;  %v1142_v20 = vsub.f32 1.0, %v1110_v51  ;;  %v2613_v59 = vadd.f32 %v1110_v51, %v2480_v2 }
 0x433   :  { %v1603_v56 = vpop.eup %1602  ;;  %1196 = vadd.xlane.f32.xlu0 %v2604_v18  ;;  %v1167_v40 = vmax.f32 %v1151_v61, 1.1754944e-38  ;;  %v1113_v11 = vmul.f32 %v1601_v58, %v2509_v36 }
 0x434   :  { %1206 = vadd.xlane.f32.xlu1 %v2610_v7  ;;  %v1158_v1 = vmax.f32 %v1142_v20, 1.1754944e-38  ;;  %v1118_v49 = vmul.f32 %v1603_v56, %v2514_v14 }
 0x435   :  { %v2620_v16 = vmul.f32 %v1167_v40, %v2491_v54  ;;  %v1145_v9 = vsub.f32 1.0, %v1113_v11  ;;  %v2623_v37 = vadd.f32 %v1113_v11, %v2493_v47 }
 0x436   :  { %v1605_v2 = vpop.eup %1604  ;;  %v2626_v34 = vmul.f32 %v1158_v1, %v2496_v0  ;;  %v1150_v62 = vsub.f32 1.0, %v1118_v49  ;;  %v2629_v19 = vadd.f32 %v1118_v49, %v2498_v8 }
 0x437   :  { %v1607_v31 = vpop.eup %1606  ;;  %1212 = vadd.xlane.f32.xlu0 %v2620_v16  ;;  %v1161_v32 = vmax.f32 %v1145_v9, 1.1754944e-38  ;;  %v1121_v26 = vmul.f32 %v1605_v2, %v2524_v39 }
 0x438   :  { %1194 = vadd.xlane.f32.xlu1 %v2626_v34  ;;  %v1166_v54 = vmax.f32 %v1150_v62, 1.1754944e-38  ;;  %v1112_v47 = vmul.f32 %v1607_v31, %v2527_v53 }
 0x439   :  { %v2636_v3 = vmul.f32 %v1161_v32, %v2509_v36  ;;  %v1153_v0 = vsub.f32 1.0, %v1121_v26  ;;  %v2639_v24 = vadd.f32 %v1121_v26, %v2511_v21 }
 0x43a   :  { %v2642_v8 = vmul.f32 %v1166_v54, %v2514_v14  ;;  %v1144_v63 = vsub.f32 1.0, %v1112_v47  ;;  %v2645_v57 = vadd.f32 %v1112_v47, %v2516_v10 }
 0x43b   :  { %v1609_v12 = vpop.eup %1608  ;;  %1200 = vadd.xlane.f32.xlu0 %v2636_v3  ;;  %v1169_v29 = vmax.f32 %v1153_v0, 1.1754944e-38 }
 0x43c   :  { %1210 = vadd.xlane.f32.xlu1 %v2642_v8  ;;  %v1160_v4 = vmax.f32 %v1144_v63, 1.1754944e-38  ;;  %v1120_v36 = vmul.f32 %v1609_v12, %v2534_v38 }
 0x43d   :  { %v2651_v28 = vmul.f32 %v1169_v29, %v2524_v39 }
 0x43e   :  { %v2654_v21 = vmul.f32 %v1160_v4, %v2527_v53  ;;  %v1152_v14 = vsub.f32 1.0, %v1120_v36  ;;  %v2657_v41 = vadd.f32 %v1120_v36, %v2529_v48 }
 0x43f   :  { %1216 = vadd.xlane.f32.xlu0 %v2651_v28 }
 0x440   :  { %1198 = vadd.xlane.f32.xlu1 %v2654_v21  ;;  %v1168_v10 = vmax.f32 %v1152_v14, 1.1754944e-38 }
 0x442   :  { %v2662_v25 = vmul.f32 %v1168_v10, %v2534_v38 }
 0x444   :  { %1214 = vadd.xlane.f32.xlu1 %v2662_v25 }
 0x445   :  { %1653 = shalt.err (!%p1650_p4)
}
 0x446   :  { %s1654_s16 = scalar_lea.hbm %s2732_s5, 2048 }
 0x447   :  { %p1655_p5 = scmp.ne.s32.totalorder %s2732_s5, %s1654_s16  ;;  %p1658_p6 = scmp.lt.u32.totalorder %s1654_s16, %s2732_s5 }
 0x449   :  { %p1660_p7 = pnand %p1658_p6, %p1655_p5 }
 0x44b   :  { %1663 = shalt.err (!%p1660_p7)
}
 0x44c   :  { %s1692_s21 = smov 128   ;;  %s1693_s22 = smov 8  }
 0x44d   :  { %1321 = dma.vmem_to_hbm [thread:$0]  %s1316_s3, 2048, %s2732_s5, [#allocation5], %s1692_s21, %s1692_s21, %s1693_s22  }
 0x44e   :  { %s1694_s5 = smov [#allocation2]  }
 0x44f   :  { %s1303_s25 = sshll.u32 %s1694_s5, 4  ;;  %s1304_s25 = int_to_ptr.vmem [resolvable:$true] %s1303_s25 }
 0x450   :  { %s1664_s26 = scalar_lea.vmem %s1304_s25, 2048  ;;  %p1669_p9 = scmp.lt.s32.totalorder %s1304_s25, %s1304_s25 }
 0x451   :  { %p1665_p8 = scmp.ne.s32.totalorder %s1304_s25, %s1664_s26  ;;  %p1670_p10 = scmp.lt.s32.totalorder %s1664_s26, %s1664_s26 }
 0x453   :  { %p1671_p11 = por %p1670_p10, %p1669_p9 }
 0x455   :  { %p1672_p12 = pnand %p1671_p11, %p1665_p8 }
 0x4ab   :  { %v1189_v39 = vpop.xlane.xlu0 %1188 }
 0x4ac   :  { %v1219_v53 = vmax.f32 %v1189_v39, 1.1754944e-38 }
 0x4ae   :  { %1610 = vrcp.f32 %v1219_v53 }
 0x4af   :  { %v1205_v48 = vpop.xlane.xlu0 %1204 }
 0x4b0   :  { %v1227_v38 = vmax.f32 %v1205_v48, 1.1754944e-38  ;;  %v1187_v30 = vpop.xlane.xlu1 %1186 }
 0x4b1   :  { %v1218_v35 = vmax.f32 %v1187_v30, 1.1754944e-38 }
 0x4b2   :  { %1612 = vrcp.f32 %v1227_v38 }
 0x4b3   :  { %1614 = vrcp.f32 %v1218_v35 }
 0x4b4   :  { %v1193_v60 = vpop.xlane.xlu0 %1192 }
 0x4b5   :  { %v1221_v51 = vmax.f32 %v1193_v60, 1.1754944e-38  ;;  %v1203_v61 = vpop.xlane.xlu1 %1202 }
 0x4b6   :  { %v1226_v58 = vmax.f32 %v1203_v61, 1.1754944e-38 }
 0x4b7   :  { %1616 = vrcp.f32 %v1221_v51 }
 0x4b8   :  { %v1611_v20 = vpop.eup %1610  ;;  %1618 = vrcp.f32 %v1226_v58  ;;  %v1209_v56 = vpop.xlane.xlu0 %1208 }
 0x4b9   :  { %v1251_v40 = vmul.f32 %v1611_v20, %v2544_v46  ;;  %v1229_v11 = vmax.f32 %v1209_v56, 1.1754944e-38 }
 0x4bb   :  { %v1267_v1 = vadd.f32 %v1251_v40, %v2539_v33  ;;  %1620 = vrcp.f32 %v1229_v11 }
 0x4bc   :  { %v1613_v49 = vpop.eup %1612  ;;  %v1191_v9 = vpop.xlane.xlu1 %1190 }
 0x4bd   :  { %v1615_v2 = vpop.eup %1614  ;;  %1283 = vst [vmem:[#allocation2 + $0x8] sm:$0xff] %v1267_v1  ;;  %v1259_v62 = vmul.f32 %v1613_v49, %v2555_v45  ;;  %v1220_v31 = vmax.f32 %v1191_v9, 1.1754944e-38 }
 0x4be   :  { %v1250_v32 = vmul.f32 %v1615_v2, %v2559_v23 }
 0x4bf   :  { %v1275_v26 = vadd.f32 %v1259_v62, %v2547_v52  ;;  %1622 = vrcp.f32 %v1220_v31 }
 0x4c0   :  { %v1266_v54 = vadd.f32 %v1250_v32, %v2550_v17  ;;  %v1197_v47 = vpop.xlane.xlu0 %1196 }
 0x4c1   :  { %v1617_v46 = vpop.eup %1616  ;;  %1291 = vst [vmem:[#allocation2 + $0x48] sm:$0xff] %v1275_v26  ;;  %v1223_v0 = vmax.f32 %v1197_v47, 1.1754944e-38  ;;  %v1207_v33 = vpop.xlane.xlu1 %1206 }
 0x4c2   :  { %v1619_v63 = vpop.eup %1618  ;;  %1282 = vst [vmem:[#allocation2] sm:$0xff] %v1266_v54  ;;  %v1253_v12 = vmul.f32 %v1617_v46, %v2571_v13  ;;  %v1228_v29 = vmax.f32 %v1207_v33, 1.1754944e-38 }
 0x4c3   :  { %v1258_v45 = vmul.f32 %v1619_v63, %v2577_v50  ;;  %1624 = vrcp.f32 %v1223_v0 }
 0x4c4   :  { %v1269_v23 = vadd.f32 %v1253_v12, %v2562_v43  ;;  %1626 = vrcp.f32 %v1228_v29  ;;  %v1213_v52 = vpop.xlane.xlu0 %1212 }
 0x4c5   :  { %v1621_v4 = vpop.eup %1620  ;;  %v1274_v17 = vadd.f32 %v1258_v45, %v2566_v27  ;;  %v1231_v36 = vmax.f32 %v1213_v52, 1.1754944e-38  ;;  %v1195_v14 = vpop.xlane.xlu1 %1194 }
 0x4c6   :  { %1285 = vst [vmem:[#allocation2 + $0x18] sm:$0xff] %v1269_v23  ;;  %v1261_v10 = vmul.f32 %v1621_v4, %v2583_v44  ;;  %v1222_v39 = vmax.f32 %v1195_v14, 1.1754944e-38 }
 0x4c7   :  { %1290 = vst [vmem:[#allocation2 + $0x40] sm:$0xff] %v1274_v17  ;;  %1628 = vrcp.f32 %v1231_v36 }
 0x4c8   :  { %v1277_v13 = vadd.f32 %v1261_v10, %v2574_v22  ;;  %1630 = vrcp.f32 %v1222_v39  ;;  %v1201_v50 = vpop.xlane.xlu0 %1200 }
 0x4c9   :  { %v1623_v53 = vpop.eup %1622  ;;  %v1225_v48 = vmax.f32 %v1201_v50, 1.1754944e-38  ;;  %v1211_v43 = vpop.xlane.xlu1 %1210 }
 0x4ca   :  { %1293 = vst [vmem:[#allocation2 + $0x58] sm:$0xff] %v1277_v13  ;;  %v1252_v38 = vmul.f32 %v1623_v53, %v2592_v15  ;;  %v1230_v30 = vmax.f32 %v1211_v43, 1.1754944e-38 }
 0x4cb   :  { %1632 = vrcp.f32 %v1225_v48 }
 0x4cc   :  { %v1268_v27 = vadd.f32 %v1252_v38, %v2586_v5  ;;  %1634 = vrcp.f32 %v1230_v30  ;;  %v1217_v35 = vpop.xlane.xlu0 %1216 }
 0x4cd   :  { %v1625_v44 = vpop.eup %1624  ;;  %v1233_v60 = vmax.f32 %v1217_v35, 1.1754944e-38  ;;  %v1199_v51 = vpop.xlane.xlu1 %1198 }
 0x4ce   :  { %v1627_v61 = vpop.eup %1626  ;;  %1284 = vst [vmem:[#allocation2 + $0x10] sm:$0xff] %v1268_v27  ;;  %v1255_v22 = vmul.f32 %v1625_v44, %v2604_v18  ;;  %v1224_v58 = vmax.f32 %v1199_v51, 1.1754944e-38 }
 0x4cf   :  { %v1260_v20 = vmul.f32 %v1627_v61, %v2610_v7  ;;  %1636 = vrcp.f32 %v1233_v60 }
 0x4d0   :  { %v1271_v56 = vadd.f32 %v1255_v22, %v2595_v42  ;;  %1638 = vrcp.f32 %v1224_v58 }
 0x4d1   :  { %v1629_v15 = vpop.eup %1628  ;;  %v1276_v40 = vadd.f32 %v1260_v20, %v2598_v6  ;;  %v1215_v5 = vpop.xlane.xlu1 %1214 }
 0x4d2   :  { %v1631_v11 = vpop.eup %1630  ;;  %1287 = vst [vmem:[#allocation2 + $0x28] sm:$0xff] %v1271_v56  ;;  %v1263_v1 = vmul.f32 %v1629_v15, %v2620_v16  ;;  %v1232_v49 = vmax.f32 %v1215_v5, 1.1754944e-38 }
 0x4d3   :  { %1292 = vst [vmem:[#allocation2 + $0x50] sm:$0xff] %v1276_v40  ;;  %v1254_v9 = vmul.f32 %v1631_v11, %v2626_v34 }
 0x4d4   :  { %v1279_v18 = vadd.f32 %v1263_v1, %v2607_v55  ;;  %1640 = vrcp.f32 %v1232_v49 }
 0x4d5   :  { %v1633_v7 = vpop.eup %1632  ;;  %v1270_v2 = vadd.f32 %v1254_v9, %v2613_v59 }
 0x4d6   :  { %v1635_v42 = vpop.eup %1634  ;;  %1295 = vst [vmem:[#allocation2 + $0x68] sm:$0xff] %v1279_v18  ;;  %v1257_v62 = vmul.f32 %v1633_v7, %v2636_v3 }
 0x4d7   :  { %1286 = vst [vmem:[#allocation2 + $0x20] sm:$0xff] %v1270_v2  ;;  %v1262_v6 = vmul.f32 %v1635_v42, %v2642_v8 }
 0x4d8   :  { %v1273_v31 = vadd.f32 %v1257_v62, %v2623_v37 }
 0x4d9   :  { %v1637_v16 = vpop.eup %1636  ;;  %v1278_v32 = vadd.f32 %v1262_v6, %v2629_v19 }
 0x4da   :  { %v1639_v26 = vpop.eup %1638  ;;  %1289 = vst [vmem:[#allocation2 + $0x38] sm:$0xff] %v1273_v31  ;;  %v1265_v55 = vmul.f32 %v1637_v16, %v2651_v28 }
 0x4db   :  { %1294 = vst [vmem:[#allocation2 + $0x60] sm:$0xff] %v1278_v32  ;;  %v1256_v34 = vmul.f32 %v1639_v26, %v2654_v21 }
 0x4dc   :  { %v1281_v59 = vadd.f32 %v1265_v55, %v2639_v24 }
 0x4dd   :  { %v1272_v54 = vadd.f32 %v1256_v34, %v2645_v57 }
 0x4de   :  { %v1641_v3 = vpop.eup %1640  ;;  %1297 = vst [vmem:[#allocation2 + $0x78] sm:$0xff] %v1281_v59 }
 0x4df   :  { %1288 = vst [vmem:[#allocation2 + $0x30] sm:$0xff] %v1272_v54  ;;  %v1264_v37 = vmul.f32 %v1641_v3, %v2662_v25 }
 0x4e1   :  { %v1280_v19 = vadd.f32 %v1264_v37, %v2657_v41 }
 0x4e3   :  { %1296 = vst [vmem:[#allocation2 + $0x70] sm:$0xff] %v1280_v19 }
 0x4e4   :  { %1675 = shalt.err (!%p1672_p12)
}
 0x4e5   :  { %s1676_s28 = scalar_lea.hbm %s2731_s4, 2048 }
 0x4e6   :  { %p1677_p13 = scmp.ne.s32.totalorder %s2731_s4, %s1676_s28  ;;  %p1680_p0 = scmp.lt.u32.totalorder %s1676_s28, %s2731_s4 }
 0x4e8   :  { %p1682_p1 = pnand %p1680_p0, %p1677_p13 }
 0x4ea   :  { %1685 = shalt.err (!%p1682_p1)
}
 0x4eb   :  { %1309 = dma.vmem_to_hbm [thread:$0]  %s1304_s25, 2048, %s2731_s4, [#allocation3], %s1692_s21, %s1692_s21, %s1693_s22  }
 0x4ec   :  { %1686 = dma.done.wait [#allocation3], 2048  }
 0x4ed   :  { %1687 = vsyncadd [#allocation3], 4294965248 }
 0x4ee   :  { %1688 = dma.done.wait [#allocation5], 2048  }
 0x4ef   :  { %1689 = vsyncadd [#allocation5], 4294965248 }
 0x4f0   :  { %1328 = vsyncpa [#allocation3], 1 }
 0x4f1   :  { %1329 = vsyncpa [#allocation5], 1 }

</bundles_post_ra>
